<compile_context>
chip_gen: v7x
topology: tpu7x:2x2x1
jax: 0.10.0
libtpu: 0.0.40
codegen_flags: <defaults>
</compile_context>

<pallas_src>
import math
import functools

import jax
import jax.numpy as jnp
from jax.experimental import pallas as pl
from jax.experimental.pallas import tpu as pltpu


# ----------------------------- in-kernel helpers -----------------------------

def _sigmoid(x):
    return 1.0 / (1.0 + jnp.exp(-x))


def _silu(x):
    return x * _sigmoid(x)


def _layernorm(x, eps):
    # PyTorch nn.LayerNorm(elementwise_affine=False): biased variance over last dim.
    mu = jnp.mean(x, axis=-1, keepdims=True)
    var = jnp.mean((x - mu) * (x - mu), axis=-1, keepdims=True)
    return (x - mu) * jax.lax.rsqrt(var + eps)


def _erf(x):
    # Abramowitz & Stegun 7.1.26 polynomial, |err| < 1.5e-7 in exact arithmetic.
    # TODO(synk): used instead of lax.erf since native erf lowering in Mosaic is not guaranteed.
    a1, a2, a3, a4, a5 = 0.254829592, -0.284496736, 1.421413741, -1.453152027, 1.061405429
    p = 0.3275911
    ax = jnp.abs(x)
    # Divide moved to the EUP slot (approx reciprocal) per perf review.
    t = pl.reciprocal(1.0 + p * ax, approx=True)
    poly = ((((a5 * t + a4) * t + a3) * t + a2) * t + a1) * t
    y = 1.0 - poly * jnp.exp(-ax * ax)
    return jnp.where(x >= 0.0, y, -y)


def _gelu_exact(x):
    # Matches PyTorch nn.GELU() (approximate='none'): 0.5*x*(1+erf(x/sqrt(2)))
    return 0.5 * x * (1.0 + _erf(x * 0.7071067811865476))


# -------------------- fully fused DiT_diff forward kernel ---------------------

def dit_kernel(x_ref, xh_ref, tf_ref, ym_ref,
               inw_ref, inb_ref, xinw_ref, xinb_ref,
               tw1_ref, tb1_ref, tw2_ref, tb2_ref,
               yw1_ref, yb1_ref, yw2_ref, yb2_ref, yw3_ref, yb3_ref,
               hmask_ref, seg_ref, segt_ref,
               wada_ref, bada_ref, wqkv_ref, bqkv_ref,
               wproj_ref, bproj_ref, wfc1_ref, bfc1_ref, wfc2_ref, bfc2_ref,
               wada_f_ref, bada_f_ref, wlin_ref, blin_ref,
               out_ref, x_state, csilu_state, *, num_heads):
    i = pl.program_id(0)
    depth = pl.num_programs(0)

    # ---- step 0: fused embedders -> VMEM-resident x and silu(c) ----
    @pl.when(i == 0)
    def _():
        xe = jnp.dot(x_ref[...], inw_ref[...],
                     preferred_element_type=jnp.float32) + inb_ref[...]
        xhe = jnp.dot(xh_ref[...], xinw_ref[...],
                      preferred_element_type=jnp.float32) + xinb_ref[...]
        x_state[...] = jnp.concatenate([xe, xhe], axis=-1)

        # TimestepEmbedder MLP: Linear -> SiLU -> Linear
        t1 = _silu(jnp.dot(tf_ref[...], tw1_ref[...],
                           preferred_element_type=jnp.float32) + tb1_ref[...])
        t2 = jnp.dot(t1, tw2_ref[...],
                     preferred_element_type=jnp.float32) + tb2_ref[...]

        # SimpleMLP on mean(y): fc1-relu, fc2-relu, fc3
        y1 = jnp.maximum(jnp.dot(ym_ref[...], yw1_ref[...],
                                 preferred_element_type=jnp.float32) + yb1_ref[...], 0.0)
        y2 = jnp.maximum(jnp.dot(y1, yw2_ref[...],
                                 preferred_element_type=jnp.float32) + yb2_ref[...], 0.0)
        y3 = jnp.dot(y2, yw3_ref[...],
                     preferred_element_type=jnp.float32) + yb3_ref[...]

        # silu(c) is all any downstream consumer needs (adaLN branches).
        csilu_state[...] = _silu(t2 + y3)

    x = x_state[...]
    silu_c = csilu_state[...].astype(jnp.bfloat16)

    n, d = x.shape
    hd = d // num_heads
    attn_scale = float(hd) ** (-0.5)
    eps = 1e-4   # matches reference nn.LayerNorm(..., eps=0.0001)

    # adaLN_modulation: SiLU(c) @ W + b, chunk into 6 along features.
    mod = jnp.dot(silu_c, wada_ref[...],
                  preferred_element_type=jnp.float32) + bada_ref[...]
    shift_msa = mod[:, 0 * d:1 * d]
    scale_msa = mod[:, 1 * d:2 * d]
    gate_msa = mod[:, 2 * d:3 * d]
    shift_mlp = mod[:, 3 * d:4 * d]
    scale_mlp = mod[:, 4 * d:5 * d]
    gate_mlp = mod[:, 5 * d:6 * d]

    # ---- attention branch: modulate(norm1(x)) -> Attention2 (fused heads) ----
    h = _layernorm(x, eps) * (1.0 + scale_msa) + shift_msa
    qkv = jnp.dot(h.astype(jnp.bfloat16), wqkv_ref[...],
                  preferred_element_type=jnp.float32) + bqkv_ref[...]
    q = qkv[:, 0 * d:1 * d]
    k = qkv[:, 1 * d:2 * d]
    v = qkv[:, 2 * d:3 * d]

    # "Stacked heads" attention: replicate K/V along sublanes (heads copies),
    # zero out features outside each copy's head with the precomputed
    # block-diagonal mask.  Row r = h*n + m of k_wide/v_wide holds token m,
    # restricted to head h's feature lanes.
    hmask = hmask_ref[...]                                           # (heads*n, d)
    k_wide = (jnp.concatenate([k] * num_heads, axis=0) * hmask).astype(jnp.bfloat16)
    v_wide = (jnp.concatenate([v] * num_heads, axis=0) * hmask).astype(jnp.bfloat16)

    # Scores: one NT matmul -> s2[nq, h*n + m] = q_h[nq] . k_h[m]
    s2 = jax.lax.dot_general(q.astype(jnp.bfloat16), k_wide,
                             (((1,), (1,)), ((), ())),
                             preferred_element_type=jnp.float32) * attn_scale
    # Per-query global max is a valid constant shift for every per-head softmax
    # row (it does not depend on the key index m).
    s2 = s2 - jnp.max(s2, axis=-1, keepdims=True)
    e2 = jnp.exp(s2)                                                 # (n, heads*n)
    # Per-head normalization via segment-sum / segment-broadcast matmuls.
    seg_sum = jnp.dot(e2, seg_ref[...], preferred_element_type=jnp.float32)     # (n, heads)
    inv = pl.reciprocal(seg_sum, approx=True)
    inv_wide = jnp.dot(inv, segt_ref[...], preferred_element_type=jnp.float32)  # (n, heads*n)
    p2 = (e2 * inv_wide).astype(jnp.bfloat16)
    # PV: one matmul; v_wide's mask routes each head's weights to its own lanes,
    # so the result is already the concatenated-heads layout.
    attn = jnp.dot(p2, v_wide, preferred_element_type=jnp.float32)   # (n, d)

    attn_out = jnp.dot(attn.astype(jnp.bfloat16), wproj_ref[...],
                       preferred_element_type=jnp.float32) + bproj_ref[...]
    x = x + gate_msa * attn_out

    # ---- MLP branch: modulate(norm2(x)) -> fc1 -> GELU(exact) -> fc2 ----
    h2 = _layernorm(x, eps) * (1.0 + scale_mlp) + shift_mlp
    h2 = jnp.dot(h2.astype(jnp.bfloat16), wfc1_ref[...],
                 preferred_element_type=jnp.float32) + bfc1_ref[...]
    h2 = _gelu_exact(h2)
    h2 = jnp.dot(h2.astype(jnp.bfloat16), wfc2_ref[...],
                 preferred_element_type=jnp.float32) + bfc2_ref[...]
    x = x + gate_mlp * h2

    x_state[...] = x

    # ---- FinalLayer folded into the last block iteration ----
    # Output is lane-dense (n, 128); sliced to (n, st_in) in the wrapper.
    @pl.when(i == depth - 1)
    def _():
        modf = jnp.dot(silu_c, wada_f_ref[...],
                       preferred_element_type=jnp.float32) + bada_f_ref[...]
        shift = modf[:, 0:d]
        scale = modf[:, d:2 * d]
        hf = _layernorm(x, eps) * (1.0 + scale) + shift
        y = jnp.dot(hf.astype(jnp.bfloat16), wlin_ref[...],
                    preferred_element_type=jnp.float32) + blin_ref[...]
        out_ref[...] = y.astype(out_ref.dtype)


def dit_diff_fused(params, x, x_hat, t_freq, y_mean, num_heads):
    n, st_in = x.shape
    co_in = x_hat.shape[1]
    hidden = params["in_w"].shape[1]
    d = params["t_w2"].shape[1]
    dh = params["wfc1"].shape[2]
    depth = params["wada"].shape[0]
    freq = t_freq.shape[1]
    assert d % num_heads == 0, "dim must be divisible by num_heads"
    hd = d // num_heads

    # Constant matrices for the stacked-heads attention (built once, hoisted).
    row_head = jnp.arange(num_heads * n, dtype=jnp.int32) // n        # head of stacked row
    col_head = jnp.arange(d, dtype=jnp.int32) // hd                   # head of feature lane
    head_mask = (row_head[:, None] == col_head[None, :]).astype(jnp.float32)       # (heads*n, d)
    seg = (row_head[:, None] ==
           jnp.arange(num_heads, dtype=jnp.int32)[None, :]).astype(jnp.float32)    # (heads*n, heads)
    seg_t = seg.T                                                                   # (heads, heads*n)

    # Lane-dense padded FinalLayer weights.
    wlin = params["final"]["wlin"]
    blin = params["final"]["blin"]
    st = wlin.shape[1]
    pad = (-st) % 128
    n_out = st + pad
    wlin_p = jnp.pad(wlin, ((0, 0), (0, pad)))
    blin_p = jnp.pad(blin, ((0, 0), (0, pad)))

    const2 = lambda i: (0, 0)
    stack3 = lambda i: (i, 0, 0)

    # Deeper weight pipelining only pays off for long stacks (v5e HBM BW);
    # skipped for short stacks where 2 buffers already cover the grid.
    stack_kwargs = {}
    if depth >= 3:
        stack_kwargs = dict(pipeline_mode=pl.Buffered(3))

    def sspec(shape):
        return pl.BlockSpec(shape, stack3, **stack_kwargs)

    grid_spec = pltpu.PrefetchScalarGridSpec(
        num_scalar_prefetch=0,
        grid=(depth,),
        in_specs=[
            pl.BlockSpec((n, st_in), const2),                 # x
            pl.BlockSpec((n, co_in), const2),                 # x_hat
            pl.BlockSpec((n, freq), const2),                  # t_freq
            pl.BlockSpec((n, co_in), const2),                 # mean(y)
            pl.BlockSpec((st_in, hidden), const2),            # in_layer W
            pl.BlockSpec((1, hidden), const2),                # in_layer b
            pl.BlockSpec((co_in, hidden), const2),            # x_in_layer W
            pl.BlockSpec((1, hidden), const2),                # x_in_layer b
            pl.BlockSpec((freq, d), const2),                  # time-MLP W1
            pl.BlockSpec((1, d), const2),                     # time-MLP b1
            pl.BlockSpec((d, d), const2),                     # time-MLP W2
            pl.BlockSpec((1, d), const2),                     # time-MLP b2
            pl.BlockSpec((co_in, hidden), const2),            # y-MLP W1
            pl.BlockSpec((1, hidden), const2),                # y-MLP b1
            pl.BlockSpec((hidden, hidden), const2),           # y-MLP W2
            pl.BlockSpec((1, hidden), const2),                # y-MLP b2
            pl.BlockSpec((hidden, d), const2),                # y-MLP W3
            pl.BlockSpec((1, d), const2),                     # y-MLP b3
            pl.BlockSpec((num_heads * n, d), const2),         # head block mask
            pl.BlockSpec((num_heads * n, num_heads), const2), # segment-sum matrix
            pl.BlockSpec((num_heads, num_heads * n), const2), # segment-broadcast matrix
            sspec((None, d, 6 * d)),                          # wada   (stacked)
            sspec((None, 1, 6 * d)),                          # bada
            sspec((None, d, 3 * d)),                          # wqkv
            sspec((None, 1, 3 * d)),                          # bqkv
            sspec((None, d, d)),                              # wproj
            sspec((None, 1, d)),                              # bproj
            sspec((None, d, dh)),                             # wfc1
            sspec((None, 1, dh)),                             # bfc1
            sspec((None, dh, d)),                             # wfc2
            sspec((None, 1, d)),                              # bfc2
            pl.BlockSpec((d, 2 * d), const2),                 # final adaLN W
            pl.BlockSpec((1, 2 * d), const2),                 # final adaLN b
            pl.BlockSpec((d, n_out), const2),                 # final linear W (padded)
            pl.BlockSpec((1, n_out), const2),                 # final linear b (padded)
        ],
        out_specs=pl.BlockSpec((n, n_out), const2),
        scratch_shapes=[pltpu.VMEM((n, d), jnp.float32),      # resident activation x
                        pltpu.VMEM((n, d), jnp.float32)],     # resident silu(c)
    )

    out = pl.pallas_call(
        functools.partial(dit_kernel, num_heads=num_heads),
        out_shape=jax.ShapeDtypeStruct((n, n_out), jnp.float32),
        grid_spec=grid_spec,
        compiler_params=pltpu.CompilerParams(
            dimension_semantics=("arbitrary",),
            # Explicit limit: ~2 MiB working set today; 32 MiB leaves headroom on
            # every generation and stays below v7x's 64 MiB physical VMEM.
            vmem_limit_bytes=32 * 1024 * 1024),
    )(x, x_hat, t_freq, y_mean,
      params["in_w"], params["in_b"], params["xin_w"], params["xin_b"],
      params["t_w1"], params["t_b1"], params["t_w2"], params["t_b2"],
      params["y_w1"], params["y_b1"], params["y_w2"], params["y_b2"],
      params["y_w3"], params["y_b3"],
      head_mask, seg, seg_t,
      params["wada"], params["bada"], params["wqkv"], params["bqkv"],
      params["wproj"], params["bproj"], params["wfc1"], params["bfc1"],
      params["wfc2"], params["bfc2"],
      params["final"]["wada"], params["final"]["bada"], wlin_p, blin_p)

    return out[:, :st]


# ------------------------------ plain-JAX glue --------------------------------

def timestep_embedding(t, dim, max_period=10000):
    half = dim // 2
    freqs = jnp.exp(-math.log(max_period) * jnp.arange(half, dtype=jnp.float32) / half)
    args = t[:, None].astype(jnp.float32) * freqs[None, :]
    return jnp.concatenate([jnp.cos(args), jnp.sin(args)], axis=-1)


def dit_diff_forward(params, x, x_hat, t, y, num_heads):
    t_freq = timestep_embedding(t, 256)
    y_mean = jnp.mean(y.astype(jnp.float32), axis=1)
    return dit_diff_fused(params, x.astype(jnp.float32), x_hat.astype(jnp.float32),
                          t_freq, y_mean, num_heads)


# ------------------------------ parameter setup --------------------------------

def init_params(key, st_in, condi_in, hidden, depth, mlp_ratio=4.0):
    d = 2 * hidden
    dh = int(d * mlp_ratio)
    keys = iter(jax.random.split(key, 64))

    def lin(fan_in, fan_out, dtype=jnp.float32, stack=None):
        a = math.sqrt(6.0 / (fan_in + fan_out))  # xavier-uniform
        wshape = (fan_in, fan_out) if stack is None else (stack, fan_in, fan_out)
        bshape = (1, fan_out) if stack is None else (stack, 1, fan_out)
        w = jax.random.uniform(next(keys), wshape, jnp.float32, -a, a).astype(dtype)
        b = jnp.zeros(bshape, jnp.float32)
        return w, b

    p = {}
    # Embedder / condition branch (tiny; kept f32).
    p["in_w"], p["in_b"] = lin(st_in, hidden)
    p["xin_w"], p["xin_b"] = lin(condi_in, hidden)
    p["t_w1"], p["t_b1"] = lin(256, d)
    p["t_w2"], p["t_b2"] = lin(d, d)
    p["y_w1"], p["y_b1"] = lin(condi_in, hidden)
    p["y_w2"], p["y_b2"] = lin(hidden, hidden)
    p["y_w3"], p["y_b3"] = lin(hidden, d)

    # Stacked per-block weights (bf16 MXU operands, f32 biases / accumulation).
    # NOTE: PyTorch zero-inits adaLN (and FinalLayer); random here (deterministic)
    # to exercise compute — use zeros for exact forward parity with the reference.
    p["wada"], p["bada"] = lin(d, 6 * d, jnp.bfloat16, depth)
    p["wqkv"], p["bqkv"] = lin(d, 3 * d, jnp.bfloat16, depth)
    p["wproj"], p["bproj"] = lin(d, d, jnp.bfloat16, depth)
    p["wfc1"], p["bfc1"] = lin(d, dh, jnp.bfloat16, depth)
    p["wfc2"], p["bfc2"] = lin(dh, d, jnp.bfloat16, depth)

    fin = {}
    fin["wada"], fin["bada"] = lin(d, 2 * d, jnp.bfloat16)   # PyTorch zero-inits; random here.
    fin["wlin"], fin["blin"] = lin(d, st_in, jnp.bfloat16)   # PyTorch zero-inits; random here.
    p["final"] = fin
    return p


# ----------------------------------- main --------------------------------------

if __name__ == "__main__":
    # Small, forward-consistent shapes:
    #   st_input_size=16, condi_input_size=12, hidden_size=64 (-> block dim 128),
    #   num_heads=8 (head_dim 16), depth=2, batch N=8, y sequence length L=4.
    N, ST, CO, H, DEPTH, HEADS, L = 8, 16, 12, 64, 2, 8, 4

    key = jax.random.PRNGKey(0)
    k1, k2, k3, k4, kp = jax.random.split(key, 5)
    x = jax.random.normal(k1, (N, ST), jnp.float32)
    x_hat = jax.random.normal(k2, (N, CO), jnp.float32)
    t = jax.random.uniform(k3, (N,), jnp.float32, 0.0, 1000.0)
    y = jax.random.normal(k4, (N, L, CO), jnp.float32)

    params = init_params(kp, ST, CO, H, DEPTH)

    fwd = jax.jit(dit_diff_forward, static_argnames=("num_heads",))
    out = fwd(params, x, x_hat, t, y, num_heads=HEADS)
    out = jax.block_until_ready(out)
    assert out.shape == (N, ST) and out.dtype == jnp.float32
    assert bool(jnp.all(jnp.isfinite(out)))
    print("KERNEL_OK")
</pallas_src>

<mosaic_0001>
module attributes {stable_mosaic.version = 11 : i64} {
  func.func @dit_kernel(%arg0: i32, %arg1: memref<8x16xf32, #tpu.memory_space<vmem>>, %arg2: memref<8x12xf32, #tpu.memory_space<vmem>>, %arg3: memref<8x256xf32, #tpu.memory_space<vmem>>, %arg4: memref<8x12xf32, #tpu.memory_space<vmem>>, %arg5: memref<16x64xf32, #tpu.memory_space<vmem>>, %arg6: memref<1x64xf32, #tpu.memory_space<vmem>>, %arg7: memref<12x64xf32, #tpu.memory_space<vmem>>, %arg8: memref<1x64xf32, #tpu.memory_space<vmem>>, %arg9: memref<256x128xf32, #tpu.memory_space<vmem>>, %arg10: memref<1x128xf32, #tpu.memory_space<vmem>>, %arg11: memref<128x128xf32, #tpu.memory_space<vmem>>, %arg12: memref<1x128xf32, #tpu.memory_space<vmem>>, %arg13: memref<12x64xf32, #tpu.memory_space<vmem>>, %arg14: memref<1x64xf32, #tpu.memory_space<vmem>>, %arg15: memref<64x64xf32, #tpu.memory_space<vmem>>, %arg16: memref<1x64xf32, #tpu.memory_space<vmem>>, %arg17: memref<64x128xf32, #tpu.memory_space<vmem>>, %arg18: memref<1x128xf32, #tpu.memory_space<vmem>>, %arg19: memref<64x128xf32, #tpu.memory_space<vmem>>, %arg20: memref<64x8xf32, #tpu.memory_space<vmem>>, %arg21: memref<8x64xf32, #tpu.memory_space<vmem>>, %arg22: memref<1x128x768xbf16, #tpu.memory_space<vmem>>, %arg23: memref<1x1x768xf32, #tpu.memory_space<vmem>>, %arg24: memref<1x128x384xbf16, #tpu.memory_space<vmem>>, %arg25: memref<1x1x384xf32, #tpu.memory_space<vmem>>, %arg26: memref<1x128x128xbf16, #tpu.memory_space<vmem>>, %arg27: memref<1x1x128xf32, #tpu.memory_space<vmem>>, %arg28: memref<1x128x512xbf16, #tpu.memory_space<vmem>>, %arg29: memref<1x1x512xf32, #tpu.memory_space<vmem>>, %arg30: memref<1x512x128xbf16, #tpu.memory_space<vmem>>, %arg31: memref<1x1x128xf32, #tpu.memory_space<vmem>>, %arg32: memref<128x256xbf16, #tpu.memory_space<vmem>>, %arg33: memref<1x256xf32, #tpu.memory_space<vmem>>, %arg34: memref<128x128xbf16, #tpu.memory_space<vmem>>, %arg35: memref<1x128xf32, #tpu.memory_space<vmem>>, %arg36: memref<8x128xf32, #tpu.memory_space<vmem>>, %arg37: memref<8x128xf32, #tpu.memory_space<vmem>>, %arg38: memref<8x128xf32, #tpu.memory_space<vmem>>) attributes {dimension_semantics = [#tpu.dimension_semantics<arbitrary>], iteration_bounds = array<i64: 2>, scalar_prefetch = 0 : i64, scratch_operands = 2 : i64, tpu.core_type = #tpu.core_type<tc>, window_params = [{pipeline_mode = #tpu.pipeline_mode<synchronous>, transform_indices = @transform_0, window_bounds = array<i64: 8, 16>}, {pipeline_mode = #tpu.pipeline_mode<synchronous>, transform_indices = @transform_1, window_bounds = array<i64: 8, 12>}, {pipeline_mode = #tpu.pipeline_mode<synchronous>, transform_indices = @transform_2, window_bounds = array<i64: 8, 256>}, {pipeline_mode = #tpu.pipeline_mode<synchronous>, transform_indices = @transform_3, window_bounds = array<i64: 8, 12>}, {pipeline_mode = #tpu.pipeline_mode<synchronous>, transform_indices = @transform_4, window_bounds = array<i64: 16, 64>}, {pipeline_mode = #tpu.pipeline_mode<synchronous>, transform_indices = @transform_5, window_bounds = array<i64: 1, 64>}, {pipeline_mode = #tpu.pipeline_mode<synchronous>, transform_indices = @transform_6, window_bounds = array<i64: 12, 64>}, {pipeline_mode = #tpu.pipeline_mode<synchronous>, transform_indices = @transform_7, window_bounds = array<i64: 1, 64>}, {pipeline_mode = #tpu.pipeline_mode<synchronous>, transform_indices = @transform_8, window_bounds = array<i64: 256, 128>}, {pipeline_mode = #tpu.pipeline_mode<synchronous>, transform_indices = @transform_9, window_bounds = array<i64: 1, 128>}, {pipeline_mode = #tpu.pipeline_mode<synchronous>, transform_indices = @transform_10, window_bounds = array<i64: 128, 128>}, {pipeline_mode = #tpu.pipeline_mode<synchronous>, transform_indices = @transform_11, window_bounds = array<i64: 1, 128>}, {pipeline_mode = #tpu.pipeline_mode<synchronous>, transform_indices = @transform_12, window_bounds = array<i64: 12, 64>}, {pipeline_mode = #tpu.pipeline_mode<synchronous>, transform_indices = @transform_13, window_bounds = array<i64: 1, 64>}, {pipeline_mode = #tpu.pipeline_mode<synchronous>, transform_indices = @transform_14, window_bounds = array<i64: 64, 64>}, {pipeline_mode = #tpu.pipeline_mode<synchronous>, transform_indices = @transform_15, window_bounds = array<i64: 1, 64>}, {pipeline_mode = #tpu.pipeline_mode<synchronous>, transform_indices = @transform_16, window_bounds = array<i64: 64, 128>}, {pipeline_mode = #tpu.pipeline_mode<synchronous>, transform_indices = @transform_17, window_bounds = array<i64: 1, 128>}, {pipeline_mode = #tpu.pipeline_mode<synchronous>, transform_indices = @transform_18, window_bounds = array<i64: 64, 128>}, {pipeline_mode = #tpu.pipeline_mode<synchronous>, transform_indices = @transform_19, window_bounds = array<i64: 64, 8>}, {pipeline_mode = #tpu.pipeline_mode<synchronous>, transform_indices = @transform_20, window_bounds = array<i64: 8, 64>}, {transform_indices = @transform_21, window_bounds = array<i64: 1, 128, 768>}, {transform_indices = @transform_22, window_bounds = array<i64: 1, 1, 768>}, {transform_indices = @transform_23, window_bounds = array<i64: 1, 128, 384>}, {transform_indices = @transform_24, window_bounds = array<i64: 1, 1, 384>}, {transform_indices = @transform_25, window_bounds = array<i64: 1, 128, 128>}, {transform_indices = @transform_26, window_bounds = array<i64: 1, 1, 128>}, {transform_indices = @transform_27, window_bounds = array<i64: 1, 128, 512>}, {transform_indices = @transform_28, window_bounds = array<i64: 1, 1, 512>}, {transform_indices = @transform_29, window_bounds = array<i64: 1, 512, 128>}, {transform_indices = @transform_30, window_bounds = array<i64: 1, 1, 128>}, {pipeline_mode = #tpu.pipeline_mode<synchronous>, transform_indices = @transform_31, window_bounds = array<i64: 128, 256>}, {pipeline_mode = #tpu.pipeline_mode<synchronous>, transform_indices = @transform_32, window_bounds = array<i64: 1, 256>}, {pipeline_mode = #tpu.pipeline_mode<synchronous>, transform_indices = @transform_33, window_bounds = array<i64: 128, 128>}, {pipeline_mode = #tpu.pipeline_mode<synchronous>, transform_indices = @transform_34, window_bounds = array<i64: 1, 128>}, {pipeline_mode = #tpu.pipeline_mode<synchronous>, transform_indices = @transform_35, window_bounds = array<i64: 8, 128>}]} {
    %c0_i32 = arith.constant 0 : i32
    %0 = arith.cmpi eq, %arg0, %c0_i32 : i32
    %1 = arith.extui %0 : i1 to i32
    %c0_i32_0 = arith.constant 0 : i32
    %2 = arith.cmpi ne, %1, %c0_i32_0 : i32
    scf.if %2 {
      %c0_79 = arith.constant 0 : index
      %c0_80 = arith.constant 0 : index
      %173 = vector.load %arg1[%c0_79, %c0_80] : memref<8x16xf32, #tpu.memory_space<vmem>>, vector<8x16xf32>
      %c0_81 = arith.constant 0 : index
      %c0_82 = arith.constant 0 : index
      %174 = vector.load %arg5[%c0_81, %c0_82] : memref<16x64xf32, #tpu.memory_space<vmem>>, vector<16x64xf32>
      %cst_83 = arith.constant dense<0.000000e+00> : vector<8x64xf32>
      %175 = tpu.matmul %173, %174, %cst_83 {dimension_numbers = #tpu.dot_dimension_numbers<[1], [0], [0], [1], [0, 0, 1, 1], [], []>} : vector<8x16xf32>, vector<16x64xf32>, vector<8x64xf32> -> vector<8x64xf32>
      %c0_84 = arith.constant 0 : index
      %c0_85 = arith.constant 0 : index
      %176 = vector.load %arg6[%c0_84, %c0_85] : memref<1x64xf32, #tpu.memory_space<vmem>>, vector<1x64xf32>
      %177 = vector.broadcast %176 : vector<1x64xf32> to vector<8x64xf32>
      %178 = arith.addf %175, %177 : vector<8x64xf32>
      %c0_86 = arith.constant 0 : index
      %c0_87 = arith.constant 0 : index
      %179 = vector.load %arg2[%c0_86, %c0_87] : memref<8x12xf32, #tpu.memory_space<vmem>>, vector<8x12xf32>
      %c0_88 = arith.constant 0 : index
      %c0_89 = arith.constant 0 : index
      %180 = vector.load %arg7[%c0_88, %c0_89] : memref<12x64xf32, #tpu.memory_space<vmem>>, vector<12x64xf32>
      %cst_90 = arith.constant dense<0.000000e+00> : vector<8x64xf32>
      %181 = tpu.matmul %179, %180, %cst_90 {dimension_numbers = #tpu.dot_dimension_numbers<[1], [0], [0], [1], [0, 0, 1, 1], [], []>} : vector<8x12xf32>, vector<12x64xf32>, vector<8x64xf32> -> vector<8x64xf32>
      %c0_91 = arith.constant 0 : index
      %c0_92 = arith.constant 0 : index
      %182 = vector.load %arg8[%c0_91, %c0_92] : memref<1x64xf32, #tpu.memory_space<vmem>>, vector<1x64xf32>
      %183 = vector.broadcast %182 : vector<1x64xf32> to vector<8x64xf32>
      %184 = arith.addf %181, %183 : vector<8x64xf32>
      %185 = tpu.concatenate %178, %184 in 1 : vector<8x64xf32>, vector<8x64xf32> -> vector<8x128xf32>
      %c0_93 = arith.constant 0 : index
      %c0_94 = arith.constant 0 : index
      %186 = vector.load %arg37[%c0_93, %c0_94] : memref<8x128xf32, #tpu.memory_space<vmem>>, vector<8x128xf32>
      tpu.vector_store %arg37[%c0_93, %c0_94], %185 {strides = array<i32>} : memref<8x128xf32, #tpu.memory_space<vmem>>, vector<8x128xf32>,
      %c0_95 = arith.constant 0 : index
      %c0_96 = arith.constant 0 : index
      %187 = vector.load %arg3[%c0_95, %c0_96] : memref<8x256xf32, #tpu.memory_space<vmem>>, vector<8x256xf32>
      %c0_97 = arith.constant 0 : index
      %c0_98 = arith.constant 0 : index
      %188 = vector.load %arg9[%c0_97, %c0_98] : memref<256x128xf32, #tpu.memory_space<vmem>>, vector<256x128xf32>
      %cst_99 = arith.constant dense<0.000000e+00> : vector<8x128xf32>
      %189 = tpu.matmul %187, %188, %cst_99 {dimension_numbers = #tpu.dot_dimension_numbers<[1], [0], [0], [1], [0, 0, 1, 1], [], []>} : vector<8x256xf32>, vector<256x128xf32>, vector<8x128xf32> -> vector<8x128xf32>
      %c0_100 = arith.constant 0 : index
      %c0_101 = arith.constant 0 : index
      %190 = vector.load %arg10[%c0_100, %c0_101] : memref<1x128xf32, #tpu.memory_space<vmem>>, vector<1x128xf32>
      %191 = vector.broadcast %190 : vector<1x128xf32> to vector<8x128xf32>
      %192 = arith.addf %189, %191 : vector<8x128xf32>
      %cst_102 = arith.constant 0.000000e+00 : f32
      %193 = vector.broadcast %cst_102 : f32 to vector<8x128xf32>
      %194 = arith.subf %193, %192 : vector<8x128xf32>
      %195 = math.exp %194 : vector<8x128xf32>
      %cst_103 = arith.constant 1.000000e+00 : f32
      %196 = vector.broadcast %cst_103 : f32 to vector<8x128xf32>
      %197 = arith.addf %196, %195 : vector<8x128xf32>
      %cst_104 = arith.constant 1.000000e+00 : f32
      %198 = vector.broadcast %cst_104 : f32 to vector<8x128xf32>
      %199 = arith.divf %198, %197 : vector<8x128xf32>
      %200 = arith.mulf %192, %199 : vector<8x128xf32>
      %c0_105 = arith.constant 0 : index
      %c0_106 = arith.constant 0 : index
      %201 = vector.load %arg11[%c0_105, %c0_106] : memref<128x128xf32, #tpu.memory_space<vmem>>, vector<128x128xf32>
      %cst_107 = arith.constant dense<0.000000e+00> : vector<8x128xf32>
      %202 = tpu.matmul %200, %201, %cst_107 {dimension_numbers = #tpu.dot_dimension_numbers<[1], [0], [0], [1], [0, 0, 1, 1], [], []>} : vector<8x128xf32>, vector<128x128xf32>, vector<8x128xf32> -> vector<8x128xf32>
      %c0_108 = arith.constant 0 : index
      %c0_109 = arith.constant 0 : index
      %203 = vector.load %arg12[%c0_108, %c0_109] : memref<1x128xf32, #tpu.memory_space<vmem>>, vector<1x128xf32>
      %204 = vector.broadcast %203 : vector<1x128xf32> to vector<8x128xf32>
      %205 = arith.addf %202, %204 : vector<8x128xf32>
      %c0_110 = arith.constant 0 : index
      %c0_111 = arith.constant 0 : index
      %206 = vector.load %arg4[%c0_110, %c0_111] : memref<8x12xf32, #tpu.memory_space<vmem>>, vector<8x12xf32>
      %c0_112 = arith.constant 0 : index
      %c0_113 = arith.constant 0 : index
      %207 = vector.load %arg13[%c0_112, %c0_113] : memref<12x64xf32, #tpu.memory_space<vmem>>, vector<12x64xf32>
      %cst_114 = arith.constant dense<0.000000e+00> : vector<8x64xf32>
      %208 = tpu.matmul %206, %207, %cst_114 {dimension_numbers = #tpu.dot_dimension_numbers<[1], [0], [0], [1], [0, 0, 1, 1], [], []>} : vector<8x12xf32>, vector<12x64xf32>, vector<8x64xf32> -> vector<8x64xf32>
      %c0_115 = arith.constant 0 : index
      %c0_116 = arith.constant 0 : index
      %209 = vector.load %arg14[%c0_115, %c0_116] : memref<1x64xf32, #tpu.memory_space<vmem>>, vector<1x64xf32>
      %210 = vector.broadcast %209 : vector<1x64xf32> to vector<8x64xf32>
      %211 = arith.addf %208, %210 : vector<8x64xf32>
      %cst_117 = arith.constant 0.000000e+00 : f32
      %212 = vector.broadcast %cst_117 : f32 to vector<8x64xf32>
      %213 = arith.maximumf %211, %212 : vector<8x64xf32>
      %c0_118 = arith.constant 0 : index
      %c0_119 = arith.constant 0 : index
      %214 = vector.load %arg15[%c0_118, %c0_119] : memref<64x64xf32, #tpu.memory_space<vmem>>, vector<64x64xf32>
      %cst_120 = arith.constant dense<0.000000e+00> : vector<8x64xf32>
      %215 = tpu.matmul %213, %214, %cst_120 {dimension_numbers = #tpu.dot_dimension_numbers<[1], [0], [0], [1], [0, 0, 1, 1], [], []>} : vector<8x64xf32>, vector<64x64xf32>, vector<8x64xf32> -> vector<8x64xf32>
      %c0_121 = arith.constant 0 : index
      %c0_122 = arith.constant 0 : index
      %216 = vector.load %arg16[%c0_121, %c0_122] : memref<1x64xf32, #tpu.memory_space<vmem>>, vector<1x64xf32>
      %217 = vector.broadcast %216 : vector<1x64xf32> to vector<8x64xf32>
      %218 = arith.addf %215, %217 : vector<8x64xf32>
      %cst_123 = arith.constant 0.000000e+00 : f32
      %219 = vector.broadcast %cst_123 : f32 to vector<8x64xf32>
      %220 = arith.maximumf %218, %219 : vector<8x64xf32>
      %c0_124 = arith.constant 0 : index
      %c0_125 = arith.constant 0 : index
      %221 = vector.load %arg17[%c0_124, %c0_125] : memref<64x128xf32, #tpu.memory_space<vmem>>, vector<64x128xf32>
      %cst_126 = arith.constant dense<0.000000e+00> : vector<8x128xf32>
      %222 = tpu.matmul %220, %221, %cst_126 {dimension_numbers = #tpu.dot_dimension_numbers<[1], [0], [0], [1], [0, 0, 1, 1], [], []>} : vector<8x64xf32>, vector<64x128xf32>, vector<8x128xf32> -> vector<8x128xf32>
      %c0_127 = arith.constant 0 : index
      %c0_128 = arith.constant 0 : index
      %223 = vector.load %arg18[%c0_127, %c0_128] : memref<1x128xf32, #tpu.memory_space<vmem>>, vector<1x128xf32>
      %224 = vector.broadcast %223 : vector<1x128xf32> to vector<8x128xf32>
      %225 = arith.addf %222, %224 : vector<8x128xf32>
      %226 = arith.addf %205, %225 : vector<8x128xf32>
      %cst_129 = arith.constant 0.000000e+00 : f32
      %227 = vector.broadcast %cst_129 : f32 to vector<8x128xf32>
      %228 = arith.subf %227, %226 : vector<8x128xf32>
      %229 = math.exp %228 : vector<8x128xf32>
      %cst_130 = arith.constant 1.000000e+00 : f32
      %230 = vector.broadcast %cst_130 : f32 to vector<8x128xf32>
      %231 = arith.addf %230, %229 : vector<8x128xf32>
      %cst_131 = arith.constant 1.000000e+00 : f32
      %232 = vector.broadcast %cst_131 : f32 to vector<8x128xf32>
      %233 = arith.divf %232, %231 : vector<8x128xf32>
      %234 = arith.mulf %226, %233 : vector<8x128xf32>
      %c0_132 = arith.constant 0 : index
      %c0_133 = arith.constant 0 : index
      %235 = vector.load %arg38[%c0_132, %c0_133] : memref<8x128xf32, #tpu.memory_space<vmem>>, vector<8x128xf32>
      tpu.vector_store %arg38[%c0_132, %c0_133], %234 {strides = array<i32>} : memref<8x128xf32, #tpu.memory_space<vmem>>, vector<8x128xf32>,
    } else {
    }
    %c0 = arith.constant 0 : index
    %c0_1 = arith.constant 0 : index
    %3 = vector.load %arg37[%c0, %c0_1] : memref<8x128xf32, #tpu.memory_space<vmem>>, vector<8x128xf32>
    %c0_2 = arith.constant 0 : index
    %c0_3 = arith.constant 0 : index
    %4 = vector.load %arg38[%c0_2, %c0_3] : memref<8x128xf32, #tpu.memory_space<vmem>>, vector<8x128xf32>
    %5 = arith.truncf %4 : vector<8x128xf32> to vector<8x128xbf16>
    %c0_4 = arith.constant 0 : index
    %c0_5 = arith.constant 0 : index
    %c0_6 = arith.constant 0 : index
    %6 = vector.load %arg22[%c0_4, %c0_5, %c0_6] : memref<1x128x768xbf16, #tpu.memory_space<vmem>>, vector<1x128x768xbf16>
    %7 = vector.shape_cast %6 : vector<1x128x768xbf16> to vector<128x768xbf16>
    %cst = arith.constant dense<0.000000e+00> : vector<8x768xf32>
    %8 = tpu.matmul %5, %7, %cst {dimension_numbers = #tpu.dot_dimension_numbers<[1], [0], [0], [1], [0, 0, 1, 1], [], []>} : vector<8x128xbf16>, vector<128x768xbf16>, vector<8x768xf32> -> vector<8x768xf32>
    %c0_7 = arith.constant 0 : index
    %c0_8 = arith.constant 0 : index
    %c0_9 = arith.constant 0 : index
    %9 = vector.load %arg23[%c0_7, %c0_8, %c0_9] : memref<1x1x768xf32, #tpu.memory_space<vmem>>, vector<1x1x768xf32>
    %10 = vector.shape_cast %9 : vector<1x1x768xf32> to vector<1x768xf32>
    %11 = vector.broadcast %10 : vector<1x768xf32> to vector<8x768xf32>
    %12 = arith.addf %8, %11 : vector<8x768xf32>
    %13 = vector.extract_strided_slice %12 {offsets = [0, 0], sizes = [8, 128], strides = [1, 1]} : vector<8x768xf32> to vector<8x128xf32>
    %14 = vector.extract_strided_slice %12 {offsets = [0, 128], sizes = [8, 128], strides = [1, 1]} : vector<8x768xf32> to vector<8x128xf32>
    %15 = vector.extract_strided_slice %12 {offsets = [0, 256], sizes = [8, 128], strides = [1, 1]} : vector<8x768xf32> to vector<8x128xf32>
    %16 = vector.extract_strided_slice %12 {offsets = [0, 384], sizes = [8, 128], strides = [1, 1]} : vector<8x768xf32> to vector<8x128xf32>
    %17 = vector.extract_strided_slice %12 {offsets = [0, 512], sizes = [8, 128], strides = [1, 1]} : vector<8x768xf32> to vector<8x128xf32>
    %18 = vector.extract_strided_slice %12 {offsets = [0, 640], sizes = [8, 128], strides = [1, 1]} : vector<8x768xf32> to vector<8x128xf32>
    %cst_10 = arith.constant dense<0.000000e+00> : vector<8xf32>
    %19 = vector.multi_reduction <add>, %3, %cst_10 [1] : vector<8x128xf32> to vector<8xf32>
    %20 = vector.shape_cast %19 : vector<8xf32> to vector<8x1xf32>
    %cst_11 = arith.constant 1.280000e+02 : f32
    %21 = vector.broadcast %cst_11 : f32 to vector<8x1xf32>
    %22 = arith.divf %20, %21 : vector<8x1xf32>
    %23 = vector.broadcast %22 : vector<8x1xf32> to vector<8x128xf32>
    %24 = arith.subf %3, %23 : vector<8x128xf32>
    %25 = vector.broadcast %22 : vector<8x1xf32> to vector<8x128xf32>
    %26 = arith.subf %3, %25 : vector<8x128xf32>
    %27 = arith.mulf %24, %26 : vector<8x128xf32>
    %cst_12 = arith.constant dense<0.000000e+00> : vector<8xf32>
    %28 = vector.multi_reduction <add>, %27, %cst_12 [1] : vector<8x128xf32> to vector<8xf32>
    %29 = vector.shape_cast %28 : vector<8xf32> to vector<8x1xf32>
    %cst_13 = arith.constant 1.280000e+02 : f32
    %30 = vector.broadcast %cst_13 : f32 to vector<8x1xf32>
    %31 = arith.divf %29, %30 : vector<8x1xf32>
    %32 = vector.broadcast %22 : vector<8x1xf32> to vector<8x128xf32>
    %33 = arith.subf %3, %32 : vector<8x128xf32>
    %cst_14 = arith.constant 9.99999974E-5 : f32
    %34 = vector.broadcast %cst_14 : f32 to vector<8x1xf32>
    %35 = arith.addf %31, %34 : vector<8x1xf32>
    %36 = math.rsqrt %35 : vector<8x1xf32>
    %37 = vector.broadcast %36 : vector<8x1xf32> to vector<8x128xf32>
    %38 = arith.mulf %33, %37 : vector<8x128xf32>
    %cst_15 = arith.constant 1.000000e+00 : f32
    %39 = vector.broadcast %cst_15 : f32 to vector<8x128xf32>
    %40 = arith.addf %39, %14 : vector<8x128xf32>
    %41 = arith.mulf %38, %40 : vector<8x128xf32>
    %42 = arith.addf %41, %13 : vector<8x128xf32>
    %43 = arith.truncf %42 : vector<8x128xf32> to vector<8x128xbf16>
    %c0_16 = arith.constant 0 : index
    %c0_17 = arith.constant 0 : index
    %c0_18 = arith.constant 0 : index
    %44 = vector.load %arg24[%c0_16, %c0_17, %c0_18] : memref<1x128x384xbf16, #tpu.memory_space<vmem>>, vector<1x128x384xbf16>
    %45 = vector.shape_cast %44 : vector<1x128x384xbf16> to vector<128x384xbf16>
    %cst_19 = arith.constant dense<0.000000e+00> : vector<8x384xf32>
    %46 = tpu.matmul %43, %45, %cst_19 {dimension_numbers = #tpu.dot_dimension_numbers<[1], [0], [0], [1], [0, 0, 1, 1], [], []>} : vector<8x128xbf16>, vector<128x384xbf16>, vector<8x384xf32> -> vector<8x384xf32>
    %c0_20 = arith.constant 0 : index
    %c0_21 = arith.constant 0 : index
    %c0_22 = arith.constant 0 : index
    %47 = vector.load %arg25[%c0_20, %c0_21, %c0_22] : memref<1x1x384xf32, #tpu.memory_space<vmem>>, vector<1x1x384xf32>
    %48 = vector.shape_cast %47 : vector<1x1x384xf32> to vector<1x384xf32>
    %49 = vector.broadcast %48 : vector<1x384xf32> to vector<8x384xf32>
    %50 = arith.addf %46, %49 : vector<8x384xf32>
    %51 = vector.extract_strided_slice %50 {offsets = [0, 0], sizes = [8, 128], strides = [1, 1]} : vector<8x384xf32> to vector<8x128xf32>
    %52 = vector.extract_strided_slice %50 {offsets = [0, 128], sizes = [8, 128], strides = [1, 1]} : vector<8x384xf32> to vector<8x128xf32>
    %53 = vector.extract_strided_slice %50 {offsets = [0, 256], sizes = [8, 128], strides = [1, 1]} : vector<8x384xf32> to vector<8x128xf32>
    %c0_23 = arith.constant 0 : index
    %c0_24 = arith.constant 0 : index
    %54 = vector.load %arg19[%c0_23, %c0_24] : memref<64x128xf32, #tpu.memory_space<vmem>>, vector<64x128xf32>
    %55 = tpu.concatenate %52, %52, %52, %52, %52, %52, %52, %52 in 0 : vector<8x128xf32>, vector<8x128xf32>, vector<8x128xf32>, vector<8x128xf32>, vector<8x128xf32>, vector<8x128xf32>, vector<8x128xf32>, vector<8x128xf32> -> vector<64x128xf32>
    %56 = arith.mulf %55, %54 : vector<64x128xf32>
    %57 = arith.truncf %56 : vector<64x128xf32> to vector<64x128xbf16>
    %58 = tpu.concatenate %53, %53, %53, %53, %53, %53, %53, %53 in 0 : vector<8x128xf32>, vector<8x128xf32>, vector<8x128xf32>, vector<8x128xf32>, vector<8x128xf32>, vector<8x128xf32>, vector<8x128xf32>, vector<8x128xf32> -> vector<64x128xf32>
    %59 = arith.mulf %58, %54 : vector<64x128xf32>
    %60 = arith.truncf %59 : vector<64x128xf32> to vector<64x128xbf16>
    %61 = arith.truncf %51 : vector<8x128xf32> to vector<8x128xbf16>
    %cst_25 = arith.constant dense<0.000000e+00> : vector<8x64xf32>
    %62 = tpu.matmul %61, %57, %cst_25 {dimension_numbers = #tpu.dot_dimension_numbers<[1], [1], [0], [0], [0, 0, 1, 0], [], []>} : vector<8x128xbf16>, vector<64x128xbf16>, vector<8x64xf32> -> vector<8x64xf32>
    %cst_26 = arith.constant 2.500000e-01 : f32
    %63 = vector.broadcast %cst_26 : f32 to vector<8x64xf32>
    %64 = arith.mulf %62, %63 : vector<8x64xf32>
    %cst_27 = arith.constant dense<0xFF800000> : vector<8xf32>
    %65 = vector.multi_reduction <maximumf>, %64, %cst_27 [1] : vector<8x64xf32> to vector<8xf32>
    %66 = vector.shape_cast %65 : vector<8xf32> to vector<8x1xf32>
    %67 = vector.broadcast %66 : vector<8x1xf32> to vector<8x64xf32>
    %68 = arith.subf %64, %67 : vector<8x64xf32>
    %69 = math.exp %68 : vector<8x64xf32>
    %c0_28 = arith.constant 0 : index
    %c0_29 = arith.constant 0 : index
    %70 = vector.load %arg20[%c0_28, %c0_29] : memref<64x8xf32, #tpu.memory_space<vmem>>, vector<64x8xf32>
    %cst_30 = arith.constant dense<0.000000e+00> : vector<8x8xf32>
    %71 = tpu.matmul %69, %70, %cst_30 {dimension_numbers = #tpu.dot_dimension_numbers<[1], [0], [0], [1], [0, 0, 1, 1], [], []>} : vector<8x64xf32>, vector<64x8xf32>, vector<8x8xf32> -> vector<8x8xf32>
    %72 = tpu.reciprocal %71 {approx = true} : vector<8x8xf32> -> vector<8x8xf32>
    %c0_31 = arith.constant 0 : index
    %c0_32 = arith.constant 0 : index
    %73 = vector.load %arg21[%c0_31, %c0_32] : memref<8x64xf32, #tpu.memory_space<vmem>>, vector<8x64xf32>
    %cst_33 = arith.constant dense<0.000000e+00> : vector<8x64xf32>
    %74 = tpu.matmul %72, %73, %cst_33 {dimension_numbers = #tpu.dot_dimension_numbers<[1], [0], [0], [1], [0, 0, 1, 1], [], []>} : vector<8x8xf32>, vector<8x64xf32>, vector<8x64xf32> -> vector<8x64xf32>
    %75 = arith.mulf %69, %74 : vector<8x64xf32>
    %76 = arith.truncf %75 : vector<8x64xf32> to vector<8x64xbf16>
    %cst_34 = arith.constant dense<0.000000e+00> : vector<8x128xf32>
    %77 = tpu.matmul %76, %60, %cst_34 {dimension_numbers = #tpu.dot_dimension_numbers<[1], [0], [0], [1], [0, 0, 1, 1], [], []>} : vector<8x64xbf16>, vector<64x128xbf16>, vector<8x128xf32> -> vector<8x128xf32>
    %78 = arith.truncf %77 : vector<8x128xf32> to vector<8x128xbf16>
    %c0_35 = arith.constant 0 : index
    %c0_36 = arith.constant 0 : index
    %c0_37 = arith.constant 0 : index
    %79 = vector.load %arg26[%c0_35, %c0_36, %c0_37] : memref<1x128x128xbf16, #tpu.memory_space<vmem>>, vector<1x128x128xbf16>
    %80 = vector.shape_cast %79 : vector<1x128x128xbf16> to vector<128x128xbf16>
    %cst_38 = arith.constant dense<0.000000e+00> : vector<8x128xf32>
    %81 = tpu.matmul %78, %80, %cst_38 {dimension_numbers = #tpu.dot_dimension_numbers<[1], [0], [0], [1], [0, 0, 1, 1], [], []>} : vector<8x128xbf16>, vector<128x128xbf16>, vector<8x128xf32> -> vector<8x128xf32>
    %c0_39 = arith.constant 0 : index
    %c0_40 = arith.constant 0 : index
    %c0_41 = arith.constant 0 : index
    %82 = vector.load %arg27[%c0_39, %c0_40, %c0_41] : memref<1x1x128xf32, #tpu.memory_space<vmem>>, vector<1x1x128xf32>
    %83 = vector.shape_cast %82 : vector<1x1x128xf32> to vector<1x128xf32>
    %84 = vector.broadcast %83 : vector<1x128xf32> to vector<8x128xf32>
    %85 = arith.addf %81, %84 : vector<8x128xf32>
    %86 = arith.mulf %15, %85 : vector<8x128xf32>
    %87 = arith.addf %3, %86 : vector<8x128xf32>
    %cst_42 = arith.constant dense<0.000000e+00> : vector<8xf32>
    %88 = vector.multi_reduction <add>, %87, %cst_42 [1] : vector<8x128xf32> to vector<8xf32>
    %89 = vector.shape_cast %88 : vector<8xf32> to vector<8x1xf32>
    %cst_43 = arith.constant 1.280000e+02 : f32
    %90 = vector.broadcast %cst_43 : f32 to vector<8x1xf32>
    %91 = arith.divf %89, %90 : vector<8x1xf32>
    %92 = vector.broadcast %91 : vector<8x1xf32> to vector<8x128xf32>
    %93 = arith.subf %87, %92 : vector<8x128xf32>
    %94 = vector.broadcast %91 : vector<8x1xf32> to vector<8x128xf32>
    %95 = arith.subf %87, %94 : vector<8x128xf32>
    %96 = arith.mulf %93, %95 : vector<8x128xf32>
    %cst_44 = arith.constant dense<0.000000e+00> : vector<8xf32>
    %97 = vector.multi_reduction <add>, %96, %cst_44 [1] : vector<8x128xf32> to vector<8xf32>
    %98 = vector.shape_cast %97 : vector<8xf32> to vector<8x1xf32>
    %cst_45 = arith.constant 1.280000e+02 : f32
    %99 = vector.broadcast %cst_45 : f32 to vector<8x1xf32>
    %100 = arith.divf %98, %99 : vector<8x1xf32>
    %101 = vector.broadcast %91 : vector<8x1xf32> to vector<8x128xf32>
    %102 = arith.subf %87, %101 : vector<8x128xf32>
    %cst_46 = arith.constant 9.99999974E-5 : f32
    %103 = vector.broadcast %cst_46 : f32 to vector<8x1xf32>
    %104 = arith.addf %100, %103 : vector<8x1xf32>
    %105 = math.rsqrt %104 : vector<8x1xf32>
    %106 = vector.broadcast %105 : vector<8x1xf32> to vector<8x128xf32>
    %107 = arith.mulf %102, %106 : vector<8x128xf32>
    %cst_47 = arith.constant 1.000000e+00 : f32
    %108 = vector.broadcast %cst_47 : f32 to vector<8x128xf32>
    %109 = arith.addf %108, %17 : vector<8x128xf32>
    %110 = arith.mulf %107, %109 : vector<8x128xf32>
    %111 = arith.addf %110, %16 : vector<8x128xf32>
    %112 = arith.truncf %111 : vector<8x128xf32> to vector<8x128xbf16>
    %c0_48 = arith.constant 0 : index
    %c0_49 = arith.constant 0 : index
    %c0_50 = arith.constant 0 : index
    %113 = vector.load %arg28[%c0_48, %c0_49, %c0_50] : memref<1x128x512xbf16, #tpu.memory_space<vmem>>, vector<1x128x512xbf16>
    %114 = vector.shape_cast %113 : vector<1x128x512xbf16> to vector<128x512xbf16>
    %cst_51 = arith.constant dense<0.000000e+00> : vector<8x512xf32>
    %115 = tpu.matmul %112, %114, %cst_51 {dimension_numbers = #tpu.dot_dimension_numbers<[1], [0], [0], [1], [0, 0, 1, 1], [], []>} : vector<8x128xbf16>, vector<128x512xbf16>, vector<8x512xf32> -> vector<8x512xf32>
    %c0_52 = arith.constant 0 : index
    %c0_53 = arith.constant 0 : index
    %c0_54 = arith.constant 0 : index
    %116 = vector.load %arg29[%c0_52, %c0_53, %c0_54] : memref<1x1x512xf32, #tpu.memory_space<vmem>>, vector<1x1x512xf32>
    %117 = vector.shape_cast %116 : vector<1x1x512xf32> to vector<1x512xf32>
    %118 = vector.broadcast %117 : vector<1x512xf32> to vector<8x512xf32>
    %119 = arith.addf %115, %118 : vector<8x512xf32>
    %cst_55 = arith.constant 5.000000e-01 : f32
    %120 = vector.broadcast %cst_55 : f32 to vector<8x512xf32>
    %121 = arith.mulf %120, %119 : vector<8x512xf32>
    %cst_56 = arith.constant 0.707106769 : f32
    %122 = vector.broadcast %cst_56 : f32 to vector<8x512xf32>
    %123 = arith.mulf %119, %122 : vector<8x512xf32>
    %124 = math.absf %123 : vector<8x512xf32>
    %cst_57 = arith.constant 0.327591091 : f32
    %125 = vector.broadcast %cst_57 : f32 to vector<8x512xf32>
    %126 = arith.mulf %125, %124 : vector<8x512xf32>
    %cst_58 = arith.constant 1.000000e+00 : f32
    %127 = vector.broadcast %cst_58 : f32 to vector<8x512xf32>
    %128 = arith.addf %127, %126 : vector<8x512xf32>
    %129 = tpu.reciprocal %128 {approx = true} : vector<8x512xf32> -> vector<8x512xf32>
    %cst_59 = arith.constant 1.06140542 : f32
    %130 = vector.broadcast %cst_59 : f32 to vector<8x512xf32>
    %131 = arith.mulf %130, %129 : vector<8x512xf32>
    %cst_60 = arith.constant -1.45315206 : f32
    %132 = vector.broadcast %cst_60 : f32 to vector<8x512xf32>
    %133 = arith.addf %131, %132 : vector<8x512xf32>
    %134 = arith.mulf %133, %129 : vector<8x512xf32>
    %cst_61 = arith.constant 1.42141378 : f32
    %135 = vector.broadcast %cst_61 : f32 to vector<8x512xf32>
    %136 = arith.addf %134, %135 : vector<8x512xf32>
    %137 = arith.mulf %136, %129 : vector<8x512xf32>
    %cst_62 = arith.constant -0.284496725 : f32
    %138 = vector.broadcast %cst_62 : f32 to vector<8x512xf32>
    %139 = arith.addf %137, %138 : vector<8x512xf32>
    %140 = arith.mulf %139, %129 : vector<8x512xf32>
    %cst_63 = arith.constant 0.254829586 : f32
    %141 = vector.broadcast %cst_63 : f32 to vector<8x512xf32>
    %142 = arith.addf %140, %141 : vector<8x512xf32>
    %143 = arith.mulf %142, %129 : vector<8x512xf32>
    %cst_64 = arith.constant 0.000000e+00 : f32
    %144 = vector.broadcast %cst_64 : f32 to vector<8x512xf32>
    %145 = arith.subf %144, %124 : vector<8x512xf32>
    %146 = arith.mulf %145, %124 : vector<8x512xf32>
    %147 = math.exp %146 : vector<8x512xf32>
    %148 = arith.mulf %143, %147 : vector<8x512xf32>
    %cst_65 = arith.constant 1.000000e+00 : f32
    %149 = vector.broadcast %cst_65 : f32 to vector<8x512xf32>
    %150 = arith.subf %149, %148 : vector<8x512xf32>
    %cst_66 = arith.constant 0.000000e+00 : f32
    %151 = vector.broadcast %cst_66 : f32 to vector<8x512xf32>
    %152 = arith.cmpf oge, %123, %151 : vector<8x512xf32>
    %cst_67 = arith.constant 0.000000e+00 : f32
    %153 = vector.broadcast %cst_67 : f32 to vector<8x512xf32>
    %154 = arith.subf %153, %150 : vector<8x512xf32>
    %155 = arith.select %152, %150, %154 : vector<8x512xi1>, vector<8x512xf32>
    %cst_68 = arith.constant 1.000000e+00 : f32
    %156 = vector.broadcast %cst_68 : f32 to vector<8x512xf32>
    %157 = arith.addf %156, %155 : vector<8x512xf32>
    %158 = arith.mulf %121, %157 : vector<8x512xf32>
    %159 = arith.truncf %158 : vector<8x512xf32> to vector<8x512xbf16>
    %c0_69 = arith.constant 0 : index
    %c0_70 = arith.constant 0 : index
    %c0_71 = arith.constant 0 : index
    %160 = vector.load %arg30[%c0_69, %c0_70, %c0_71] : memref<1x512x128xbf16, #tpu.memory_space<vmem>>, vector<1x512x128xbf16>
    %161 = vector.shape_cast %160 : vector<1x512x128xbf16> to vector<512x128xbf16>
    %cst_72 = arith.constant dense<0.000000e+00> : vector<8x128xf32>
    %162 = tpu.matmul %159, %161, %cst_72 {dimension_numbers = #tpu.dot_dimension_numbers<[1], [0], [0], [1], [0, 0, 1, 1], [], []>} : vector<8x512xbf16>, vector<512x128xbf16>, vector<8x128xf32> -> vector<8x128xf32>
    %c0_73 = arith.constant 0 : index
    %c0_74 = arith.constant 0 : index
    %c0_75 = arith.constant 0 : index
    %163 = vector.load %arg31[%c0_73, %c0_74, %c0_75] : memref<1x1x128xf32, #tpu.memory_space<vmem>>, vector<1x1x128xf32>
    %164 = vector.shape_cast %163 : vector<1x1x128xf32> to vector<1x128xf32>
    %165 = vector.broadcast %164 : vector<1x128xf32> to vector<8x128xf32>
    %166 = arith.addf %162, %165 : vector<8x128xf32>
    %167 = arith.mulf %18, %166 : vector<8x128xf32>
    %168 = arith.addf %87, %167 : vector<8x128xf32>
    %c0_76 = arith.constant 0 : index
    %c0_77 = arith.constant 0 : index
    %169 = vector.load %arg37[%c0_76, %c0_77] : memref<8x128xf32, #tpu.memory_space<vmem>>, vector<8x128xf32>
    tpu.vector_store %arg37[%c0_76, %c0_77], %168 {strides = array<i32>} : memref<8x128xf32, #tpu.memory_space<vmem>>, vector<8x128xf32>,
    %c1_i32 = arith.constant 1 : i32
    %170 = arith.cmpi eq, %arg0, %c1_i32 : i32
    %171 = arith.extui %170 : i1 to i32
    %c0_i32_78 = arith.constant 0 : i32
    %172 = arith.cmpi ne, %171, %c0_i32_78 : i32
    scf.if %172 {
      %c0_79 = arith.constant 0 : index
      %c0_80 = arith.constant 0 : index
      %173 = vector.load %arg32[%c0_79, %c0_80] : memref<128x256xbf16, #tpu.memory_space<vmem>>, vector<128x256xbf16>
      %cst_81 = arith.constant dense<0.000000e+00> : vector<8x256xf32>
      %174 = tpu.matmul %5, %173, %cst_81 {dimension_numbers = #tpu.dot_dimension_numbers<[1], [0], [0], [1], [0, 0, 1, 1], [], []>} : vector<8x128xbf16>, vector<128x256xbf16>, vector<8x256xf32> -> vector<8x256xf32>
      %c0_82 = arith.constant 0 : index
      %c0_83 = arith.constant 0 : index
      %175 = vector.load %arg33[%c0_82, %c0_83] : memref<1x256xf32, #tpu.memory_space<vmem>>, vector<1x256xf32>
      %176 = vector.broadcast %175 : vector<1x256xf32> to vector<8x256xf32>
      %177 = arith.addf %174, %176 : vector<8x256xf32>
      %178 = vector.extract_strided_slice %177 {offsets = [0, 0], sizes = [8, 128], strides = [1, 1]} : vector<8x256xf32> to vector<8x128xf32>
      %179 = vector.extract_strided_slice %177 {offsets = [0, 128], sizes = [8, 128], strides = [1, 1]} : vector<8x256xf32> to vector<8x128xf32>
      %cst_84 = arith.constant dense<0.000000e+00> : vector<8xf32>
      %180 = vector.multi_reduction <add>, %168, %cst_84 [1] : vector<8x128xf32> to vector<8xf32>
      %181 = vector.shape_cast %180 : vector<8xf32> to vector<8x1xf32>
      %cst_85 = arith.constant 1.280000e+02 : f32
      %182 = vector.broadcast %cst_85 : f32 to vector<8x1xf32>
      %183 = arith.divf %181, %182 : vector<8x1xf32>
      %184 = vector.broadcast %183 : vector<8x1xf32> to vector<8x128xf32>
      %185 = arith.subf %168, %184 : vector<8x128xf32>
      %186 = vector.broadcast %183 : vector<8x1xf32> to vector<8x128xf32>
      %187 = arith.subf %168, %186 : vector<8x128xf32>
      %188 = arith.mulf %185, %187 : vector<8x128xf32>
      %cst_86 = arith.constant dense<0.000000e+00> : vector<8xf32>
      %189 = vector.multi_reduction <add>, %188, %cst_86 [1] : vector<8x128xf32> to vector<8xf32>
      %190 = vector.shape_cast %189 : vector<8xf32> to vector<8x1xf32>
      %cst_87 = arith.constant 1.280000e+02 : f32
      %191 = vector.broadcast %cst_87 : f32 to vector<8x1xf32>
      %192 = arith.divf %190, %191 : vector<8x1xf32>
      %193 = vector.broadcast %183 : vector<8x1xf32> to vector<8x128xf32>
      %194 = arith.subf %168, %193 : vector<8x128xf32>
      %cst_88 = arith.constant 9.99999974E-5 : f32
      %195 = vector.broadcast %cst_88 : f32 to vector<8x1xf32>
      %196 = arith.addf %192, %195 : vector<8x1xf32>
      %197 = math.rsqrt %196 : vector<8x1xf32>
      %198 = vector.broadcast %197 : vector<8x1xf32> to vector<8x128xf32>
      %199 = arith.mulf %194, %198 : vector<8x128xf32>
      %cst_89 = arith.constant 1.000000e+00 : f32
      %200 = vector.broadcast %cst_89 : f32 to vector<8x128xf32>
      %201 = arith.addf %200, %179 : vector<8x128xf32>
      %202 = arith.mulf %199, %201 : vector<8x128xf32>
      %203 = arith.addf %202, %178 : vector<8x128xf32>
      %204 = arith.truncf %203 : vector<8x128xf32> to vector<8x128xbf16>
      %c0_90 = arith.constant 0 : index
      %c0_91 = arith.constant 0 : index
      %205 = vector.load %arg34[%c0_90, %c0_91] : memref<128x128xbf16, #tpu.memory_space<vmem>>, vector<128x128xbf16>
      %cst_92 = arith.constant dense<0.000000e+00> : vector<8x128xf32>
      %206 = tpu.matmul %204, %205, %cst_92 {dimension_numbers = #tpu.dot_dimension_numbers<[1], [0], [0], [1], [0, 0, 1, 1], [], []>} : vector<8x128xbf16>, vector<128x128xbf16>, vector<8x128xf32> -> vector<8x128xf32>
      %c0_93 = arith.constant 0 : index
      %c0_94 = arith.constant 0 : index
      %207 = vector.load %arg35[%c0_93, %c0_94] : memref<1x128xf32, #tpu.memory_space<vmem>>, vector<1x128xf32>
      %208 = vector.broadcast %207 : vector<1x128xf32> to vector<8x128xf32>
      %209 = arith.addf %206, %208 : vector<8x128xf32>
      %c0_95 = arith.constant 0 : index
      %c0_96 = arith.constant 0 : index
      %210 = vector.load %arg36[%c0_95, %c0_96] : memref<8x128xf32, #tpu.memory_space<vmem>>, vector<8x128xf32>
      tpu.vector_store %arg36[%c0_95, %c0_96], %209 {strides = array<i32>} : memref<8x128xf32, #tpu.memory_space<vmem>>, vector<8x128xf32>,
    } else {
    }
    return
  }
  func.func @transform_0(%arg0: i32) -> (i32, i32) {
    %c0_i32 = arith.constant 0 : i32
    %c0_i32_0 = arith.constant 0 : i32
    %c0_i32_1 = arith.constant 0 : i32
    return %c0_i32, %c0_i32_0 : i32, i32
  }
  func.func @transform_1(%arg0: i32) -> (i32, i32) {
    %c0_i32 = arith.constant 0 : i32
    %c0_i32_0 = arith.constant 0 : i32
    %c0_i32_1 = arith.constant 0 : i32
    return %c0_i32, %c0_i32_0 : i32, i32
  }
  func.func @transform_2(%arg0: i32) -> (i32, i32) {
    %c0_i32 = arith.constant 0 : i32
    %c0_i32_0 = arith.constant 0 : i32
    %c0_i32_1 = arith.constant 0 : i32
    return %c0_i32, %c0_i32_0 : i32, i32
  }
  func.func @transform_3(%arg0: i32) -> (i32, i32) {
    %c0_i32 = arith.constant 0 : i32
    %c0_i32_0 = arith.constant 0 : i32
    %c0_i32_1 = arith.constant 0 : i32
    return %c0_i32, %c0_i32_0 : i32, i32
  }
  func.func @transform_4(%arg0: i32) -> (i32, i32) {
    %c0_i32 = arith.constant 0 : i32
    %c0_i32_0 = arith.constant 0 : i32
    %c0_i32_1 = arith.constant 0 : i32
    return %c0_i32, %c0_i32_0 : i32, i32
  }
  func.func @transform_5(%arg0: i32) -> (i32, i32) {
    %c0_i32 = arith.constant 0 : i32
    %c0_i32_0 = arith.constant 0 : i32
    %c0_i32_1 = arith.constant 0 : i32
    return %c0_i32, %c0_i32_0 : i32, i32
  }
  func.func @transform_6(%arg0: i32) -> (i32, i32) {
    %c0_i32 = arith.constant 0 : i32
    %c0_i32_0 = arith.constant 0 : i32
    %c0_i32_1 = arith.constant 0 : i32
    return %c0_i32, %c0_i32_0 : i32, i32
  }
  func.func @transform_7(%arg0: i32) -> (i32, i32) {
    %c0_i32 = arith.constant 0 : i32
    %c0_i32_0 = arith.constant 0 : i32
    %c0_i32_1 = arith.constant 0 : i32
    return %c0_i32, %c0_i32_0 : i32, i32
  }
  func.func @transform_8(%arg0: i32) -> (i32, i32) {
    %c0_i32 = arith.constant 0 : i32
    %c0_i32_0 = arith.constant 0 : i32
    %c0_i32_1 = arith.constant 0 : i32
    return %c0_i32, %c0_i32_0 : i32, i32
  }
  func.func @transform_9(%arg0: i32) -> (i32, i32) {
    %c0_i32 = arith.constant 0 : i32
    %c0_i32_0 = arith.constant 0 : i32
    %c0_i32_1 = arith.constant 0 : i32
    return %c0_i32, %c0_i32_0 : i32, i32
  }
  func.func @transform_10(%arg0: i32) -> (i32, i32) {
    %c0_i32 = arith.constant 0 : i32
    %c0_i32_0 = arith.constant 0 : i32
    %c0_i32_1 = arith.constant 0 : i32
    return %c0_i32, %c0_i32_0 : i32, i32
  }
  func.func @transform_11(%arg0: i32) -> (i32, i32) {
    %c0_i32 = arith.constant 0 : i32
    %c0_i32_0 = arith.constant 0 : i32
    %c0_i32_1 = arith.constant 0 : i32
    return %c0_i32, %c0_i32_0 : i32, i32
  }
  func.func @transform_12(%arg0: i32) -> (i32, i32) {
    %c0_i32 = arith.constant 0 : i32
    %c0_i32_0 = arith.constant 0 : i32
    %c0_i32_1 = arith.constant 0 : i32
    return %c0_i32, %c0_i32_0 : i32, i32
  }
  func.func @transform_13(%arg0: i32) -> (i32, i32) {
    %c0_i32 = arith.constant 0 : i32
    %c0_i32_0 = arith.constant 0 : i32
    %c0_i32_1 = arith.constant 0 : i32
    return %c0_i32, %c0_i32_0 : i32, i32
  }
  func.func @transform_14(%arg0: i32) -> (i32, i32) {
    %c0_i32 = arith.constant 0 : i32
    %c0_i32_0 = arith.constant 0 : i32
    %c0_i32_1 = arith.constant 0 : i32
    return %c0_i32, %c0_i32_0 : i32, i32
  }
  func.func @transform_15(%arg0: i32) -> (i32, i32) {
    %c0_i32 = arith.constant 0 : i32
    %c0_i32_0 = arith.constant 0 : i32
    %c0_i32_1 = arith.constant 0 : i32
    return %c0_i32, %c0_i32_0 : i32, i32
  }
  func.func @transform_16(%arg0: i32) -> (i32, i32) {
    %c0_i32 = arith.constant 0 : i32
    %c0_i32_0 = arith.constant 0 : i32
    %c0_i32_1 = arith.constant 0 : i32
    return %c0_i32, %c0_i32_0 : i32, i32
  }
  func.func @transform_17(%arg0: i32) -> (i32, i32) {
    %c0_i32 = arith.constant 0 : i32
    %c0_i32_0 = arith.constant 0 : i32
    %c0_i32_1 = arith.constant 0 : i32
    return %c0_i32, %c0_i32_0 : i32, i32
  }
  func.func @transform_18(%arg0: i32) -> (i32, i32) {
    %c0_i32 = arith.constant 0 : i32
    %c0_i32_0 = arith.constant 0 : i32
    %c0_i32_1 = arith.constant 0 : i32
    return %c0_i32, %c0_i32_0 : i32, i32
  }
  func.func @transform_19(%arg0: i32) -> (i32, i32) {
    %c0_i32 = arith.constant 0 : i32
    %c0_i32_0 = arith.constant 0 : i32
    %c0_i32_1 = arith.constant 0 : i32
    return %c0_i32, %c0_i32_0 : i32, i32
  }
  func.func @transform_20(%arg0: i32) -> (i32, i32) {
    %c0_i32 = arith.constant 0 : i32
    %c0_i32_0 = arith.constant 0 : i32
    %c0_i32_1 = arith.constant 0 : i32
    return %c0_i32, %c0_i32_0 : i32, i32
  }
  func.func @transform_21(%arg0: i32) -> (i32, i32, i32) {
    %c0_i32 = arith.constant 0 : i32
    %c0_i32_0 = arith.constant 0 : i32
    %c0_i32_1 = arith.constant 0 : i32
    return %arg0, %c0_i32, %c0_i32_0 : i32, i32, i32
  }
  func.func @transform_22(%arg0: i32) -> (i32, i32, i32) {
    %c0_i32 = arith.constant 0 : i32
    %c0_i32_0 = arith.constant 0 : i32
    %c0_i32_1 = arith.constant 0 : i32
    return %arg0, %c0_i32, %c0_i32_0 : i32, i32, i32
  }
  func.func @transform_23(%arg0: i32) -> (i32, i32, i32) {
    %c0_i32 = arith.constant 0 : i32
    %c0_i32_0 = arith.constant 0 : i32
    %c0_i32_1 = arith.constant 0 : i32
    return %arg0, %c0_i32, %c0_i32_0 : i32, i32, i32
  }
  func.func @transform_24(%arg0: i32) -> (i32, i32, i32) {
    %c0_i32 = arith.constant 0 : i32
    %c0_i32_0 = arith.constant 0 : i32
    %c0_i32_1 = arith.constant 0 : i32
    return %arg0, %c0_i32, %c0_i32_0 : i32, i32, i32
  }
  func.func @transform_25(%arg0: i32) -> (i32, i32, i32) {
    %c0_i32 = arith.constant 0 : i32
    %c0_i32_0 = arith.constant 0 : i32
    %c0_i32_1 = arith.constant 0 : i32
    return %arg0, %c0_i32, %c0_i32_0 : i32, i32, i32
  }
  func.func @transform_26(%arg0: i32) -> (i32, i32, i32) {
    %c0_i32 = arith.constant 0 : i32
    %c0_i32_0 = arith.constant 0 : i32
    %c0_i32_1 = arith.constant 0 : i32
    return %arg0, %c0_i32, %c0_i32_0 : i32, i32, i32
  }
  func.func @transform_27(%arg0: i32) -> (i32, i32, i32) {
    %c0_i32 = arith.constant 0 : i32
    %c0_i32_0 = arith.constant 0 : i32
    %c0_i32_1 = arith.constant 0 : i32
    return %arg0, %c0_i32, %c0_i32_0 : i32, i32, i32
  }
  func.func @transform_28(%arg0: i32) -> (i32, i32, i32) {
    %c0_i32 = arith.constant 0 : i32
    %c0_i32_0 = arith.constant 0 : i32
    %c0_i32_1 = arith.constant 0 : i32
    return %arg0, %c0_i32, %c0_i32_0 : i32, i32, i32
  }
  func.func @transform_29(%arg0: i32) -> (i32, i32, i32) {
    %c0_i32 = arith.constant 0 : i32
    %c0_i32_0 = arith.constant 0 : i32
    %c0_i32_1 = arith.constant 0 : i32
    return %arg0, %c0_i32, %c0_i32_0 : i32, i32, i32
  }
  func.func @transform_30(%arg0: i32) -> (i32, i32, i32) {
    %c0_i32 = arith.constant 0 : i32
    %c0_i32_0 = arith.constant 0 : i32
    %c0_i32_1 = arith.constant 0 : i32
    return %arg0, %c0_i32, %c0_i32_0 : i32, i32, i32
  }
  func.func @transform_31(%arg0: i32) -> (i32, i32) {
    %c0_i32 = arith.constant 0 : i32
    %c0_i32_0 = arith.constant 0 : i32
    %c0_i32_1 = arith.constant 0 : i32
    return %c0_i32, %c0_i32_0 : i32, i32
  }
  func.func @transform_32(%arg0: i32) -> (i32, i32) {
    %c0_i32 = arith.constant 0 : i32
    %c0_i32_0 = arith.constant 0 : i32
    %c0_i32_1 = arith.constant 0 : i32
    return %c0_i32, %c0_i32_0 : i32, i32
  }
  func.func @transform_33(%arg0: i32) -> (i32, i32) {
    %c0_i32 = arith.constant 0 : i32
    %c0_i32_0 = arith.constant 0 : i32
    %c0_i32_1 = arith.constant 0 : i32
    return %c0_i32, %c0_i32_0 : i32, i32
  }
  func.func @transform_34(%arg0: i32) -> (i32, i32) {
    %c0_i32 = arith.constant 0 : i32
    %c0_i32_0 = arith.constant 0 : i32
    %c0_i32_1 = arith.constant 0 : i32
    return %c0_i32, %c0_i32_0 : i32, i32
  }
  func.func @transform_35(%arg0: i32) -> (i32, i32) {
    %c0_i32 = arith.constant 0 : i32
    %c0_i32_0 = arith.constant 0 : i32
    %c0_i32_1 = arith.constant 0 : i32
    return %c0_i32, %c0_i32_0 : i32, i32
  }
}

</mosaic_0001>

<bundles_post_ra>
// kernel: dit_diff_forward.1
= control target key start
LH: loop header
LB: loop body
LE: loop exit
PB: predicated region body
PF: predicated region fallthrough
CT: control target
= control target key end

     0   :  { %s6957_s6 = smov 1   ;;  %s6958_s10 = smov 2   ;;  %s8226_s0 = inlined_call_operand.smem [shape: u32[36], index: -1, kind: input, shape index: {}] }
   0x1   :  { %s7046_s5 = sld [smem:[%s8226_s0]]   ;;  %s6959_s14 = smov 3  }
   0x2   :  { %s7051_s9 = sld [smem:[%s8226_s0 + %s6957_s6]]   ;;  %s6960_s18 = smov 4  }
   0x3   :  { %s7056_s13 = sld [smem:[%s8226_s0 + %s6958_s10]]   ;;  %s6961_s22 = smov 5  }
   0x4   :  { %s7061_s17 = sld [smem:[%s8226_s0 + %s6959_s14]]   ;;  %s6962_s26 = smov 6  }
   0x5   :  { %s7066_s21 = sld [smem:[%s8226_s0 + %s6960_s18]]   ;;  %s6963_s30 = smov 7  }
   0x6   :  { %s7071_s25 = sld [smem:[%s8226_s0 + %s6961_s22]]   ;;  %s6964_s4 = smov 8  }
   0x7   :  { %8286 = sst [smem:[#allocation53_spill]] %s7046_s5  ;;  %s6965_s10 = smov 9  }
   0x8   :  { %8287 = sst [smem:[#allocation54_spill]] %s7051_s9  ;;  %s6966_s15 = smov 10  }
   0x9   :  { %8288 = sst [smem:[#allocation55_spill]] %s7056_s13  ;;  %s6967_s20 = smov 11  }
   0xa   :  { %8289 = sst [smem:[#allocation56_spill]] %s7061_s17  ;;  %s6969_s1 = smov 13  }
   0xb   :  { %s7076_s29 = sld [smem:[%s8226_s0 + %s6962_s26]]   ;;  %s6968_s26 = smov 12  }
   0xc   :  { %s7081_s3 = sld [smem:[%s8226_s0 + %s6963_s30]]   ;;  %s6970_s7 = smov 14  }
   0xd   :  { %s7086_s8 = sld [smem:[%s8226_s0 + %s6964_s4]]   ;;  %s6972_s22 = smov 16  }
   0xe   :  { %s7091_s14 = sld [smem:[%s8226_s0 + %s6965_s10]]   ;;  %s6973_s28 = smov 17  }
   0xf   :  { %s7096_s19 = sld [smem:[%s8226_s0 + %s6966_s15]]   ;;  %s6971_s15 = smov 15  }
  0x10   :  { %s7101_s24 = sld [smem:[%s8226_s0 + %s6967_s20]]  }
  0x11   :  { %s7106_s30 = sld [smem:[%s8226_s0 + %s6968_s26]]  }
  0x12   :  { %8290 = sst [smem:[#allocation57_spill]] %s7081_s3 }
  0x13   :  { %8291 = sst [smem:[#allocation58_spill]] %s7086_s8 }
  0x14   :  { %s7111_s6 = sld [smem:[%s8226_s0 + %s6969_s1]]  }
  0x15   :  { %8292 = sst [smem:[#allocation59_spill]] %s7096_s19 }
  0x16   :  { %s7116_s12 = sld [smem:[%s8226_s0 + %s6970_s7]]   ;;  %s6974_s7 = smov 18  }
  0x17   :  { %8293 = sst [smem:[#allocation60_spill]] %s7106_s30 }
  0x18   :  { %s7121_s20 = sld [smem:[%s8226_s0 + %s6971_s15]]   ;;  %s6975_s15 = smov 19  }
  0x19   :  { %s7126_s27 = sld [smem:[%s8226_s0 + %s6972_s22]]   ;;  %s6976_s22 = smov 20  }
  0x1a   :  { %8294 = sst [smem:[#allocation61_spill]] %s7111_s6 }
  0x1b   :  { %s7131_s4 = sld [smem:[%s8226_s0 + %s6973_s28]]   ;;  %s6977_s28 = smov 21  }
  0x1c   :  { %8295 = sst [smem:[#allocation62_spill]] %s7116_s12 }
  0x1d   :  { %s7136_s17 = sld [smem:[%s8226_s0 + %s6974_s7]]   ;;  %s6978_s7 = smov 22  }
  0x1e   :  { %8296 = sst [smem:[#allocation63_spill]] %s7121_s20 }
  0x1f   :  { %8297 = sst [smem:[#allocation64_spill]] %s7126_s27 }
  0x20   :  { %s7141_s13 = sld [smem:[%s8226_s0 + %s6975_s15]]   ;;  %s6979_s15 = smov 23  }
  0x21   :  { %8298 = sst [smem:[#allocation65_spill]] %s7131_s4 }
  0x22   :  { %s7146_s27 = sld [smem:[%s8226_s0 + %s6976_s22]]   ;;  %s6980_s22 = smov 24  }
  0x23   :  { %8299 = sst [smem:[#allocation66_spill]] %s7136_s17 }
  0x24   :  { %s7151_s4 = sld [smem:[%s8226_s0 + %s6977_s28]]   ;;  %s6981_s28 = smov 25  }
  0x25   :  { %s7156_s17 = sld [smem:[%s8226_s0 + %s6978_s7]]   ;;  %s6982_s7 = smov 26  }
  0x26   :  { %8300 = sst [smem:[#allocation67_spill]] %s7141_s13 }
  0x27   :  { %s7161_s13 = sld [smem:[%s8226_s0 + %s6979_s15]]   ;;  %s6983_s15 = smov 27  }
  0x28   :  { %8301 = sst [smem:[#allocation68_spill]] %s7146_s27 }
  0x29   :  { %s7166_s27 = sld [smem:[%s8226_s0 + %s6980_s22]]   ;;  %s6984_s22 = smov 28  }
  0x2a   :  { %8302 = sst [smem:[#allocation69_spill]] %s7151_s4 }
  0x2b   :  { %8303 = sst [smem:[#allocation70_spill]] %s7156_s17 }
  0x2c   :  { %s7171_s12 = sld [smem:[%s8226_s0 + %s6981_s28]]   ;;  %s6985_s28 = smov 29  }
  0x2d   :  { %s7176_s17 = sld [smem:[%s8226_s0 + %s6982_s7]]   ;;  %s6986_s7 = smov 30  }
  0x2e   :  { %s7181_s30 = sld [smem:[%s8226_s0 + %s6983_s15]]   ;;  %s6987_s15 = smov 31  }
  0x2f   :  { %s7186_s19 = sld [smem:[%s8226_s0 + %s6984_s22]]   ;;  %s6988_s22 = smov 32  }
  0x30   :  { %s7191_s8 = sld [smem:[%s8226_s0 + %s6985_s28]]   ;;  %s6989_s28 = smov 33  }
  0x31   :  { %s7196_s20 = sld [smem:[%s8226_s0 + %s6986_s7]]   ;;  %s6990_s7 = smov 34  }
  0x34   :  { %8304 = sst [smem:[#allocation71_spill]] %s7181_s30 }
  0x35   :  { %8305 = sst [smem:[#allocation72_spill]] %s7186_s19 }
  0x36   :  { %8306 = sst [smem:[#allocation73_spill]] %s7191_s8 }
  0x37   :  { %8307 = sst [smem:[#allocation74_spill]] %s7196_s20 }
  0x38   :  { %s7201_s30 = sld [smem:[%s8226_s0 + %s6987_s15]]   ;;  %s6991_s15 = smov 35  }
  0x39   :  { %s7206_s19 = sld [smem:[%s8226_s0 + %s6988_s22]]  }
  0x3a   :  { %s7211_s8 = sld [smem:[%s8226_s0 + %s6989_s28]]  }
  0x3b   :  { %s7216_s20 = sld [smem:[%s8226_s0 + %s6990_s7]]  }
  0x3e   :  { %8308 = sst [smem:[#allocation75_spill]] %s7201_s30 }
  0x3f   :  { %8309 = sst [smem:[#allocation76_spill]] %s7206_s19 }
  0x40   :  { %8310 = sst [smem:[#allocation77_spill]] %s7211_s8 }
  0x41   :  { %8311 = sst [smem:[#allocation78_spill]] %s7216_s20 }
  0x42   :  { %s7221_s30 = sld [smem:[%s8226_s0 + %s6991_s15]]  }
  0x48   :  { %8312 = sst [smem:[#allocation79_spill]] %s7221_s30 }
  0x49   :  { %76 = vsyncpa [#allocation5], 0 }
  0x4a   :  { %77 = vsyncpa [#allocation8], 0 }
  0x4b   :  { %78 = vsyncpa [#allocation11], 0 }
  0x4c   :  { %79 = vsyncpa [#allocation14], 0 }
  0x4d   :  { %80 = vsyncpa [#allocation17], 0 }
  0x4e   :  { %81 = vsyncpa [#allocation20], 0 }
  0x4f   :  { %82 = vsyncpa [#allocation23], 0 }
  0x50   :  { %83 = vsyncpa [#allocation26], 0 }
  0x51   :  { %84 = vsyncpa [#allocation29], 0 }
  0x52   :  { %85 = vsyncpa [#allocation6], 0  ;;  %s7223_s22 = smov 0   ;;  %s7225_s23 = smov 0  }
  0x53   :  { %s7227_s26 = smov 0   ;;  %s7229_s28 = smov 0  }
  0x54 LB: > { %s8313_s9 = sld [smem:[#allocation54_spill]]  ;;  %s8314_s6 = sld [smem:[#allocation61_spill]]  ;;  %s6943_s22 = sphi %s7223_s22, %s8408_s22   ;;  %s6955_s28 = sphi %s7229_s28, %s8407_s28   ;;  %s6951_s26 = sphi %s7227_s26, %s8410_s26   ;;  %s6947_s23 = sphi %s7225_s23, %s8409_s23  }
  0x55   : > { %s8315_s3 = sld [smem:[#allocation57_spill]]  ;;  %s8316_s4 = sld [smem:[#allocation69_spill]] }
  0x56   : > { %s8317_s5 = sld [smem:[#allocation53_spill]]  ;;  %8318 = sst [smem:[#allocation80_spill]] %s6947_s23 }
  0x57   : > { %8319 = sst [smem:[#allocation81_spill]] %s6951_s26  ;;  %s6992_s0 = smov [#allocation4]  }
  0x58   : > { %s915_s1 = sshll.u32 %s6992_s0, 4  ;;  %s7244_s2 = sadd.s32 4294967295, %s6955_s28   ;;  %s916_s1 = int_to_ptr.vmem [resolvable:$true] %s915_s1 }
  0x59   : > { %8320 = sst [smem:[#allocation82_spill]] %s7244_s2  ;;  %p4820_p0 = scmp.ge.s32.totalorder %s6955_s28, 1 }
  0x5a   : > { %p8241_p1 = scmp.eq.s32.totalorder %s7244_s2, 0  ;;  %p902_p2 = scmp.lt.s32.totalorder %s6955_s28, 3 }
  0x5b   : > { %s7263_s11 = sadd.s32 1, %s6955_s28   ;;  %s539_s15 = sadd.s32 1, %s6951_s26 }
  0x5c   : > { %p7250_p4 = pnand %p4820_p0, %p902_p2  ;;  %8324 = sst [smem:[#allocation84_spill]] %s7263_s11 }
  0x5d   : > { %s536_s16 = ssub.s32 %s6955_s28, %s7263_s11  ;;  %s6133_s18 = scalar_lea.hbm %s8317_s5, 128 }
  0x5e   : > { %s8321_s7 = scalar_select %p7250_p4, 1, 0 }
  0x5f   : > { %p5652_p5 = pneg %p7250_p4  ;;  %p6134_p7 = scmp.ne.s32.totalorder %s8317_s5, %s6133_s18 }
  0x60   : > { %8322 = sst [smem:[#allocation83_spill]] %s8321_s7  ;;  %p6140_p11 = scmp.lt.u32.totalorder %s6133_s18, %s8317_s5 }
  0x61   : > { %p7258_p6 = pnand %p5652_p5, %p8241_p1 }
  0x63   : > { %s8323_s10 = scalar_select %p7258_p6, 1, 0 }
  0x64   : > { %p7272_p8 = pneg %p7258_p6 }
  0x66   : > { %s8325_s0 = scalar_select %p7272_p8, 1, 0 }
  0x67   : > { %p6136_p9 = pnand %p7272_p8, %p6134_p7 }
  0x69   : > { %p6137_p10 = pneg %p6136_p9 }
  0x6b   : > { %p6142_p12 = pnand %p6140_p11, %p6137_p10 }
  0x6d   : > { %6145 = shalt.err (!%p6142_p12)
}
  0x6e   : > { %s6146_s30 = scalar_lea.vmem %s916_s1, 128  ;;  %p6154_p5 = scmp.lt.s32.totalorder %s916_s1, %s916_s1 }
  0x6f   : > { %p6147_p13 = scmp.ne.s32.totalorder %s916_s1, %s6146_s30  ;;  %p6155_p3 = scmp.lt.s32.totalorder %s6146_s30, %s6146_s30 }
  0x71   : > { %p6149_p0 = pnand %p6147_p13, %p7272_p8  ;;  %p6156_p1 = por %p6155_p3, %p6154_p5 }
  0x73   : > { %p6150_p2 = pneg %p6149_p0 }
  0x75   : > { %p6157_p4 = pnand %p6156_p1, %p6150_p2 }
  0x77   : > { %6160 = shalt.err (!%p6157_p4)
}
  0x78   : > { %5655 = dma.hbm_to_vmem [thread:$0]  (!%p7258_p6), %s8317_s5, 128, %s916_s1, [#allocation5]  }
  0x79   : > { %p537_p7 = scmp.eq.s32.totalorder %s536_s16, 0  ;;  %p546_p3 = scmp.ne.s32.totalorder %s6951_s26, %s6947_s23 }
  0x7a   : > { %p547_p1 = scmp.eq.s32.totalorder %s6955_s28, 0  ;;  %p552_p4 = scmp.ne.s32.totalorder %s6947_s23, %s6943_s22 }
  0x7b   : > { %s7290_s30 = scalar_select %p537_p7, %s6951_s26, %s539_s15  }
  0x7c   : > { %p548_p9 = por %p547_p1, %p546_p3  ;;  %p8327_p10 = scmp.eq.s32.totalorder %s7244_s2, 0 }
  0x7d   : > { %8326 = sst [smem:[#allocation85_spill]] %s7290_s30  ;;  %p5747_p12 = scmp.lt.s32.totalorder %s6955_s28, 2 }
  0x7e   : > { %p7294_p11 = por %p8327_p10, %p552_p4  ;;  %s1150_s11 = sand.u32 1, %s6955_s28  }
  0x7f   : > { %s7301_s20 = sand.u32 1, %s6951_s26   ;;  %p7304_p13 = pnand %p5747_p12, %p548_p9 }
  0x80   : > { %s8328_s18 = scalar_select %p7294_p11, 1, 0 }
  0x81   : > { %s5552_s1 = smul.u32 384, %s7301_s20  ;;  %s7314_s26 = scalar_lea.sflag [#allocation5], %s1150_s11 }
  0x82   : > { %8329 = sst [smem:[#allocation86_spill]] %s8328_s18  ;;  %s5553_s22 = smul.u32 6144, %s6955_s28 }
  0x83   : > { %s8330_s16 = scalar_select %p7304_p13, 1, 0 }
  0x84   : > { %s7310_s15 = scalar_lea.hbm %s8316_s4, %s5553_s22  ;;  %s1154_s5 = scalar_lea.vmem [#allocation30], %s5552_s1 }
  0x85   : > { %s1161_s30 = sshll.u32 %s1154_s5, 4  ;;  %s6161_s8 = scalar_lea.hbm %s7310_s15, 6144  ;;  %s7312_s30 = int_to_ptr.vmem [resolvable:$true] %s1161_s30 }
  0x86   : > { %p6162_p0 = scmp.ne.s32.totalorder %s7310_s15, %s6161_s8  ;;  %p7320_p2 = pneg %p7304_p13 }
  0x87   : > { %s6166_s22 = scalar_lea.hbm %s8316_s4, 12288  ;;  %p6167_p3 = scmp.lt.u32.totalorder %s7310_s15, %s8316_s4 }
  0x88   : > { %s8331_s18 = scalar_select %p7320_p2, 1, 0 }
  0x89   : > { %p6164_p5 = pnand %p7320_p2, %p6162_p0  ;;  %p6168_p1 = scmp.lt.u32.totalorder %s6166_s22, %s6161_s8 }
  0x8a   : > { %p6170_p9 = scmp.lt.u32.totalorder %s6161_s8, %s7310_s15 }
  0x8b   : > { %p6165_p7 = pneg %p6164_p5  ;;  %p6169_p4 = por %p6168_p1, %p6167_p3 }
  0x8d   : > { %p6171_p10 = por %p6170_p9, %p6169_p4 }
  0x8f   : > { %p6172_p12 = pnand %p6171_p10, %p6165_p7 }
  0x91   : > { %6175 = shalt.err (!%p6172_p12)
}
  0x92   : > { %s6176_s5 = scalar_lea.vmem %s7312_s30, 6144  ;;  %s6993_s11 = smov [#allocation30]  }
  0x93   : > { %p6177_p11 = scmp.ne.s32.totalorder %s7312_s30, %s6176_s5  ;;  %s6181_s1 = sshll.u32 %s6993_s11, 4  ;;  %s6182_s1 = int_to_ptr.vmem [resolvable:$false] %s6181_s1 }
  0x94   : > { %s6183_s23 = scalar_lea.vmem %s6182_s1, 12288  ;;  %p6184_p0 = scmp.lt.s32.totalorder %s7312_s30, %s6182_s1 }
  0x95   : > { %p6179_p6 = pnand %p6177_p11, %p7320_p2  ;;  %p6185_p5 = scmp.lt.s32.totalorder %s6183_s23, %s6176_s5 }
  0x97   : > { %p6180_p8 = pneg %p6179_p6  ;;  %p6186_p3 = por %p6185_p5, %p6184_p0 }
  0x99   : > { %p6187_p1 = pnand %p6186_p3, %p6180_p8 }
  0x9b   : > { %6190 = shalt.err (!%p6187_p1)
}
  0x9c   : > { %s6994_s8 = smov 384   ;;  %s6995_s22 = smov 24  }
  0x9d   : > { %5710 = dma.hbm_to_vmem [thread:$0]  (!%p7304_p13), %s7310_s15, 6144, %s7312_s30, %s7314_s26, %s6994_s8, %s6994_s8, %s6995_s22  }
  0x9e   : > { %s5554_s11 = smul.u32 192, %s7301_s20  ;;  %s6196_s19 = scalar_lea.hbm %s7161_s13, 6144 }
  0x9f   : > { %s5555_s23 = smul.u32 3072, %s6955_s28 }
  0xa0   : > { %s5556_s5 = smul.u32 3, %s7301_s20  ;;  %s1182_s4 = scalar_lea.vmem [#allocation31], %s5554_s11 }
  0xa1   : > { %s7344_s1 = scalar_lea.hbm %s7161_s13, %s5555_s23  ;;  %s1189_s2 = sshll.u32 %s1182_s4, 4  ;;  %s7346_s2 = int_to_ptr.vmem [resolvable:$true] %s1189_s2 }
  0xa2   : > { %s6191_s7 = scalar_lea.hbm %s7344_s1, 3072  ;;  %p6197_p7 = scmp.lt.u32.totalorder %s7344_s1, %s7161_s13 }
  0xa3   : > { %p6192_p6 = scmp.ne.s32.totalorder %s7344_s1, %s6191_s7  ;;  %p6198_p4 = scmp.lt.u32.totalorder %s6196_s19, %s6191_s7 }
  0xa4   : > { %p6200_p10 = scmp.lt.u32.totalorder %s6191_s7, %s7344_s1 }
  0xa5   : > { %p6194_p8 = pnand %p6192_p6, %p7320_p2  ;;  %p6199_p9 = por %p6198_p4, %p6197_p7 }
  0xa7   : > { %p6195_p11 = pneg %p6194_p8  ;;  %p6201_p12 = por %p6200_p10, %p6199_p9 }
  0xa9   : > { %p6202_p0 = pnand %p6201_p12, %p6195_p11 }
  0xab   : > { %6205 = shalt.err (!%p6202_p0)
}
  0xac   : > { %s6206_s4 = scalar_lea.vmem %s7346_s2, 3072  ;;  %s6996_s30 = smov [#allocation31]  }
  0xad   : > { %p6207_p5 = scmp.ne.s32.totalorder %s7346_s2, %s6206_s4  ;;  %s6211_s15 = sshll.u32 %s6996_s30, 4  ;;  %s6212_s15 = int_to_ptr.vmem [resolvable:$false] %s6211_s15 }
  0xae   : > { %s6213_s8 = scalar_lea.vmem %s6212_s15, 6144  ;;  %p6214_p6 = scmp.lt.s32.totalorder %s7346_s2, %s6212_s15 }
  0xaf   : > { %p6209_p3 = pnand %p6207_p5, %p7320_p2  ;;  %p6215_p8 = scmp.lt.s32.totalorder %s6213_s8, %s6206_s4 }
  0xb1   : > { %p6210_p1 = pneg %p6209_p3  ;;  %p6216_p7 = por %p6215_p8, %p6214_p6 }
  0xb3   : > { %p6217_p4 = pnand %p6216_p7, %p6210_p1 }
  0xb5   : > { %6220 = shalt.err (!%p6217_p4)
}
  0xb6   : > { %s6997_s19 = smov 192   ;;  %s6998_s7 = smov 12  }
  0xb7   : > { %5713 = dma.hbm_to_vmem [thread:$0]  (!%p7304_p13), %s7344_s1, 3072, %s7346_s2, %s7314_s26, %s6997_s19, %s6997_s19, %s6998_s7  }
  0xb8   : > { %s5557_s22 = smul.u32 48, %s6955_s28  ;;  %s1203_s11 = scalar_lea.vmem [#allocation32], %s5556_s5 }
  0xb9   : > { %s1211_s23 = sshll.u32 %s1203_s11, 4  ;;  %s4843_s4 = sshll.u32 %s7301_s20, 6  ;;  %s7369_s23 = int_to_ptr.vmem [resolvable:$true] %s1211_s23 }
  0xba   : > { %s1209_s30 = scalar_lea.hbm %s7166_s27, %s5557_s22  ;;  %s6226_s8 = scalar_lea.hbm %s7166_s27, 96 }
  0xbb   : > { %s6221_s15 = scalar_lea.hbm %s1209_s30, 48  ;;  %p6227_p12 = scmp.lt.u32.totalorder %s1209_s30, %s7166_s27 }
  0xbc   : > { %p6222_p11 = scmp.ne.s32.totalorder %s1209_s30, %s6221_s15  ;;  %p6228_p0 = scmp.lt.u32.totalorder %s6226_s8, %s6221_s15 }
  0xbd   : > { %p6230_p3 = scmp.lt.u32.totalorder %s6221_s15, %s1209_s30 }
  0xbe   : > { %p6224_p9 = pnand %p6222_p11, %p7320_p2  ;;  %p6229_p5 = por %p6228_p0, %p6227_p12 }
  0xc0   : > { %p6225_p10 = pneg %p6224_p9  ;;  %p6231_p1 = por %p6230_p3, %p6229_p5 }
  0xc2   : > { %p6232_p6 = pnand %p6231_p1, %p6225_p10 }
  0xc4   : > { %6235 = shalt.err (!%p6232_p6)
}
  0xc5   : > { %s6236_s2 = scalar_lea.vmem %s7369_s23, 48  ;;  %s6999_s5 = smov [#allocation32]  }
  0xc6   : > { %p6237_p8 = scmp.ne.s32.totalorder %s7369_s23, %s6236_s2  ;;  %s6241_s1 = sshll.u32 %s6999_s5, 4  ;;  %s6242_s1 = int_to_ptr.vmem [resolvable:$false] %s6241_s1 }
  0xc7   : > { %s6243_s19 = scalar_lea.vmem %s6242_s1, 96  ;;  %p6244_p11 = scmp.lt.s32.totalorder %s7369_s23, %s6242_s1 }
  0xc8   : > { %p6239_p7 = pnand %p6237_p8, %p7320_p2  ;;  %p6245_p9 = scmp.lt.s32.totalorder %s6243_s19, %s6236_s2 }
  0xca   : > { %p6240_p4 = pneg %p6239_p7  ;;  %p6246_p12 = por %p6245_p9, %p6244_p11 }
  0xcc   : > { %p6247_p0 = pnand %p6246_p12, %p6240_p4 }
  0xce   : > { %6250 = shalt.err (!%p6247_p0)
}
  0xcf   : > { %5716 = dma.hbm_to_vmem [thread:$0]  (!%p7304_p13), %s1209_s30, 48, %s7369_s23, %s7314_s26  }
  0xd0   : > { %s5069_s7 = sshll.u32 %s6955_s28, 10  ;;  %s1222_s22 = scalar_lea.vmem [#allocation33], %s4843_s4 }
  0xd1   : > { %s1229_s11 = sshll.u32 %s1222_s22, 4  ;;  %s7390_s15 = scalar_lea.hbm %s7171_s12, %s5069_s7  ;;  %s7392_s11 = int_to_ptr.vmem [resolvable:$true] %s1229_s11 }
  0xd2   : > { %s6251_s8 = scalar_lea.hbm %s7390_s15, 1024  ;;  %s6256_s2 = scalar_lea.hbm %s7171_s12, 2048 }
  0xd3   : > { %p6252_p10 = scmp.ne.s32.totalorder %s7390_s15, %s6251_s8  ;;  %p6257_p1 = scmp.lt.u32.totalorder %s7390_s15, %s7171_s12 }
  0xd4   : > { %p6258_p6 = scmp.lt.u32.totalorder %s6256_s2, %s6251_s8  ;;  %p6260_p7 = scmp.lt.u32.totalorder %s6251_s8, %s7390_s15 }
  0xd5   : > { %p6254_p5 = pnand %p6252_p10, %p7320_p2 }
  0xd6   : > { %p6259_p8 = por %p6258_p6, %p6257_p1 }
  0xd7   : > { %p6255_p3 = pneg %p6254_p5 }
  0xd8   : > { %p6261_p4 = por %p6260_p7, %p6259_p8 }
  0xda   : > { %p6262_p11 = pnand %p6261_p4, %p6255_p3 }
  0xdc   : > { %6265 = shalt.err (!%p6262_p11)
}
  0xdd   : > { %s6266_s23 = scalar_lea.vmem %s7392_s11, 1024  ;;  %s7000_s4 = smov [#allocation33]  }
  0xde   : > { %p6267_p9 = scmp.ne.s32.totalorder %s7392_s11, %s6266_s23  ;;  %s6271_s30 = sshll.u32 %s7000_s4, 4  ;;  %s6272_s30 = int_to_ptr.vmem [resolvable:$false] %s6271_s30 }
  0xdf   : > { %s6273_s5 = scalar_lea.vmem %s6272_s30, 2048  ;;  %p6274_p10 = scmp.lt.s32.totalorder %s7392_s11, %s6272_s30 }
  0xe0   : > { %p6269_p12 = pnand %p6267_p9, %p7320_p2  ;;  %p6275_p5 = scmp.lt.s32.totalorder %s6273_s5, %s6266_s23 }
  0xe2   : > { %p6270_p0 = pneg %p6269_p12  ;;  %p6276_p1 = por %p6275_p5, %p6274_p10 }
  0xe4   : > { %p6277_p6 = pnand %p6276_p1, %p6270_p0 }
  0xe6   : > { %6280 = shalt.err (!%p6277_p6)
}
  0xe7   : > { %s8274_s1 = smov 64   ;;  %s7002_s19 = smov 4  }
  0xe8   : > { %5719 = dma.hbm_to_vmem [thread:$0]  (!%p7304_p13), %s7390_s15, 1024, %s7392_s11, %s7314_s26, %s8274_s1, %s8274_s1, %s7002_s19  }
  0xe9   : > { %s7003_s7 = smov [#allocation7]   ;;  %s7004_s8 = smov [#allocation10]  }
  0xea   : > { %s926_s22 = sshll.u32 %s7003_s7, 4  ;;  %s956_s2 = sshll.u32 %s7004_s8, 4  ;;  %s927_s22 = int_to_ptr.vmem [resolvable:$true] %s926_s22  ;;  %s7415_s2 = int_to_ptr.vmem [resolvable:$true] %s956_s2 }
  0xeb   : > { %s6281_s23 = scalar_lea.hbm %s8313_s9, 128  ;;  %p8332_p8 = scmp.ne.s32.totalorder %s8325_s0, 0 }
  0xec   : > { %p6282_p3 = scmp.ne.s32.totalorder %s8313_s9, %s6281_s23  ;;  %p6288_p11 = scmp.lt.u32.totalorder %s6281_s23, %s8313_s9 }
  0xee   : > { %p6284_p7 = pnand %p6282_p3, %p8332_p8 }
  0xf0   : > { %p6285_p4 = pneg %p6284_p7 }
  0xf2   : > { %p6290_p9 = pnand %p6288_p11, %p6285_p4 }
  0xf4   : > { %6293 = shalt.err (!%p6290_p9)
}
  0xf5   : > { %s6294_s4 = scalar_lea.vmem %s927_s22, 128  ;;  %p6302_p5 = scmp.lt.s32.totalorder %s927_s22, %s927_s22 }
  0xf6   : > { %p6295_p12 = scmp.ne.s32.totalorder %s927_s22, %s6294_s4  ;;  %p6303_p1 = scmp.lt.s32.totalorder %s6294_s4, %s6294_s4 }
  0xf8   : > { %p6297_p0 = pnand %p6295_p12, %p8332_p8  ;;  %p6304_p6 = por %p6303_p1, %p6302_p5 }
  0xfa   : > { %p6298_p10 = pneg %p6297_p0 }
  0xfc   : > { %p6305_p13 = pnand %p6304_p6, %p6298_p10 }
  0xfe   : > { %6308 = shalt.err (!%p6305_p13)
}
  0xff   : > { %p8333_p2 = scmp.ne.s32.totalorder %s8323_s10, 0  ;;  %s6309_s11 = scalar_lea.hbm %s7071_s25, 16 }
 0x100   : > { %p6310_p3 = scmp.ne.s32.totalorder %s7071_s25, %s6309_s11  ;;  %p6316_p11 = scmp.lt.u32.totalorder %s6309_s11, %s7071_s25 }
 0x101   : > { %5658 = dma.hbm_to_vmem [thread:$0]  (!%p8333_p2), %s8313_s9, 128, %s927_s22, [#allocation8]  }
 0x102   : > { %p6312_p7 = pnand %p6310_p3, %p8332_p8 }
 0x104   : > { %p6313_p4 = pneg %p6312_p7 }
 0x106   : > { %p6318_p9 = pnand %p6316_p11, %p6313_p4 }
 0x108   : > { %6321 = shalt.err (!%p6318_p9)
}
 0x109   : > { %s6322_s15 = scalar_lea.vmem %s7415_s2, 16  ;;  %s6329_s30 = scalar_lea.vmem %s7415_s2, 32 }
 0x10a   : > { %p6323_p13 = scmp.ne.s32.totalorder %s7415_s2, %s6322_s15  ;;  %p6330_p10 = scmp.lt.s32.totalorder %s7415_s2, %s7415_s2 }
 0x10b   : > { %p6331_p5 = scmp.lt.s32.totalorder %s6329_s30, %s6322_s15 }
 0x10c   : > { %p6325_p12 = pnand %p6323_p13, %p8332_p8 }
 0x10d   : > { %p6332_p1 = por %p6331_p5, %p6330_p10 }
 0x10e   : > { %p6326_p0 = pneg %p6325_p12 }
 0x110   : > { %p6333_p6 = pnand %p6332_p1, %p6326_p0 }
 0x112   : > { %6336 = shalt.err (!%p6333_p6)
}
 0x113   : > { %5664 = dma.hbm_to_vmem [thread:$0]  (!%p8333_p2), %s7071_s25, 16, %s7415_s2, [#allocation11]  }
 0x114   : > { %s8269_s5 = sshll.u32 %s6955_s28, 4  ;;  %s1242_s22 = scalar_lea.vmem [#allocation34], %s7301_s20 }
 0x115   : > { %s7447_s7 = scalar_lea.hbm %s7176_s17, %s8269_s5  ;;  %s1249_s8 = sshll.u32 %s1242_s22, 4  ;;  %s1250_s8 = int_to_ptr.vmem [resolvable:$true] %s1249_s8 }
 0x116   : > { %s6337_s23 = scalar_lea.hbm %s7447_s7, 16  ;;  %p8334_p7 = scmp.ne.s32.totalorder %s8331_s18, 0 }
 0x117   : > { %p6338_p3 = scmp.ne.s32.totalorder %s7447_s7, %s6337_s23  ;;  %s6342_s4 = scalar_lea.hbm %s7176_s17, 32 }
 0x118   : > { %p6343_p9 = scmp.lt.u32.totalorder %s7447_s7, %s7176_s17  ;;  %p6344_p13 = scmp.lt.u32.totalorder %s6342_s4, %s6337_s23 }
 0x119   : > { %p6340_p4 = pnand %p6338_p3, %p8334_p7  ;;  %p6346_p0 = scmp.lt.u32.totalorder %s6337_s23, %s7447_s7 }
 0x11a   : > { %p6345_p12 = por %p6344_p13, %p6343_p9 }
 0x11b   : > { %p6341_p11 = pneg %p6340_p4 }
 0x11c   : > { %p6347_p10 = por %p6346_p0, %p6345_p12 }
 0x11e   : > { %p6348_p5 = pnand %p6347_p10, %p6341_p11 }
 0x120   : > { %6351 = shalt.err (!%p6348_p5)
}
 0x121   : > { %s6352_s2 = scalar_lea.vmem %s1250_s8, 16  ;;  %s7005_s11 = smov [#allocation34]  }
 0x122   : > { %p6353_p1 = scmp.ne.s32.totalorder %s1250_s8, %s6352_s2  ;;  %s6357_s15 = sshll.u32 %s7005_s11, 4  ;;  %s6358_s15 = int_to_ptr.vmem [resolvable:$false] %s6357_s15 }
 0x123   : > { %s6359_s30 = scalar_lea.vmem %s6358_s15, 32  ;;  %p6360_p3 = scmp.lt.s32.totalorder %s1250_s8, %s6358_s15 }
 0x124   : > { %p6355_p6 = pnand %p6353_p1, %p8334_p7  ;;  %p6361_p4 = scmp.lt.s32.totalorder %s6359_s30, %s6352_s2 }
 0x126   : > { %p6356_p2 = pneg %p6355_p6  ;;  %p6362_p8 = por %p6361_p4, %p6360_p3 }
 0x128   : > { %p6363_p9 = pnand %p6362_p8, %p6356_p2 }
 0x12a   : > { %6366 = shalt.err (!%p6363_p9)
}
 0x12b   : > { %p8335_p13 = scmp.ne.s32.totalorder %s8330_s16, 0  ;;  %s7006_s22 = smov [#allocation9]  }
 0x12c   : > { %s942_s23 = sshll.u32 %s7006_s22, 4  ;;  %s6367_s4 = scalar_lea.hbm %s7066_s21, 256  ;;  %s943_s23 = int_to_ptr.vmem [resolvable:$true] %s942_s23 }
 0x12d   : > { %5722 = dma.hbm_to_vmem [thread:$0]  (!%p8335_p13), %s7447_s7, 16, %s1250_s8, %s7314_s26  }
 0x12e   : > { %p6368_p11 = scmp.ne.s32.totalorder %s7066_s21, %s6367_s4  ;;  %p8336_p12 = scmp.ne.s32.totalorder %s8325_s0, 0 }
 0x12f   : > { %p6374_p5 = scmp.lt.u32.totalorder %s6367_s4, %s7066_s21 }
 0x130   : > { %p6370_p0 = pnand %p6368_p11, %p8336_p12 }
 0x132   : > { %p6371_p10 = pneg %p6370_p0 }
 0x134   : > { %p6376_p2 = pnand %p6374_p5, %p6371_p10 }
 0x136   : > { %6379 = shalt.err (!%p6376_p2)
}
 0x137   : > { %s6380_s2 = scalar_lea.vmem %s943_s23, 256  ;;  %p6388_p3 = scmp.lt.s32.totalorder %s943_s23, %s943_s23 }
 0x138   : > { %p6381_p8 = scmp.ne.s32.totalorder %s943_s23, %s6380_s2  ;;  %p6389_p4 = scmp.lt.s32.totalorder %s6380_s2, %s6380_s2 }
 0x13a   : > { %p6383_p1 = pnand %p6381_p8, %p8336_p12  ;;  %p6390_p9 = por %p6389_p4, %p6388_p3 }
 0x13c   : > { %p6384_p6 = pneg %p6383_p1 }
 0x13e   : > { %p6391_p13 = pnand %p6390_p9, %p6384_p6 }
 0x140   : > { %6394 = shalt.err (!%p6391_p13)
}
 0x141   : > { %s8270_s7 = smov 128   ;;  %s8272_s8 = smov 8  }
 0x142   : > { %p8337_p11 = scmp.ne.s32.totalorder %s8323_s10, 0  ;;  %s7009_s11 = smov [#allocation12]  }
 0x143   : > { %s966_s15 = sshll.u32 %s7009_s11, 4  ;;  %s7010_s30 = smov [#allocation13]   ;;  %s967_s15 = int_to_ptr.vmem [resolvable:$true] %s966_s15 }
 0x144   : > { %5661 = dma.hbm_to_vmem [thread:$0]  (!%p8337_p11), %s7066_s21, 256, %s943_s23, [#allocation8], %s8270_s7, %s8270_s7, %s8272_s8  }
 0x145   : > { %s980_s22 = sshll.u32 %s7010_s30, 4  ;;  %s6395_s4 = scalar_lea.hbm %s7076_s29, 256  ;;  %s7477_s22 = int_to_ptr.vmem [resolvable:$true] %s980_s22 }
 0x146   : > { %p6396_p13 = scmp.ne.s32.totalorder %s7076_s29, %s6395_s4  ;;  %p6402_p5 = scmp.lt.u32.totalorder %s6395_s4, %s7076_s29 }
 0x148   : > { %p6398_p0 = pnand %p6396_p13, %p8336_p12 }
 0x14a   : > { %p6399_p10 = pneg %p6398_p0 }
 0x14c   : > { %p6404_p2 = pnand %p6402_p5, %p6399_p10 }
 0x14e   : > { %6407 = shalt.err (!%p6404_p2)
}
 0x14f   : > { %s6408_s2 = scalar_lea.vmem %s967_s15, 256  ;;  %p6416_p3 = scmp.lt.s32.totalorder %s967_s15, %s967_s15 }
 0x150   : > { %p6409_p8 = scmp.ne.s32.totalorder %s967_s15, %s6408_s2  ;;  %p6417_p4 = scmp.lt.s32.totalorder %s6408_s2, %s6408_s2 }
 0x152   : > { %p6411_p1 = pnand %p6409_p8, %p8336_p12  ;;  %p6418_p9 = por %p6417_p4, %p6416_p3 }
 0x154   : > { %p6412_p6 = pneg %p6411_p1 }
 0x156   : > { %p6419_p7 = pnand %p6418_p9, %p6412_p6 }
 0x158   : > { %6422 = shalt.err (!%p6419_p7)
}
 0x159   : > { %5667 = dma.hbm_to_vmem [thread:$0]  (!%p8337_p11), %s7076_s29, 256, %s967_s15, [#allocation11], %s8270_s7, %s8270_s7, %s8272_s8  }
 0x15a   : > { %s6423_s23 = scalar_lea.hbm %s8315_s3, 16 }
 0x15b   : > { %p6424_p13 = scmp.ne.s32.totalorder %s8315_s3, %s6423_s23  ;;  %p6430_p5 = scmp.lt.u32.totalorder %s6423_s23, %s8315_s3 }
 0x15d   : > { %p6426_p0 = pnand %p6424_p13, %p8336_p12 }
 0x15f   : > { %p6427_p10 = pneg %p6426_p0 }
 0x161   : > { %p6432_p2 = pnand %p6430_p5, %p6427_p10 }
 0x163   : > { %6435 = shalt.err (!%p6432_p2)
}
 0x164   : > { %s6436_s11 = scalar_lea.vmem %s7477_s22, 16  ;;  %s6443_s30 = scalar_lea.vmem %s7477_s22, 32 }
 0x165   : > { %p6437_p7 = scmp.ne.s32.totalorder %s7477_s22, %s6436_s11  ;;  %p6444_p6 = scmp.lt.s32.totalorder %s7477_s22, %s7477_s22 }
 0x166   : > { %p6445_p3 = scmp.lt.s32.totalorder %s6443_s30, %s6436_s11 }
 0x167   : > { %p6439_p8 = pnand %p6437_p7, %p8336_p12 }
 0x168   : > { %p6446_p4 = por %p6445_p3, %p6444_p6 }
 0x169   : > { %p6440_p1 = pneg %p6439_p8 }
 0x16b   : > { %p6447_p9 = pnand %p6446_p4, %p6440_p1 }
 0x16d   : > { %6450 = shalt.err (!%p6447_p9)
}
 0x16e   : > { %5670 = dma.hbm_to_vmem [thread:$0]  (!%p8337_p11), %s8315_s3, 16, %s7477_s22, [#allocation14]  }
 0x16f   : > { %s7011_s15 = smov [#allocation16]   ;;  %s7012_s2 = smov [#allocation19]  }
 0x170   : > { %s1004_s4 = sshll.u32 %s7011_s15, 4  ;;  %s1028_s23 = sshll.u32 %s7012_s2, 4  ;;  %s1005_s4 = int_to_ptr.vmem [resolvable:$true] %s1004_s4  ;;  %s7508_s23 = int_to_ptr.vmem [resolvable:$true] %s1028_s23 }
 0x171   : > { %s6451_s11 = scalar_lea.hbm %s7091_s14, 16 }
 0x172   : > { %p6452_p13 = scmp.ne.s32.totalorder %s7091_s14, %s6451_s11  ;;  %p6458_p5 = scmp.lt.u32.totalorder %s6451_s11, %s7091_s14 }
 0x174   : > { %p6454_p0 = pnand %p6452_p13, %p8336_p12 }
 0x176   : > { %p6455_p10 = pneg %p6454_p0 }
 0x178   : > { %p6460_p2 = pnand %p6458_p5, %p6455_p10 }
 0x17a   : > { %6463 = shalt.err (!%p6460_p2)
}
 0x17b   : > { %s6464_s30 = scalar_lea.vmem %s1005_s4, 16  ;;  %s6471_s22 = scalar_lea.vmem %s1005_s4, 32 }
 0x17c   : > { %p6465_p7 = scmp.ne.s32.totalorder %s1005_s4, %s6464_s30  ;;  %p6472_p6 = scmp.lt.s32.totalorder %s1005_s4, %s1005_s4 }
 0x17d   : > { %p6473_p3 = scmp.lt.s32.totalorder %s6471_s22, %s6464_s30 }
 0x17e   : > { %p6467_p8 = pnand %p6465_p7, %p8336_p12 }
 0x17f   : > { %p6474_p4 = por %p6473_p3, %p6472_p6 }
 0x180   : > { %p6468_p1 = pneg %p6467_p8 }
 0x182   : > { %p6475_p9 = pnand %p6474_p4, %p6468_p1 }
 0x184   : > { %6478 = shalt.err (!%p6475_p9)
}
 0x185   : > { %5676 = dma.hbm_to_vmem [thread:$0]  (!%p8337_p11), %s7091_s14, 16, %s1005_s4, [#allocation17]  }
 0x186   : > { %s6479_s15 = scalar_lea.hbm %s7101_s24, 16 }
 0x187   : > { %p6480_p13 = scmp.ne.s32.totalorder %s7101_s24, %s6479_s15  ;;  %p6486_p5 = scmp.lt.u32.totalorder %s6479_s15, %s7101_s24 }
 0x189   : > { %p6482_p0 = pnand %p6480_p13, %p8336_p12 }
 0x18b   : > { %p6483_p10 = pneg %p6482_p0 }
 0x18d   : > { %p6488_p2 = pnand %p6486_p5, %p6483_p10 }
 0x18f   : > { %6491 = shalt.err (!%p6488_p2)
}
 0x190   : > { %s6492_s2 = scalar_lea.vmem %s7508_s23, 16  ;;  %s6499_s11 = scalar_lea.vmem %s7508_s23, 32 }
 0x191   : > { %p6493_p7 = scmp.ne.s32.totalorder %s7508_s23, %s6492_s2  ;;  %p6500_p6 = scmp.lt.s32.totalorder %s7508_s23, %s7508_s23 }
 0x192   : > { %p6501_p3 = scmp.lt.s32.totalorder %s6499_s11, %s6492_s2 }
 0x193   : > { %p6495_p8 = pnand %p6493_p7, %p8336_p12 }
 0x194   : > { %p6502_p4 = por %p6501_p3, %p6500_p6 }
 0x195   : > { %p6496_p1 = pneg %p6495_p8 }
 0x197   : > { %p6503_p9 = pnand %p6502_p4, %p6496_p1 }
 0x199   : > { %6506 = shalt.err (!%p6503_p9)
}
 0x19a   : > { %5682 = dma.hbm_to_vmem [thread:$0]  (!%p8337_p11), %s7101_s24, 16, %s7508_s23, [#allocation20]  }
 0x19b   : > { %s7013_s4 = smov [#allocation22]   ;;  %s7014_s22 = smov [#allocation25]  }
 0x19c   : > { %s1052_s30 = sshll.u32 %s7013_s4, 4  ;;  %s1076_s15 = sshll.u32 %s7014_s22, 4  ;;  %s1053_s30 = int_to_ptr.vmem [resolvable:$true] %s1052_s30  ;;  %s7536_s15 = int_to_ptr.vmem [resolvable:$true] %s1076_s15 }
 0x19d   : > { %s6507_s2 = scalar_lea.hbm %s8314_s6, 16 }
 0x19e   : > { %p6508_p13 = scmp.ne.s32.totalorder %s8314_s6, %s6507_s2  ;;  %p6514_p5 = scmp.lt.u32.totalorder %s6507_s2, %s8314_s6 }
 0x1a0   : > { %p6510_p0 = pnand %p6508_p13, %p8336_p12 }
 0x1a2   : > { %p6511_p10 = pneg %p6510_p0 }
 0x1a4   : > { %p6516_p2 = pnand %p6514_p5, %p6511_p10 }
 0x1a6   : > { %6519 = shalt.err (!%p6516_p2)
}
 0x1a7   : > { %s6520_s11 = scalar_lea.vmem %s1053_s30, 16  ;;  %s6527_s23 = scalar_lea.vmem %s1053_s30, 32 }
 0x1a8   : > { %p6521_p7 = scmp.ne.s32.totalorder %s1053_s30, %s6520_s11  ;;  %p6528_p6 = scmp.lt.s32.totalorder %s1053_s30, %s1053_s30 }
 0x1a9   : > { %p6529_p3 = scmp.lt.s32.totalorder %s6527_s23, %s6520_s11 }
 0x1aa   : > { %p6523_p8 = pnand %p6521_p7, %p8336_p12 }
 0x1ab   : > { %p6530_p4 = por %p6529_p3, %p6528_p6 }
 0x1ac   : > { %p6524_p1 = pneg %p6523_p8 }
 0x1ae   : > { %p6531_p9 = pnand %p6530_p4, %p6524_p1 }
 0x1b0   : > { %6534 = shalt.err (!%p6531_p9)
}
 0x1b1   : > { %s8338_s4 = sld [smem:[#allocation63_spill]] }
 0x1b2   : > { %5688 = dma.hbm_to_vmem [thread:$0]  (!%p8337_p11), %s8314_s6, 16, %s1053_s30, [#allocation23]  }
 0x1b7   : > { %s6535_s22 = scalar_lea.hbm %s8338_s4, 16 }
 0x1b8   : > { %p6536_p13 = scmp.ne.s32.totalorder %s8338_s4, %s6535_s22  ;;  %p6542_p5 = scmp.lt.u32.totalorder %s6535_s22, %s8338_s4 }
 0x1ba   : > { %p6538_p0 = pnand %p6536_p13, %p8336_p12 }
 0x1bc   : > { %p6539_p10 = pneg %p6538_p0 }
 0x1be   : > { %p6544_p2 = pnand %p6542_p5, %p6539_p10 }
 0x1c0   : > { %6547 = shalt.err (!%p6544_p2)
}
 0x1c1   : > { %s6548_s2 = scalar_lea.vmem %s7536_s15, 16  ;;  %s6555_s11 = scalar_lea.vmem %s7536_s15, 32 }
 0x1c2   : > { %p6549_p7 = scmp.ne.s32.totalorder %s7536_s15, %s6548_s2  ;;  %p6556_p6 = scmp.lt.s32.totalorder %s7536_s15, %s7536_s15 }
 0x1c3   : > { %p6557_p3 = scmp.lt.s32.totalorder %s6555_s11, %s6548_s2 }
 0x1c4   : > { %p6551_p8 = pnand %p6549_p7, %p8336_p12 }
 0x1c5   : > { %p6558_p4 = por %p6557_p3, %p6556_p6 }
 0x1c6   : > { %p6552_p1 = pneg %p6551_p8 }
 0x1c8   : > { %p6559_p9 = pnand %p6558_p4, %p6552_p1 }
 0x1ca   : > { %6562 = shalt.err (!%p6559_p9)
}
 0x1cb   : > { %s8339_s30 = sld [smem:[#allocation73_spill]]  ;;  %s4847_s23 = sshll.u32 %s7301_s20, 8 }
 0x1cc   : > { %5694 = dma.hbm_to_vmem [thread:$0]  (!%p8337_p11), %s8338_s4, 16, %s7536_s15, [#allocation26]  }
 0x1cd   : > { %s5070_s22 = sshll.u32 %s6955_s28, 12  ;;  %s1275_s2 = scalar_lea.vmem [#allocation35], %s4847_s23 }
 0x1ce   : > { %s1282_s11 = sshll.u32 %s1275_s2, 4  ;;  %s7015_s7 = smov [#allocation15]   ;;  %s7569_s11 = int_to_ptr.vmem [resolvable:$true] %s1282_s11 }
 0x1cf   : > { %s7571_s8 = sshll.u32 %s7015_s7, 4  ;;  %p8340_p0 = scmp.ne.s32.totalorder %s8331_s18, 0  ;;  %s991_s8 = int_to_ptr.vmem [resolvable:$true] %s7571_s8 }
 0x1d1   : > { %s7567_s5 = scalar_lea.hbm %s8339_s30, %s5070_s22  ;;  %s6568_s15 = scalar_lea.hbm %s8339_s30, 8192 }
 0x1d2   : > { %s6563_s1 = scalar_lea.hbm %s7567_s5, 4096  ;;  %p6569_p2 = scmp.lt.u32.totalorder %s7567_s5, %s8339_s30 }
 0x1d3   : > { %p6564_p13 = scmp.ne.s32.totalorder %s7567_s5, %s6563_s1  ;;  %p6570_p7 = scmp.lt.u32.totalorder %s6568_s15, %s6563_s1 }
 0x1d4   : > { %p6572_p1 = scmp.lt.u32.totalorder %s6563_s1, %s7567_s5 }
 0x1d5   : > { %p6566_p10 = pnand %p6564_p13, %p8340_p0  ;;  %p6571_p8 = por %p6570_p7, %p6569_p2 }
 0x1d7   : > { %p6567_p5 = pneg %p6566_p10  ;;  %p6573_p6 = por %p6572_p1, %p6571_p8 }
 0x1d9   : > { %p6574_p3 = pnand %p6573_p6, %p6567_p5 }
 0x1db   : > { %6577 = shalt.err (!%p6574_p3)
}
 0x1dc   : > { %s6578_s23 = scalar_lea.vmem %s7569_s11, 4096  ;;  %s7016_s7 = smov [#allocation35]  }
 0x1dd   : > { %p6579_p4 = scmp.ne.s32.totalorder %s7569_s11, %s6578_s23  ;;  %s6583_s22 = sshll.u32 %s7016_s7, 4  ;;  %s6584_s22 = int_to_ptr.vmem [resolvable:$false] %s6583_s22 }
 0x1de   : > { %s6585_s2 = scalar_lea.vmem %s6584_s22, 8192  ;;  %p6586_p13 = scmp.lt.s32.totalorder %s7569_s11, %s6584_s22 }
 0x1df   : > { %p6581_p9 = pnand %p6579_p4, %p8340_p0  ;;  %p6587_p10 = scmp.lt.s32.totalorder %s6585_s2, %s6578_s23 }
 0x1e1   : > { %p6582_p11 = pneg %p6581_p9  ;;  %p6588_p2 = por %p6587_p10, %p6586_p13 }
 0x1e3   : > { %p6589_p7 = pnand %p6588_p2, %p6582_p11 }
 0x1e5   : > { %6592 = shalt.err (!%p6589_p7)
}
 0x1e6   : > { %p8341_p5 = scmp.ne.s32.totalorder %s8330_s16, 0  ;;  %s8342_s1 = smov 64  }
 0x1e7   : > { %s8343_s15 = sld [smem:[#allocation58_spill]] }
 0x1e8   : > { %5725 = dma.hbm_to_vmem [thread:$0]  (!%p8341_p5), %s7567_s5, 4096, %s7569_s11, %s7314_s26, %s8342_s1, %s8342_s1, %s7002_s19  }
 0x1ed   : > { %s6593_s7 = scalar_lea.hbm %s8343_s15, 4096 }
 0x1ee   : > { %p6594_p8 = scmp.ne.s32.totalorder %s8343_s15, %s6593_s7  ;;  %p6600_p6 = scmp.lt.u32.totalorder %s6593_s7, %s8343_s15 }
 0x1f0   : > { %p6596_p11 = pnand %p6594_p8, %p8336_p12 }
 0x1f2   : > { %p6597_p1 = pneg %p6596_p11 }
 0x1f4   : > { %p6602_p3 = pnand %p6600_p6, %p6597_p1 }
 0x1f6   : > { %6605 = shalt.err (!%p6602_p3)
}
 0x1f7   : > { %s6606_s23 = scalar_lea.vmem %s991_s8, 4096  ;;  %p6614_p10 = scmp.lt.s32.totalorder %s991_s8, %s991_s8 }
 0x1f8   : > { %p6607_p4 = scmp.ne.s32.totalorder %s991_s8, %s6606_s23  ;;  %p6615_p2 = scmp.lt.s32.totalorder %s6606_s23, %s6606_s23 }
 0x1fa   : > { %p6609_p9 = pnand %p6607_p4, %p8336_p12  ;;  %p6616_p7 = por %p6615_p2, %p6614_p10 }
 0x1fc   : > { %p6610_p13 = pneg %p6609_p9 }
 0x1fe   : > { %p6617_p0 = pnand %p6616_p7, %p6610_p13 }
 0x200   : > { %6620 = shalt.err (!%p6617_p0)
}
 0x201   : > { %p8344_p5 = scmp.ne.s32.totalorder %s8323_s10, 0  ;;  %s8345_s19 = smov 8  }
 0x202   : > { %s8346_s5 = smov 128   ;;  %s8347_s11 = sld [smem:[#allocation59_spill]] }
 0x203   : > { %5673 = dma.hbm_to_vmem [thread:$0]  (!%p8344_p5), %s8343_s15, 4096, %s991_s8, [#allocation14], %s8346_s5, %s8346_s5, %s8345_s19  }
 0x204   : > { %s7017_s22 = smov [#allocation18]   ;;  %s7018_s1 = smov [#allocation21]  }
 0x205   : > { %s1014_s2 = sshll.u32 %s7017_s22, 4  ;;  %s1038_s7 = sshll.u32 %s7018_s1, 4  ;;  %s1015_s2 = int_to_ptr.vmem [resolvable:$true] %s1014_s2  ;;  %s1039_s7 = int_to_ptr.vmem [resolvable:$true] %s1038_s7 }
 0x208   : > { %s6621_s23 = scalar_lea.hbm %s8347_s11, 2048 }
 0x209   : > { %p6622_p8 = scmp.ne.s32.totalorder %s8347_s11, %s6621_s23  ;;  %p6628_p1 = scmp.lt.u32.totalorder %s6621_s23, %s8347_s11 }
 0x20b   : > { %p6624_p0 = pnand %p6622_p8, %p8336_p12 }
 0x20d   : > { %p6625_p11 = pneg %p6624_p0 }
 0x20f   : > { %p6630_p6 = pnand %p6628_p1, %p6625_p11 }
 0x211   : > { %6633 = shalt.err (!%p6630_p6)
}
 0x212   : > { %s6634_s3 = scalar_lea.vmem %s1015_s2, 2048  ;;  %p6642_p13 = scmp.lt.s32.totalorder %s1015_s2, %s1015_s2 }
 0x213   : > { %p6635_p3 = scmp.ne.s32.totalorder %s1015_s2, %s6634_s3  ;;  %p6643_p10 = scmp.lt.s32.totalorder %s6634_s3, %s6634_s3 }
 0x215   : > { %p6637_p4 = pnand %p6635_p3, %p8336_p12  ;;  %p6644_p2 = por %p6643_p10, %p6642_p13 }
 0x217   : > { %p6638_p9 = pneg %p6637_p4 }
 0x219   : > { %p6645_p7 = pnand %p6644_p2, %p6638_p9 }
 0x21b   : > { %6648 = shalt.err (!%p6645_p7)
}
 0x21c   : > { %s8348_s8 = sld [smem:[#allocation60_spill]] }
 0x21d   : > { %5679 = dma.hbm_to_vmem [thread:$0]  (!%p8344_p5), %s8347_s11, 2048, %s1015_s2, [#allocation17], %s8346_s5, %s8346_s5, %s8345_s19  }
 0x222   : > { %s6649_s22 = scalar_lea.hbm %s8348_s8, 256 }
 0x223   : > { %p6650_p8 = scmp.ne.s32.totalorder %s8348_s8, %s6649_s22  ;;  %p6656_p1 = scmp.lt.u32.totalorder %s6649_s22, %s8348_s8 }
 0x225   : > { %p6652_p0 = pnand %p6650_p8, %p8336_p12 }
 0x227   : > { %p6653_p11 = pneg %p6652_p0 }
 0x229   : > { %p6658_p6 = pnand %p6656_p1, %p6653_p11 }
 0x22b   : > { %6661 = shalt.err (!%p6658_p6)
}
 0x22c   : > { %s6662_s3 = scalar_lea.vmem %s1039_s7, 256  ;;  %p6670_p13 = scmp.lt.s32.totalorder %s1039_s7, %s1039_s7 }
 0x22d   : > { %p6663_p3 = scmp.ne.s32.totalorder %s1039_s7, %s6662_s3  ;;  %p6671_p10 = scmp.lt.s32.totalorder %s6662_s3, %s6662_s3 }
 0x22f   : > { %p6665_p4 = pnand %p6663_p3, %p8336_p12  ;;  %p6672_p2 = por %p6671_p10, %p6670_p13 }
 0x231   : > { %p6666_p9 = pneg %p6665_p4 }
 0x233   : > { %p6673_p7 = pnand %p6672_p2, %p6666_p9 }
 0x235   : > { %6676 = shalt.err (!%p6673_p7)
}
 0x236   : > { %s8349_s2 = sld [smem:[#allocation62_spill]]  ;;  %s7019_s1 = smov [#allocation24]  }
 0x237   : > { %5685 = dma.hbm_to_vmem [thread:$0]  (!%p8344_p5), %s8348_s8, 256, %s1039_s7, [#allocation20], %s8346_s5, %s8346_s5, %s8345_s19  }
 0x238   : > { %s1062_s23 = sshll.u32 %s7019_s1, 4  ;;  %s7020_s22 = smov [#allocation27]   ;;  %s1063_s23 = int_to_ptr.vmem [resolvable:$true] %s1062_s23 }
 0x239   : > { %s1086_s4 = sshll.u32 %s7020_s22, 4  ;;  %s1087_s4 = int_to_ptr.vmem [resolvable:$true] %s1086_s4 }
 0x23c   : > { %s6677_s3 = scalar_lea.hbm %s8349_s2, 1024 }
 0x23d   : > { %p6678_p8 = scmp.ne.s32.totalorder %s8349_s2, %s6677_s3  ;;  %p6684_p1 = scmp.lt.u32.totalorder %s6677_s3, %s8349_s2 }
 0x23f   : > { %p6680_p0 = pnand %p6678_p8, %p8336_p12 }
 0x241   : > { %p6681_p11 = pneg %p6680_p0 }
 0x243   : > { %p6686_p6 = pnand %p6684_p1, %p6681_p11 }
 0x245   : > { %6689 = shalt.err (!%p6686_p6)
}
 0x246   : > { %s6690_s6 = scalar_lea.vmem %s1063_s23, 1024  ;;  %p6698_p13 = scmp.lt.s32.totalorder %s1063_s23, %s1063_s23 }
 0x247   : > { %p6691_p3 = scmp.ne.s32.totalorder %s1063_s23, %s6690_s6  ;;  %p6699_p10 = scmp.lt.s32.totalorder %s6690_s6, %s6690_s6 }
 0x249   : > { %p6693_p4 = pnand %p6691_p3, %p8336_p12  ;;  %p6700_p2 = por %p6699_p10, %p6698_p13 }
 0x24b   : > { %p6694_p9 = pneg %p6693_p4 }
 0x24d   : > { %p6701_p7 = pnand %p6700_p2, %p6694_p9 }
 0x24f   : > { %6704 = shalt.err (!%p6701_p7)
}
 0x250   : > { %s8350_s7 = sld [smem:[#allocation64_spill]] }
 0x251   : > { %5691 = dma.hbm_to_vmem [thread:$0]  (!%p8344_p5), %s8349_s2, 1024, %s1063_s23, [#allocation23], %s8346_s5, %s8346_s5, %s8345_s19  }
 0x256   : > { %s6705_s1 = scalar_lea.hbm %s8350_s7, 1024 }
 0x257   : > { %p6706_p8 = scmp.ne.s32.totalorder %s8350_s7, %s6705_s1  ;;  %p6712_p1 = scmp.lt.u32.totalorder %s6705_s1, %s8350_s7 }
 0x259   : > { %p6708_p0 = pnand %p6706_p8, %p8336_p12 }
 0x25b   : > { %p6709_p11 = pneg %p6708_p0 }
 0x25d   : > { %p6714_p6 = pnand %p6712_p1, %p6709_p11 }
 0x25f   : > { %6717 = shalt.err (!%p6714_p6)
}
 0x260   : > { %s6718_s6 = scalar_lea.vmem %s1087_s4, 1024  ;;  %p6726_p13 = scmp.lt.s32.totalorder %s1087_s4, %s1087_s4 }
 0x261   : > { %p6719_p3 = scmp.ne.s32.totalorder %s1087_s4, %s6718_s6  ;;  %p6727_p10 = scmp.lt.s32.totalorder %s6718_s6, %s6718_s6 }
 0x263   : > { %p6721_p4 = pnand %p6719_p3, %p8336_p12  ;;  %p6728_p2 = por %p6727_p10, %p6726_p13 }
 0x265   : > { %p6722_p9 = pneg %p6721_p4 }
 0x267   : > { %p6729_p7 = pnand %p6728_p2, %p6722_p9 }
 0x269   : > { %6732 = shalt.err (!%p6729_p7)
}
 0x26a   : > { %s8351_s23 = sld [smem:[#allocation65_spill]]  ;;  %s7021_s22 = smov [#allocation28]  }
 0x26b   : > { %5697 = dma.hbm_to_vmem [thread:$0]  (!%p8344_p5), %s8350_s7, 1024, %s1087_s4, [#allocation26], %s8346_s5, %s8346_s5, %s8345_s19  }
 0x26c   : > { %s1100_s1 = sshll.u32 %s7021_s22, 4  ;;  %s7022_s2 = smov [#allocation37]   ;;  %s1101_s1 = int_to_ptr.vmem [resolvable:$true] %s1100_s1 }
 0x26d   : > { %s1119_s8 = sshll.u32 %s7022_s2, 4  ;;  %s1120_s8 = int_to_ptr.vmem [resolvable:$true] %s1119_s8 }
 0x270   : > { %s8352_s3 = smov %s8351_s23  ;;  %s6733_s6 = scalar_lea.hbm %s8351_s23, 16 }
 0x271   : > { %p6734_p8 = scmp.ne.s32.totalorder %s8352_s3, %s6733_s6  ;;  %p6740_p1 = scmp.lt.u32.totalorder %s6733_s6, %s8352_s3 }
 0x273   : > { %p6736_p0 = pnand %p6734_p8, %p8336_p12 }
 0x275   : > { %p6737_p11 = pneg %p6736_p0 }
 0x277   : > { %p6742_p6 = pnand %p6740_p1, %p6737_p11 }
 0x279   : > { %6745 = shalt.err (!%p6742_p6)
}
 0x27a   : > { %s6746_s9 = scalar_lea.vmem %s1101_s1, 16  ;;  %s6753_s4 = scalar_lea.vmem %s1101_s1, 32 }
 0x27b   : > { %p6747_p3 = scmp.ne.s32.totalorder %s1101_s1, %s6746_s9  ;;  %p6754_p13 = scmp.lt.s32.totalorder %s1101_s1, %s1101_s1 }
 0x27c   : > { %p6755_p10 = scmp.lt.s32.totalorder %s6753_s4, %s6746_s9 }
 0x27d   : > { %p6749_p4 = pnand %p6747_p3, %p8336_p12 }
 0x27e   : > { %p6756_p2 = por %p6755_p10, %p6754_p13 }
 0x27f   : > { %p6750_p9 = pneg %p6749_p4 }
 0x281   : > { %p6757_p7 = pnand %p6756_p2, %p6750_p9 }
 0x283   : > { %6760 = shalt.err (!%p6757_p7)
}
 0x284   : > { %s8353_s2 = sld [smem:[#allocation75_spill]] }
 0x285   : > { %5700 = dma.hbm_to_vmem [thread:$0]  (!%p8344_p5), %s8352_s3, 16, %s1101_s1, [#allocation29]  }
 0x28a   : > { %s6761_s23 = scalar_lea.hbm %s8353_s2, 2048 }
 0x28b   : > { %p6762_p8 = scmp.ne.s32.totalorder %s8353_s2, %s6761_s23  ;;  %p6768_p1 = scmp.lt.u32.totalorder %s6761_s23, %s8353_s2 }
 0x28d   : > { %p6764_p0 = pnand %p6762_p8, %p8336_p12 }
 0x28f   : > { %p6765_p11 = pneg %p6764_p0 }
 0x291   : > { %p6770_p6 = pnand %p6768_p1, %p6765_p11 }
 0x293   : > { %6773 = shalt.err (!%p6770_p6)
}
 0x294   : > { %s6774_s9 = scalar_lea.vmem %s1120_s8, 2048  ;;  %p6782_p13 = scmp.lt.s32.totalorder %s1120_s8, %s1120_s8 }
 0x295   : > { %p6775_p3 = scmp.ne.s32.totalorder %s1120_s8, %s6774_s9  ;;  %p6783_p10 = scmp.lt.s32.totalorder %s6774_s9, %s6774_s9 }
 0x297   : > { %p6777_p4 = pnand %p6775_p3, %p8336_p12  ;;  %p6784_p2 = por %p6783_p10, %p6782_p13 }
 0x299   : > { %p6778_p9 = pneg %p6777_p4 }
 0x29b   : > { %p6785_p7 = pnand %p6784_p2, %p6778_p9 }
 0x29d   : > { %6788 = shalt.err (!%p6785_p7)
}
 0x29e   : > { %s8354_s22 = sld [smem:[#allocation74_spill]]  ;;  %s8356_s6 = sld [smem:[#allocation76_spill]] }
 0x29f   : > { %5703 = dma.hbm_to_vmem [thread:$0]  (!%p8344_p5), %s8353_s2, 2048, %s1120_s8, [#allocation8], %s8346_s5, %s8346_s5, %s8345_s19  }
 0x2a0   : > { %s7023_s4 = smov [#allocation38]   ;;  %s8357_s9 = sshll.u32 %s6955_s28, 4 }
 0x2a1   : > { %s1133_s23 = sshll.u32 %s7023_s4, 4  ;;  %s1134_s23 = int_to_ptr.vmem [resolvable:$true] %s1133_s23 }
 0x2a4   : > { %s8355_s1 = smov %s8354_s22  ;;  %s7686_s3 = scalar_lea.hbm %s8354_s22, %s8357_s9 }
 0x2a5   : > { %s6789_s7 = scalar_lea.hbm %s8356_s6, 32 }
 0x2a6   : > { %p6790_p8 = scmp.ne.s32.totalorder %s8356_s6, %s6789_s7  ;;  %p6796_p1 = scmp.lt.u32.totalorder %s6789_s7, %s8356_s6 }
 0x2a8   : > { %p6792_p0 = pnand %p6790_p8, %p8336_p12 }
 0x2aa   : > { %p6793_p11 = pneg %p6792_p0 }
 0x2ac   : > { %p6798_p6 = pnand %p6796_p1, %p6793_p11 }
 0x2ae   : > { %6801 = shalt.err (!%p6798_p6)
}
 0x2af   : > { %s6802_s11 = scalar_lea.vmem %s1134_s23, 32  ;;  %p6810_p13 = scmp.lt.s32.totalorder %s1134_s23, %s1134_s23 }
 0x2b0   : > { %p6803_p3 = scmp.ne.s32.totalorder %s1134_s23, %s6802_s11  ;;  %p6811_p10 = scmp.lt.s32.totalorder %s6802_s11, %s6802_s11 }
 0x2b2   : > { %p6805_p4 = pnand %p6803_p3, %p8336_p12  ;;  %p6812_p2 = por %p6811_p10, %p6810_p13 }
 0x2b4   : > { %p6806_p9 = pneg %p6805_p4 }
 0x2b6   : > { %p6813_p7 = pnand %p6812_p2, %p6806_p9 }
 0x2b8   : > { %6816 = shalt.err (!%p6813_p7)
}
 0x2b9   : > { %5706 = dma.hbm_to_vmem [thread:$0]  (!%p8344_p5), %s8356_s6, 32, %s1134_s23, [#allocation11]  }
 0x2ba   : > { %s1295_s28 = scalar_lea.vmem [#allocation36], %s7301_s20  ;;  %s6817_s19 = scalar_lea.hbm %s7686_s3, 16 }
 0x2bb   : > { %s1302_s0 = sshll.u32 %s1295_s28, 4  ;;  %p6818_p12 = scmp.ne.s32.totalorder %s7686_s3, %s6817_s19  ;;  %s1303_s0 = int_to_ptr.vmem [resolvable:$true] %s1302_s0 }
 0x2bc   : > { %p8358_p8 = scmp.ne.s32.totalorder %s8331_s18, 0  ;;  %s6822_s5 = scalar_lea.hbm %s8355_s1, 32 }
 0x2bd   : > { %p6823_p1 = scmp.lt.u32.totalorder %s7686_s3, %s8355_s1  ;;  %p6824_p6 = scmp.lt.u32.totalorder %s6822_s5, %s6817_s19 }
 0x2be   : > { %p6820_p0 = pnand %p6818_p12, %p8358_p8  ;;  %p6826_p4 = scmp.lt.u32.totalorder %s6817_s19, %s7686_s3 }
 0x2bf   : > { %p6825_p3 = por %p6824_p6, %p6823_p1 }
 0x2c0   : > { %p6821_p11 = pneg %p6820_p0 }
 0x2c1   : > { %p6827_p9 = por %p6826_p4, %p6825_p3 }
 0x2c3   : > { %p6828_p13 = pnand %p6827_p9, %p6821_p11 }
 0x2c5   : > { %6831 = shalt.err (!%p6828_p13)
}
 0x2c6   : > { %s6832_s10 = scalar_lea.vmem %s1303_s0, 16  ;;  %s7024_s20 = smov [#allocation36]  }
 0x2c7   : > { %p6833_p10 = scmp.ne.s32.totalorder %s1303_s0, %s6832_s10  ;;  %s6837_s11 = sshll.u32 %s7024_s20, 4  ;;  %s6838_s11 = int_to_ptr.vmem [resolvable:$false] %s6837_s11 }
 0x2c8   : > { %s6839_s8 = scalar_lea.vmem %s6838_s11, 32  ;;  %p6840_p7 = scmp.lt.s32.totalorder %s1303_s0, %s6838_s11 }
 0x2c9   : > { %p6835_p5 = pnand %p6833_p10, %p8358_p8  ;;  %p6841_p12 = scmp.lt.s32.totalorder %s6839_s8, %s6832_s10 }
 0x2cb   : > { %p6836_p2 = pneg %p6835_p5  ;;  %p6842_p0 = por %p6841_p12, %p6840_p7 }
 0x2cd   : > { %p6843_p1 = pnand %p6842_p0, %p6836_p2 }
 0x2cf   : > { %6846 = shalt.err (!%p6843_p1)
}
 0x2d0   : > { %p8359_p6 = scmp.ne.s32.totalorder %s8330_s16, 0  ;;  %s8360_s7 = sld [smem:[#allocation83_spill]] }
 0x2d2   : > { %5728 = dma.hbm_to_vmem [thread:$0]  (!%p8359_p6), %s7686_s3, 16, %s1303_s0, %s7314_s26  }
 0x2d6   : > { %p8361_p11 = scmp.ne.s32.totalorder %s8360_s7, 0 }
 0x2d7   : > { %s8362_s18 = sld [smem:[#allocation82_spill]] (!%p8361_p11) }
 0x2d8   : > { %1311 = sbr.rel (%p8361_p11) target bundleno = 4678 (0x1246), region = 160 }
 0x2dd   : > { %p8363_p8 = scmp.eq.s32.totalorder (!%p8361_p11), %s8362_s18, 0 }
 0x2df   : > { %6890 = dma.done.wait (%p8363_p8), [#allocation5], 128   ;;  %p8364_p3 = pmov %p8363_p8 }
 0x2e1   : > { %6892 = vsyncadd (%p8364_p3), [#allocation5], 4294967168  ;;  %p8365_p4 = pmov %p8364_p3 }
 0x2e2   : > { %p8366_p9 = pmov %p8364_p3 }
 0x2e3   : > { %6894 = dma.done.wait (%p8365_p4), [#allocation8], 384  }
 0x2e4   : > { %6896 = vsyncadd (%p8366_p9), [#allocation8], 4294966912  ;;  %p8367_p13 = pmov %p8364_p3 }
 0x2e5   : > { %p8368_p10 = pmov %p8364_p3 }
 0x2e6   : > { %6898 = dma.done.wait (%p8367_p13), [#allocation11], 272  }
 0x2e7   : > { %6900 = vsyncadd (%p8368_p10), [#allocation11], 4294967024  ;;  %p8369_p5 = pmov %p8364_p3 }
 0x2e8   : > { %p8370_p2 = pmov %p8364_p3 }
 0x2e9   : > { %6902 = dma.done.wait (%p8369_p5), [#allocation14], 4112  }
 0x2ea   : > { %6904 = vsyncadd (%p8370_p2), [#allocation14], 4294963184  ;;  %p8371_p7 = pmov %p8370_p2 }
 0x2eb   : > { %p8372_p12 = pmov %p8370_p2 }
 0x2ec   : > { %6906 = dma.done.wait (%p8371_p7), [#allocation17], 2064  }
 0x2ed   : > { %6908 = vsyncadd (%p8372_p12), [#allocation17], 4294965232  ;;  %p8373_p0 = pmov %p8370_p2 }
 0x2ef   : > { %6910 = dma.done.wait (%p8373_p0), [#allocation20], 272   ;;  %p8374_p1 = pmov %p8373_p0 }
 0x2f0   : > { %p8375_p6 = pmov %p8373_p0 }
 0x2f1   : > { %6912 = vsyncadd (%p8374_p1), [#allocation20], 4294967024 }
 0x2f2   : > { %6914 = dma.done.wait (%p8375_p6), [#allocation23], 1040   ;;  %p8376_p11 = pmov %p8373_p0 }
 0x2f3   : > { %p8377_p8 = pmov %p8373_p0 }
 0x2f4   : > { %6916 = vsyncadd (%p8376_p11), [#allocation23], 4294966256 }
 0x2f5   : > { %6918 = dma.done.wait (%p8377_p8), [#allocation26], 1040   ;;  %p8378_p3 = pmov %p8373_p0 }
 0x2f6   : > { %p8379_p4 = pmov %p8373_p0 }
 0x2f7   : > { %6920 = vsyncadd (%p8378_p3), [#allocation26], 4294966256 }
 0x2f8   : > { %6922 = dma.done.wait (%p8379_p4), [#allocation29], 16   ;;  %p8380_p9 = pmov %p8373_p0 }
 0x2f9   : > { %s8381_s26 = sld [smem:[#allocation80_spill]]  ;;  %s8382_s16 = sld [smem:[#allocation86_spill]] }
 0x2fa   : > { %6924 = vsyncadd (%p8380_p9), [#allocation29], 4294967280  ;;  %s1377_s3 = sand.u32 1, %s8362_s18  }
 0x2fb   : > { %s1378_s23 = scalar_lea.sflag [#allocation5], %s1377_s3 }
 0x2ff   : > { %s7753_s22 = sand.u32 1, %s8381_s26   ;;  %p8383_p13 = scmp.ne.s32.totalorder %s8382_s16, 0 }
 0x300   : > { %s5558_s4 = smul.u32 384, %s7753_s22 }
 0x302   : > { %s7756_s9 = scalar_lea.vmem [#allocation30], %s5558_s4 }
 0x303   : > { %6926 = dma.done.wait (%p8383_p13), %s1378_s23, 14416  }
 0x304   : > { %6928 = vsyncadd (%p8383_p13), %s1378_s23, 4294952880  ;;  %s5559_s28 = smul.u32 192, %s7753_s22  ;;  %s4868_s0 = sshll.u32 %s7753_s22, 6 }
 0x305   : > { %s5560_s19 = smul.u32 3, %s7753_s22  ;;  %s4869_s5 = sshll.u32 %s7753_s22, 8 }
 0x306   : > { %s7766_s10 = scalar_lea.vmem [#allocation31], %s5559_s28  ;;  %s7770_s11 = scalar_lea.vmem [#allocation33], %s4868_s0 }
 0x307   : > { %s7768_s20 = scalar_lea.vmem [#allocation32], %s5560_s19  ;;  %s7773_s7 = scalar_lea.vmem [#allocation35], %s4869_s5 }
 0x308   : > { %p8384_p10 = pmov %p8373_p0 }
 0x309   : > { %p8385_p5 = pmov %p8373_p0 }
 0x30a   : > { %6930 = dma.done.wait (%p8384_p10), [#allocation8], 2048  }
 0x30b   : > { %6932 = vsyncadd (%p8385_p5), [#allocation8], 4294965248  ;;  %p8386_p2 = pmov %p8373_p0 }
 0x30c   : > { %p8387_p7 = pmov %p8373_p0 }
 0x30d   : > { %6934 = dma.done.wait (%p8386_p2), [#allocation11], 32  }
 0x30e   : > { %6936 = vsyncadd (%p8387_p7), [#allocation11], 4294967264  ;;  %s8388_s16 = sld [smem:[#allocation71_spill]]  ;;  %s8389_s3 = sld [smem:[#allocation70_spill]] }
 0x30f   : > { %s8390_s4 = sld [smem:[#allocation72_spill]]  ;;  %p1564_p12 = scmp.lt.s32.totalorder %s8362_s18, 1 }
 0x310   : > { %p8391_p0 = scmp.ne.s32.totalorder %s8362_s18, 0 }
 0x311   : > { %s1565_s23 = scalar_select %p1564_p12, %s8362_s18, 1 }
 0x312   : > { %1581 = sbr.rel (%p8391_p0) target bundleno = 1506 (0x5e2), region = 264  ;;  %v1583_v0 = vld [vmem:[#allocation9] sm:$0xff] (!%p8391_p0)  ;;  %v1584_v1 = vld [vmem:[#allocation9 + $0x8] sm:$0xff] (!%p8391_p0)  ;;  %v1667_v2 = vld [vmem:[#allocation12] sm:$0xff] (!%p8391_p0)  ;;  %vm1680_vm0 = vcmask (!%p8391_p0), 1043456   ;;  %v7025_v3 = vmov (!%p8391_p0), 0.0|0.0  }
 0x313   : > { %s5561_s28 = smul.u32 6, %s1565_s23  ;;  %s5071_s0 = sshll.u32 %s1565_s23, 8  ;;  %5445 = vmatprep.subr.bf16.mxu0 (!%p8391_p0), %v7025_v3  ;;  %5448 = vmatprep.subr.bf16.mxu1 (!%p8391_p0), %v7025_v3  ;;  %v5446_v4 = vpack.c.bf16 (!%p8391_p0), %v1584_v1, %v1583_v0  ;;  %v1668_v5 = vld [vmem:[#allocation12 + $0x8] sm:$0xf] (!%p8391_p0)  ;;  %vm7026_vm1 = vmmov (!%p8391_p0), 1   ;;  %v1582_v7 = vld [vmem:[#allocation4] sm:$0xff] (!%p8391_p0) }
 0x314   : > { %s7787_s19 = scalar_lea.vmem %s8388_s16, %s5071_s0  ;;  %s4874_s5 = sshll.u32 %s1565_s23, 2  ;;  %vm7799_vm2 = vmpackc.low (!%p8391_p0), %vm1680_vm0, %vm7026_vm1  ;;  %v5449_v8 = vpack.c.bf16 (!%p8391_p0), %v1668_v5, %v1667_v2  ;;  %vm7027_vm3 = vmmov (!%p8391_p0), 0   ;;  %v7028_v9 = vmov (!%p8391_p0), 0.0   ;;  %v1666_v10 = vld [vmem:[#allocation7] sm:$0xff] (!%p8391_p0)  ;;  %v1779_v11 = vld [vmem:[#allocation15 + $0x80] sm:$0xff] (!%p8391_p0)  ;;  %vm1592_vm4 = vcmask (!%p8391_p0), 130048  }
 0x315   : > { %s7790_s26 = scalar_lea.vmem %s8389_s3, %s5561_s28  ;;  %s7793_s8 = scalar_lea.vmem %s8390_s4, %s4874_s5  ;;  %5247 = vmatprep.mubr.msk.f32.mxu0 (!%p8391_p0), %vm7027_vm3, %v7028_v9  ;;  %5254 = vmatprep.mubr.msk.f32.mxu1 (!%p8391_p0), %vm7027_vm3, %v7028_v9  ;;  %v1780_v12 = vld [vmem:[#allocation15 + $0x88] sm:$0xff] (!%p8391_p0)  ;;  %v1763_v14 = vld [vmem:[#allocation15] sm:$0xff] (!%p8391_p0)  ;;  %v1781_v16 = vld [vmem:[#allocation15 + $0x90] sm:$0xff] (!%p8391_p0)  ;;  %vm1676_vm5 = vcmask (!%p8391_p0), 97280   ;;  %vm1758_vm6 = vcmask (!%p8391_p0), 523264  }
 0x316   : > { %5447 = vmatpush3.bf16.msra.mxu0 (!%p8391_p0), %v5446_v4  ;;  %v5452_v13 = vpack.c.bf16 (!%p8391_p0), %v1780_v12, %v1779_v11  ;;  %v1764_v15 = vld [vmem:[#allocation15 + $0x8] sm:$0xff] (!%p8391_p0)  ;;  %5451 = vmatpush3.bf16.msk.msra.mxu1 (!%p8391_p0), %vm7799_vm2, %v5449_v8  ;;  %v1782_v18 = vld [vmem:[#allocation15 + $0x98] sm:$0xff] (!%p8391_p0)  ;;  %v1765_v19 = vld [vmem:[#allocation15 + $0x10] sm:$0xff] (!%p8391_p0)  ;;  %s8394_s18 = sld [smem:[#allocation55_spill]] (!%p8391_p0)  ;;  %s8395_s16 = sld [smem:[#allocation56_spill]] (!%p8391_p0) }
 0x317   : > { %v5454_v17 = vpack.c.bf16 (!%p8391_p0), %v1764_v15, %v1763_v14  ;;  %v1766_v20 = vld [vmem:[#allocation15 + $0x18] sm:$0xff] (!%p8391_p0)  ;;  %v5456_v21 = vpack.c.bf16 (!%p8391_p0), %v1782_v18, %v1781_v16  ;;  %v1783_v22 = vld [vmem:[#allocation15 + $0xa0] sm:$0xff] (!%p8391_p0)  ;;  %v1784_v23 = vld [vmem:[#allocation15 + $0xa8] sm:$0xff] (!%p8391_p0)  ;;  %5484 = vmatprep.subr.bf16.mxu1 (!%p8391_p0), %v7025_v3  ;;  %s7029_s3 = smov (!%p8391_p0), 64  }
 0x318   : > { %5453 = vmatprep.subr.bf16.mxu0 (!%p8391_p0), %v5452_v13  ;;  %v5458_v24 = vpack.c.bf16 (!%p8391_p0), %v1766_v20, %v1765_v19  ;;  %v5460_v25 = vpack.c.bf16 (!%p8391_p0), %v1784_v23, %v1783_v22  ;;  %v1767_v26 = vld [vmem:[#allocation15 + $0x20] sm:$0xff] (!%p8391_p0)  ;;  %v1768_v27 = vld [vmem:[#allocation15 + $0x28] sm:$0xff] (!%p8391_p0)  ;;  %v1785_v28 = vld [vmem:[#allocation15 + $0xb0] sm:$0xff] (!%p8391_p0) }
 0x319   : > { %5248 = vmatmul.mubr.msk.f32.vlgmr.msra.gmra.mrb[0].mxu0 %vm1592_vm4, %v1582_v7  ;;  %5255 = vmatmul.mubr.msk.f32.vlgmr.msra.gmra.mrb[0].mxu1 %vm1676_vm5, %v1666_v10  ;;  %v1786_v29 = vld [vmem:[#allocation15 + $0xb8] sm:$0xff]  ;;  %v5462_v30 = vpack.c.bf16 %v1768_v27, %v1767_v26  ;;  %v1769_v32 = vld [vmem:[#allocation15 + $0x30] sm:$0xff]  ;;  %v1787_v34 = vld [vmem:[#allocation15 + $0xc0] sm:$0xff] }
 0x31a   : > { %5455 = vmatpush3.bf16.msra.mxu0 %v5454_v17  ;;  %5289 = vmatprep.mubr.msk.f32.mxu1 %vm7027_vm3, %v7028_v9  ;;  %v5464_v31 = vpack.c.bf16 %v1786_v29, %v1785_v28  ;;  %v1770_v33 = vld [vmem:[#allocation15 + $0x38] sm:$0xff]  ;;  %v1788_v35 = vld [vmem:[#allocation15 + $0xc8] sm:$0xff]  ;;  %v1771_v39 = vld [vmem:[#allocation15 + $0x40] sm:$0xff] }
 0x31b   : > { %5457 = vmatprep.subr.bf16.mxu0 %v5456_v21  ;;  %v5466_v37 = vpack.c.bf16 %v1770_v33, %v1769_v32  ;;  %v5468_v38 = vpack.c.bf16 %v1788_v35, %v1787_v34  ;;  %v1772_v40 = vld [vmem:[#allocation15 + $0x48] sm:$0xff]  ;;  %v1789_v41 = vld [vmem:[#allocation15 + $0xd0] sm:$0xff]  ;;  %v1790_v42 = vld [vmem:[#allocation15 + $0xd8] sm:$0xff] }
 0x31c   : > { %v1762_v36 = vld [vmem:[%s8394_s18 + $0x8] sm:$0xff]  ;;  %v5470_v43 = vpack.c.bf16 %v1772_v40, %v1771_v39  ;;  %v5472_v44 = vpack.c.bf16 %v1790_v42, %v1789_v41  ;;  %v1773_v45 = vld [vmem:[#allocation15 + $0x50] sm:$0xff]  ;;  %v1774_v46 = vld [vmem:[#allocation15 + $0x58] sm:$0xff] }
 0x31d   : > { %1866 = vmatprep.mubr.f32.mxu0 %v1762_v36  ;;  %v1791_v47 = vld [vmem:[#allocation15 + $0xe0] sm:$0xff]  ;;  %v1792_v48 = vld [vmem:[#allocation15 + $0xe8] sm:$0xff]  ;;  %v5474_v49 = vpack.c.bf16 %v1774_v46, %v1773_v45  ;;  %v1793_v53 = vld [vmem:[#allocation15 + $0xf0] sm:$0xff] }
 0x31e   : > { %5459 = vmatpush3.bf16.msra.mxu0 %v5458_v24  ;;  %v5476_v50 = vpack.c.bf16 %v1792_v48, %v1791_v47  ;;  %v1775_v51 = vld [vmem:[#allocation15 + $0x60] sm:$0xff]  ;;  %v1776_v52 = vld [vmem:[#allocation15 + $0x68] sm:$0xff]  ;;  %v1794_v54 = vld [vmem:[#allocation15 + $0xf8] sm:$0xff] }
 0x31f   : > { %5461 = vmatprep.subr.bf16.mxu0 %v5460_v25  ;;  %v5478_v55 = vpack.c.bf16 %v1776_v52, %v1775_v51  ;;  %v5480_v56 = vpack.c.bf16 %v1794_v54, %v1793_v53  ;;  %v1777_v57 = vld [vmem:[#allocation15 + $0x70] sm:$0xff]  ;;  %v1778_v58 = vld [vmem:[#allocation15 + $0x78] sm:$0xff]  ;;  %v1973_v60 = vld [vmem:[#allocation21] sm:$0xff] }
 0x320   : > { %v5482_v59 = vpack.c.bf16 %v1778_v58, %v1777_v57  ;;  %v1974_v61 = vld [vmem:[#allocation21 + $0x8] sm:$0xf]  ;;  %v1761_v62 = vld [vmem:[%s8394_s18] sm:$0xff]  ;;  %v1881_v18 = vld [vmem:[#allocation18 + $0x10] sm:$0xff] }
 0x321   : > { %v5509_v63 = vpack.c.bf16 %v1974_v61, %v1973_v60  ;;  %v1972_v0 = vld [vmem:[%s8395_s16] sm:$0xff]  ;;  %v2061_v4 = vld [vmem:[#allocation24 + $0x10] sm:$0xff]  ;;  %v2062_v7 = vld [vmem:[#allocation24 + $0x18] sm:$0xff] }
 0x322   : > { %5463 = vmatpush3.bf16.msra.mxu0 %v5462_v30  ;;  %v2059_v1 = vld [vmem:[#allocation24] sm:$0xff]  ;;  %v2060_v2 = vld [vmem:[#allocation24 + $0x8] sm:$0xff]  ;;  %v5516_v8 = vpack.c.bf16 %v2062_v7, %v2061_v4  ;;  %v1880_v13 = vld [vmem:[#allocation18 + $0x8] sm:$0xff] }
 0x323   : > { %5465 = vmatprep.subr.bf16.mxu0 %v5464_v31  ;;  %v5513_v5 = vpack.c.bf16 %v2060_v2, %v2059_v1  ;;  %v2063_v6 = vld [vmem:[#allocation24 + $0x20] sm:$0xff]  ;;  %v2064_v10 = vld [vmem:[#allocation24 + $0x28] sm:$0xff]  ;;  %v2065_v15 = vld [vmem:[#allocation24 + $0x30] sm:$0xff] }
 0x324   : > { %v5519_v11 = vpack.c.bf16 %v2064_v10, %v2063_v6  ;;  %v1879_v12 = vld [vmem:[#allocation18] sm:$0xff]  ;;  %v2066_v16 = vld [vmem:[#allocation24 + $0x38] sm:$0xff]  ;;  %v1882_v19 = vld [vmem:[#allocation18 + $0x18] sm:$0xff] }
 0x325   : > { %v5485_v14 = vpack.c.bf16 %v1880_v13, %v1879_v12  ;;  %v5522_v17 = vpack.c.bf16 %v2066_v16, %v2065_v15  ;;  %v5488_v20 = vpack.c.bf16 %v1882_v19, %v1881_v18  ;;  %v1883_v21 = vld [vmem:[#allocation18 + $0x20] sm:$0xff]  ;;  %v1884_v22 = vld [vmem:[#allocation18 + $0x28] sm:$0xff]  ;;  %v1885_v24 = vld [vmem:[#allocation18 + $0x30] sm:$0xff] }
 0x326   : > { %5467 = vmatpush3.bf16.msra.mxu0 %v5466_v37  ;;  %v5491_v23 = vpack.c.bf16 %v1884_v22, %v1883_v21  ;;  %v1886_v25 = vld [vmem:[#allocation18 + $0x38] sm:$0xff]  ;;  %v1887_v27 = vld [vmem:[#allocation18 + $0x40] sm:$0xff]  ;;  %v1888_v28 = vld [vmem:[#allocation18 + $0x48] sm:$0xff] }
 0x327   : > { %5469 = vmatprep.subr.bf16.mxu0 %v5468_v38  ;;  %5486 = vmatpush3.bf16.msra.mxu1 %v5485_v14  ;;  %v5494_v26 = vpack.c.bf16 %v1886_v25, %v1885_v24  ;;  %v5497_v29 = vpack.c.bf16 %v1888_v28, %v1887_v27  ;;  %v1889_v30 = vld [vmem:[#allocation18 + $0x50] sm:$0xff]  ;;  %v1890_v31 = vld [vmem:[#allocation18 + $0x58] sm:$0xff]  ;;  %v1891_v33 = vld [vmem:[#allocation18 + $0x60] sm:$0xff] }
 0x328   : > { %5487 = vmatprep.subr.bf16.mxu1 %v7025_v3  ;;  %v5500_v32 = vpack.c.bf16 %v1890_v31, %v1889_v30  ;;  %v1892_v34 = vld [vmem:[#allocation18 + $0x68] sm:$0xff]  ;;  %v1893_v36 = vld [vmem:[#allocation18 + $0x70] sm:$0xff]  ;;  %v1894_v37 = vld [vmem:[#allocation18 + $0x78] sm:$0xff] }
 0x329   : > { %v5503_v35 = vpack.c.bf16 %v1892_v34, %v1891_v33  ;;  %v5506_v38 = vpack.c.bf16 %v1894_v37, %v1893_v36  ;;  %v4878_v39 = vld [vmem:[#allocation13] ss:$0 sm:$0xff]  ;;  %v4881_v46 = vld [vmem:[#allocation16] ss:$0 sm:$0xff]  ;;  %v2151_v1 = vld [vmem:[#allocation27 + $0x18] sm:$0xff] }
 0x32a   : > { %5471 = vmatpush3.bf16.msra.mxu0 %v5470_v43  ;;  %v2149_v60 = vld [vmem:[#allocation27 + $0x8] sm:$0xff]  ;;  %v2152_v4 = vld [vmem:[#allocation27 + $0x20] sm:$0xff]  ;;  %v2154_v12 = vld [vmem:[#allocation27 + $0x30] sm:$0xff] }
 0x32b   : > { %5473 = vmatprep.subr.bf16.mxu0 %v5472_v44  ;;  %5489 = vmatpush3.bf16.msra.mxu1 %v5488_v20  ;;  %v2155_v13 = vld [vmem:[#allocation27 + $0x38] sm:$0xff]  ;;  %v4882_v19 = vld [vmem:[#allocation19] ss:$0 sm:$0xff]  ;;  %v4888_v20 = vld [vmem:[#allocation28] ss:$0 sm:$0xff] }
 0x32c   : > { %5490 = vmatprep.subr.bf16.mxu1 %v7025_v3  ;;  %v4886_v14 = vld [vmem:[#allocation25] ss:$0 sm:$0xff] }
 0x32e   : > { %5475 = vmatpush3.bf16.msra.mxu0 %v5474_v49  ;;  %v4883_v49 = vld [vmem:[#allocation22] ss:$0 sm:$0xff] }
 0x32f   : > { %5477 = vmatprep.subr.bf16.mxu0 %v5476_v50  ;;  %5492 = vmatpush3.bf16.msra.mxu1 %v5491_v23 }
 0x330   : > { %5493 = vmatprep.subr.bf16.mxu1 %v7025_v3 }
 0x332   : > { %5479 = vmatpush3.bf16.msra.mxu0 %v5478_v55 }
 0x333   : > { %5481 = vmatprep.subr.bf16.mxu0 %v5480_v56  ;;  %5495 = vmatpush3.bf16.msra.mxu1 %v5494_v26 }
 0x334   : > { %5496 = vmatprep.subr.bf16.mxu1 %v7025_v3 }
 0x336   : > { %5483 = vmatpush3.bf16.msra.mxu0 %v5482_v59  ;;  %v2148_v59 = vld [vmem:[#allocation27] sm:$0xff] }
 0x337   : > { %5508 = vmatprep.subr.bf16.mxu0 %v7025_v3  ;;  %5498 = vmatpush3.bf16.msra.mxu1 %v5497_v29 }
 0x338   : > { %5499 = vmatprep.subr.bf16.mxu1 %v7025_v3 }
 0x339   : > { %1867 = vmatmul.mubr.f32.vlgmr.msra.gmra.mrb[2].mxu0 %v1761_v62  ;;  %v5525_v62 = vpack.c.bf16 %v2149_v60, %v2148_v59 }
 0x33a   : > { %5511 = vmatpush3.bf16.msk.msra.mxu0 %vm7799_vm2, %v5509_v63  ;;  %5296 = vmatprep.mubr.msk.f32.mxu0 %vm7027_vm3, %v7028_v9 }
 0x33b   : > { %5512 = vmatprep.subr.bf16.mxu0 %v7025_v3  ;;  %5501 = vmatpush3.bf16.msra.mxu1 %v5500_v32 }
 0x33c   : > { %5502 = vmatprep.subr.bf16.mxu1 %v7025_v3 }
 0x33d   : > { %5297 = vmatmul.mubr.msk.f32.vlgmr.msra.gmra.mrb[4].mxu0 %vm1676_vm5, %v1972_v0  ;;  %v2150_v0 = vld [vmem:[#allocation27 + $0x10] sm:$0xff] }
 0x33e   : > { %5315 = vmatprep.mubr.msk.f32.mxu0 %vm7027_vm3, %v7028_v9  ;;  %5514 = vmatpush3.bf16.msra.mxu0 %v5513_v5  ;;  %v5528_v2 = vpack.c.bf16 %v2151_v1, %v2150_v0  ;;  %v2153_v5 = vld [vmem:[#allocation27 + $0x28] sm:$0xff] }
 0x33f   : > { %5515 = vmatprep.subr.bf16.mxu0 %v7025_v3  ;;  %5504 = vmatpush3.bf16.msra.mxu1 %v5503_v35  ;;  %v5531_v7 = vpack.c.bf16 %v2153_v5, %v2152_v4 }
 0x340   : > { %5505 = vmatprep.subr.bf16.mxu1 %v7025_v3 }
 0x342   : > { %5517 = vmatpush3.bf16.msra.mxu0 %v5516_v8  ;;  %v4876_v8 = vld [vmem:[#allocation10] ss:$0 sm:$0xff] }
 0x343   : > { %5518 = vmatprep.subr.bf16.mxu0 %v7025_v3  ;;  %5507 = vmatpush3.bf16.msra.mxu1 %v5506_v38 }
 0x344   : > { %5524 = vmatprep.subr.bf16.mxu1 %v7025_v3 }
 0x346   : > { %5520 = vmatpush3.bf16.msra.mxu0 %v5519_v11 }
 0x347   : > { %5521 = vmatprep.subr.bf16.mxu0 %v7025_v3 }
 0x34a   : > { %5523 = vmatpush3.bf16.msra.mxu0 %v5522_v17 }
 0x3ec   : > { %v1662_v40 = vpop.f32.mrb[0].mxu0  ;;  %v1750_v41 = vpop.f32.mrb[0].mxu1 }
 0x3ed   : > { %v5249_v42 = vpop.f32.mrb[1].mxu0  ;;  %v1751_v43 = vadd.f32 %v4878_v39, %v1750_v41  ;;  %v5256_v44 = vpop.f32.mrb[1].mxu1  ;;  %v1663_v6 = vadd.f32 %v4876_v8, %v1662_v40 }
 0x3ef   : > { %1755 = vrot.lane.b32.xlu0 %v1751_v43, %s7029_s3 }
 0x40c   : > { %v5110_v45 = vpop.f32.mrb[2].mxu0 }
 0x40d   : > { %v5111_v47 = vpop.f32.mrb[3].mxu0 }
 0x40e   : > { %v5112_v48 = vadd.f32 %v5111_v47, %v5110_v45 }
 0x410   : > { %v1869_v50 = vadd.f32 %v5112_v48, %v4881_v46  ;;  %v2054_v51 = vpop.f32.mrb[4].mxu0 }
 0x411   : > { %v2055_v52 = vadd.f32 %v4883_v49, %v2054_v51  ;;  %v5298_v53 = vpop.f32.mrb[5].mxu0 }
 0x412   : > { %v1872_v54 = vsub.f32 0.0, %v1869_v50 }
 0x413   : > { %v2058_v55 = vmax.f32 %v2055_v52, 0.0 }
 0x414   : > { %v1873_v56 = vmul.f32 1.442695, %v1872_v54 }
 0x415   : > { %5316 = vmatmul.mubr.msk.f32.vlgmr.msra.gmra.mrb[6].mxu0 %vm1758_vm6, %v2058_v55 }
 0x416   : > { %5874 = vpow2.f32 %v1873_v56 }
 0x420   : > { %v5875_v57 = vpop.eup %5874 }
 0x421   : > { %v1875_v58 = vadd.f32 1.0, %v5875_v57 }
 0x423   : > { %5876 = vrcp.f32 %v1875_v58 }
 0x42d   : > { %v5877_v61 = vpop.eup %5876 }
 0x42e   : > { %v1878_v63 = vmul.f32 %v5877_v61, %v1869_v50 }
 0x430   : > { %5290 = vmatmul.mubr.f32.vlgmr.msra.gmra.mrb[2].mxu1 %v1878_v63 }
 0x431   : > { %5526 = vmatpush3.bf16.msra.mxu1 %v5525_v62  ;;  %5334 = vmatprep.mubr.msk.f32.mxu1 %vm7027_vm3, %v7028_v9  ;;  %v5534_v9 = vpack.c.bf16 %v2155_v13, %v2154_v12 }
 0x432   : > { %5527 = vmatprep.subr.bf16.mxu1 %v7025_v3 }
 0x435   : > { %5529 = vmatpush3.bf16.msra.mxu1 %v5528_v2 }
 0x436   : > { %5530 = vmatprep.subr.bf16.mxu1 %v7025_v3 }
 0x439   : > { %5532 = vmatpush3.bf16.msra.mxu1 %v5531_v7 }
 0x43a   : > { %5533 = vmatprep.subr.bf16.mxu1 %v7025_v3  ;;  %v5548_v3 = vadd.f32 %v4888_v20, %v4882_v19 }
 0x43d   : > { %5535 = vmatpush3.bf16.msra.mxu1 %v5534_v9 }
 0x461   : > { %v1756_v10 = vpop.permute.xlu0 %1755 }
 0x462   : > { %v1759_v11 = vsel %vm1758_vm6, %v1663_v6, %v1756_v10 }
 0x463   : > { %1760 = vst [vmem:[#allocation2] sm:$0xff] %v1759_v11 }
 0x4e8   : > { %v2143_v15 = vpop.f32.mrb[6].mxu0 }
 0x4e9   : > { %v2144_v16 = vadd.f32 %v4886_v14, %v2143_v15  ;;  %v5317_v17 = vpop.f32.mrb[7].mxu0 }
 0x4eb   : > { %v2147_v18 = vmax.f32 %v2144_v16, 0.0 }
 0x4ed   : > { %5335 = vmatmul.mubr.msk.f32.vlgmr.msra.gmra.mrb[2].mxu1 %vm1758_vm6, %v2147_v18 }
 0x5c0   : > { %v2232_v21 = vpop.f32.mrb[2].mxu1 }
 0x5c1   : > { %v5549_v22 = vadd.f32 %v5548_v3, %v2232_v21  ;;  %v5336_v23 = vpop.f32.mrb[3].mxu1 }
 0x5c3   : > { %v2237_v24 = vsub.f32 0.0, %v5549_v22 }
 0x5c5   : > { %v2238_v25 = vmul.f32 1.442695, %v2237_v24 }
 0x5c7   : > { %5878 = vpow2.f32 %v2238_v25 }
 0x5d1   : > { %v5879_v26 = vpop.eup %5878 }
 0x5d2   : > { %v2240_v27 = vadd.f32 1.0, %v5879_v26 }
 0x5d4   : > { %5880 = vrcp.f32 %v2240_v27 }
 0x5de   : > { %v5881_v28 = vpop.eup %5880 }
 0x5df   : > { %v2243_v29 = vmul.f32 %v5881_v28, %v5549_v22 }
 0x5e1   : > { %2244 = vst [vmem:[#allocation3] sm:$0xff] %v2243_v29 }
 0x5e2 PF: > { %v7845_v30 = vld [vmem:[#allocation2] sm:$0xff]  ;;  %v7030_v33 = vmov 0   ;;  %v5885_v34 = vld [vmem:[%s7756_s9 + $0x34] ss:$24 sps:$4 sm:$0xff]   ;;  %v5914_v49 = vld [vmem:[%s7756_s9 + $0x38] ss:$24 sps:$4 sm:$0xff]  }
 0x5e3   : > { %2691 = vadd.xlane.f32.xlu0 %v7845_v30  ;;  %v5882_v31 = vld [vmem:[%s7756_s9 + $0x4] ss:$24 sps:$4 sm:$0xff]   ;;  %v5884_v32 = vld [vmem:[%s7756_s9] ss:$24 sps:$4 sm:$0xff]   ;;  %2600 = vmatprep.mubr.bf16.mxu0 %v7030_v33  ;;  %v5887_v35 = vld [vmem:[%s7756_s9 + $0x30] ss:$24 sps:$4 sm:$0xff]  }
 0x5e4   : > { %2641 = vmatprep.mubr.bf16.mxu1 %v7030_v33  ;;  %2568 = vmatprep.subr.bf16.mxu0 %v5882_v31  ;;  %v5888_v36 = vld [vmem:[%s7756_s9 + $0x64] ss:$24 sps:$4 sm:$0xff]   ;;  %v5890_v37 = vld [vmem:[%s7756_s9 + $0x60] ss:$24 sps:$4 sm:$0xff]   ;;  %v5891_v38 = vld [vmem:[%s7756_s9 + $0x94] ss:$24 sps:$4 sm:$0xff]  }
 0x5e5   : > { %2569 = vmatpush1.bf16.msra.mxu0 %v5884_v32  ;;  %v5893_v39 = vld [vmem:[%s7756_s9 + $0x90] ss:$24 sps:$4 sm:$0xff]   ;;  %v5894_v40 = vld [vmem:[%s7756_s9 + $0xc4] ss:$24 sps:$4 sm:$0xff]   ;;  %v5896_v41 = vld [vmem:[%s7756_s9 + $0xc0] ss:$24 sps:$4 sm:$0xff]  }
 0x5e6   : > { %2570 = vmatprep.subr.bf16.mxu0 %v5885_v34  ;;  %v5897_v42 = vld [vmem:[%s7756_s9 + $0xf4] ss:$24 sps:$4 sm:$0xff]   ;;  %v5899_v43 = vld [vmem:[%s7756_s9 + $0xf0] ss:$24 sps:$4 sm:$0xff]   ;;  %v5900_v44 = vld [vmem:[%s7756_s9 + $0x124] ss:$24 sps:$4 sm:$0xff]  }
 0x5e7   : > { %v5906_v45 = vld [vmem:[%s7756_s9 + $0xc] ss:$24 sps:$4 sm:$0xff]   ;;  %v5908_v46 = vld [vmem:[%s7756_s9 + $0x8] ss:$24 sps:$4 sm:$0xff]   ;;  %v5912_v47 = vld [vmem:[%s7756_s9 + $0x3c] ss:$24 sps:$4 sm:$0xff]  }
 0x5e8   : > { %2609 = vmatprep.subr.bf16.mxu1 %v5906_v45  ;;  %v5902_v48 = vld [vmem:[%s7756_s9 + $0x120] ss:$24 sps:$4 sm:$0xff]   ;;  %v5903_v50 = vld [vmem:[%s7756_s9 + $0x154] ss:$24 sps:$4 sm:$0xff]   ;;  %v5905_v52 = vld [vmem:[%s7756_s9 + $0x150] ss:$24 sps:$4 sm:$0xff]   ;;  %v2298_v45 = vlaneseq }
 0x5e9   : > { %2571 = vmatpush1.bf16.msra.mxu0 %v5887_v35  ;;  %2610 = vmatpush1.bf16.msra.mxu1 %v5908_v46  ;;  %v5918_v51 = vld [vmem:[%s7756_s9 + $0x6c] ss:$24 sps:$4 sm:$0xff]   ;;  %v5920_v54 = vld [vmem:[%s7756_s9 + $0x68] ss:$24 sps:$4 sm:$0xff]   ;;  %v5924_v56 = vld [vmem:[%s7756_s9 + $0x9c] ss:$24 sps:$4 sm:$0xff]  }
 0x5ea   : > { %2572 = vmatprep.subr.bf16.mxu0 %v5888_v36  ;;  %2611 = vmatprep.subr.bf16.mxu1 %v5912_v47  ;;  %v2246_v53 = vld [vmem:[#allocation3] sm:$0xff]  ;;  %v5917_v60 = vld [vmem:[%s7756_s9 + $0x44] ss:$24 sps:$4 sm:$0xff]   ;;  %v5915_v62 = vld [vmem:[%s7756_s9 + $0x40] ss:$24 sps:$4 sm:$0xff]   ;;  %v7031_v25 = vmov 0.0  }
 0x5eb   : > { %v5911_v55 = vld [vmem:[%s7756_s9 + $0x14] ss:$24 sps:$4 sm:$0xff]   ;;  %v7874_v57 = vpack.c.bf16 %v2246_v53, %v2246_v53  ;;  %v5909_v58 = vld [vmem:[%s7756_s9 + $0x10] ss:$24 sps:$4 sm:$0xff]   ;;  %v5929_v5 = vld [vmem:[%s7756_s9 + $0xa4] ss:$24 sps:$4 sm:$0xff]  }
 0x5ec   : > { %v5926_v59 = vld [vmem:[%s7756_s9 + $0x98] ss:$24 sps:$4 sm:$0xff]   ;;  %v5930_v61 = vld [vmem:[%s7756_s9 + $0xcc] ss:$24 sps:$4 sm:$0xff]   ;;  %v5932_v0 = vld [vmem:[%s7756_s9 + $0xc8] ss:$24 sps:$4 sm:$0xff]  }
 0x5ed   : > { %2573 = vmatpush1.bf16.msra.mxu0 %v5890_v37  ;;  %2612 = vmatpush1.bf16.msra.mxu1 %v5914_v49  ;;  %v5923_v63 = vld [vmem:[%s7756_s9 + $0x74] ss:$24 sps:$4 sm:$0xff]   ;;  %v5921_v2 = vld [vmem:[%s7756_s9 + $0x70] ss:$24 sps:$4 sm:$0xff]   ;;  %v5927_v8 = vld [vmem:[%s7756_s9 + $0xa0] ss:$24 sps:$4 sm:$0xff]  }
 0x5ee   : > { %2574 = vmatprep.subr.bf16.mxu0 %v5891_v38  ;;  %2613 = vmatprep.subr.bf16.mxu1 %v5918_v51  ;;  %v5936_v1 = vld [vmem:[%s7756_s9 + $0xfc] ss:$24 sps:$4 sm:$0xff]   ;;  %v5938_v4 = vld [vmem:[%s7756_s9 + $0xf8] ss:$24 sps:$4 sm:$0xff]   ;;  %v5942_v7 = vld [vmem:[%s7756_s9 + $0x12c] ss:$24 sps:$4 sm:$0xff]  }
 0x5ef   : > { %v5944_v6 = vld [vmem:[%s7756_s9 + $0x128] ss:$24 sps:$4 sm:$0xff]   ;;  %v5935_v10 = vld [vmem:[%s7756_s9 + $0xd4] ss:$24 sps:$4 sm:$0xff]   ;;  %v5950_v13 = vld [vmem:[%s7756_s9 + $0x158] ss:$24 sps:$4 sm:$0xff]  }
 0x5f0   : > { %v5948_v11 = vld [vmem:[%s7756_s9 + $0x15c] ss:$24 sps:$4 sm:$0xff]   ;;  %v5933_v12 = vld [vmem:[%s7756_s9 + $0xd0] ss:$24 sps:$4 sm:$0xff]   ;;  %v5939_v15 = vld [vmem:[%s7756_s9 + $0x100] ss:$24 sps:$4 sm:$0xff]  }
 0x5f1   : > { %2575 = vmatpush1.bf16.msra.mxu0 %v5893_v39  ;;  %2614 = vmatpush1.bf16.msra.mxu1 %v5920_v54  ;;  %v5941_v9 = vld [vmem:[%s7756_s9 + $0x104] ss:$24 sps:$4 sm:$0xff]   ;;  %v5954_v16 = vld [vmem:[%s7766_s10] ss:$12 sps:$4 sm:$0xff]   ;;  %v5945_v19 = vld [vmem:[%s7756_s9 + $0x130] ss:$24 sps:$4 sm:$0xff]  }
 0x5f2   : > { %2576 = vmatprep.subr.bf16.mxu0 %v5894_v40  ;;  %2615 = vmatprep.subr.bf16.mxu1 %v5924_v56  ;;  %v5956_v14 = vld [vmem:[%s7766_s10 + $0x4] ss:$12 sps:$4 sm:$0xff]   ;;  %v5947_v17 = vld [vmem:[%s7756_s9 + $0x134] ss:$24 sps:$4 sm:$0xff]   ;;  %v5960_v18 = vld [vmem:[%s7766_s10 + $0x1c] ss:$12 sps:$4 sm:$0xff]  }
 0x5f3   : > { %v5958_v20 = vld [vmem:[%s7766_s10 + $0x18] ss:$12 sps:$4 sm:$0xff]   ;;  %v5964_v21 = vld [vmem:[%s7766_s10 + $0x34] ss:$12 sps:$4 sm:$0xff]   ;;  %v5962_v23 = vld [vmem:[%s7766_s10 + $0x30] ss:$12 sps:$4 sm:$0xff]  }
 0x5f4   : > { %v5953_v3 = vld [vmem:[%s7756_s9 + $0x164] ss:$24 sps:$4 sm:$0xff]   ;;  %v5951_v22 = vld [vmem:[%s7756_s9 + $0x160] ss:$24 sps:$4 sm:$0xff]   ;;  %v5957_v24 = vld [vmem:[%s7766_s10 + $0x8] ss:$12 sps:$4 sm:$0xff]  }
 0x5f5   : > { %2577 = vmatpush1.bf16.msra.mxu0 %v5896_v41  ;;  %2616 = vmatpush1.bf16.msra.mxu1 %v5926_v59  ;;  %v5961_v26 = vld [vmem:[%s7766_s10 + $0x20] ss:$12 sps:$4 sm:$0xff]   ;;  %v5965_v32 = vld [vmem:[%s7766_s10 + $0x38] ss:$12 sps:$4 sm:$0xff]   ;;  %v5966_v35 = vld [vmem:[%s7766_s10 + $0x48] ss:$12 sps:$4 sm:$0xff]  }
 0x5f6   : > { %2578 = vmatprep.subr.bf16.mxu0 %v5897_v42  ;;  %2617 = vmatprep.subr.bf16.mxu1 %v5930_v61  ;;  %v5968_v34 = vld [vmem:[%s7766_s10 + $0x4c] ss:$12 sps:$4 sm:$0xff]   ;;  %v5969_v36 = vld [vmem:[%s7766_s10 + $0x50] ss:$12 sps:$4 sm:$0xff]   ;;  %v5973_v38 = vld [vmem:[%s7766_s10 + $0x68] ss:$12 sps:$4 sm:$0xff]  }
 0x5f7   : > { %v5972_v37 = vld [vmem:[%s7766_s10 + $0x64] ss:$12 sps:$4 sm:$0xff]   ;;  %v5976_v39 = vld [vmem:[%s7766_s10 + $0x7c] ss:$12 sps:$4 sm:$0xff]   ;;  %v5977_v41 = vld [vmem:[%s7766_s10 + $0x80] ss:$12 sps:$4 sm:$0xff]  }
 0x5f8   : > { %v5974_v40 = vld [vmem:[%s7766_s10 + $0x78] ss:$12 sps:$4 sm:$0xff]   ;;  %v5980_v42 = vld [vmem:[%s7766_s10 + $0x94] ss:$12 sps:$4 sm:$0xff]   ;;  %v7942_v49 = vshrl.u32 %v2298_v45, 7  ;;  %vm7032_vm7 = vmmov 0  }
 0x5f9   : > { %2579 = vmatpush1.bf16.msra.mxu0 %v5899_v43  ;;  %2618 = vmatpush1.bf16.msra.mxu1 %v5932_v0  ;;  %v5978_v43 = vld [vmem:[%s7766_s10 + $0x90] ss:$12 sps:$4 sm:$0xff]   ;;  %v5984_v46 = vld [vmem:[%s7766_s10 + $0xac] ss:$12 sps:$4 sm:$0xff]   ;;  %v5982_v47 = vld [vmem:[%s7766_s10 + $0xa8] ss:$12 sps:$4 sm:$0xff]  }
 0x5fa   : > { %2580 = vmatprep.subr.bf16.mxu0 %v5900_v44  ;;  %2619 = vmatprep.subr.bf16.mxu1 %v5936_v1  ;;  %v5981_v44 = vld [vmem:[%s7766_s10 + $0x98] ss:$12 sps:$4 sm:$0xff]   ;;  %v2320_v51 = vsub.s32 5, %v7942_v49  ;;  %v2312_v61 = vsub.s32 3, %v7942_v49  ;;  %s8396_s9 = sld [smem:[#allocation66_spill]]  ;;  %vm3039_vm8 = vcmask 523264  }
 0x5fb   : > { %vm3129_vm9 = vcmask 64512  }
 0x5fd   : > { %2581 = vmatpush1.bf16.msra.mxu0 %v5902_v48  ;;  %2620 = vmatpush1.bf16.msra.mxu1 %v5938_v4  ;;  %v5985_v48 = vld [vmem:[%s7766_s10 + $0xb0] ss:$12 sps:$4 sm:$0xff]  }
 0x5fe   : > { %2582 = vmatprep.subr.bf16.mxu0 %v5903_v50  ;;  %2621 = vmatprep.subr.bf16.mxu1 %v5942_v7  ;;  %v2316_v50 = vsub.s32 4, %v7942_v49 }
 0x600   : > { %v2968_v45 = vld [vmem:[%s8396_s9 + $0x18] sm:$0xff] }
 0x601   : > { %2583 = vmatpush1.bf16.msra.mxu0 %v5905_v52  ;;  %2622 = vmatpush1.bf16.msra.mxu1 %v5944_v6  ;;  %v2296_v52 = vld [vmem:[%s7790_s26] sm:$0x3f]  ;;  %s8399_s26 = scalar_lea.vmem [#allocation34], %s7753_s22 }
 0x602   : > { %2650 = vmatprep.subr.bf16.mxu0 %v5911_v55  ;;  %2623 = vmatprep.subr.bf16.mxu1 %v5948_v11  ;;  %v2317_v53 = vrot.slane %v2296_v52, %v2316_v50  ;;  %v2321_v54 = vrot.slane %v2296_v52, %v2320_v51 }
 0x604   : > { %2601 = vmatmul.mubr.bf16.vlgmr.msra.gmra.mrb[0].mxu0 %v7874_v57 }
 0x605   : > { %2651 = vmatpush1.bf16.msra.mxu0 %v5909_v58  ;;  %2682 = vmatprep.mubr.bf16.mxu0 %v7030_v33 }
 0x606   : > { %2652 = vmatprep.subr.bf16.mxu0 %v5917_v60  ;;  %2624 = vmatpush1.bf16.msra.mxu1 %v5950_v13  ;;  %v7952_v60 = vsub.s32 2, %v7942_v49 }
 0x607   : > { %2884 = vmatprep.subr.bf16.mxu1 %v5956_v14 }
 0x609   : > { %2653 = vmatpush1.bf16.msra.mxu0 %v5915_v62  ;;  %2642 = vmatmul.mubr.bf16.vlgmr.msra.gmra.mrb[0].mxu1 %v7874_v57  ;;  %v2309_v62 = vrot.slane %v2296_v52, %v7952_v60 }
 0x60a   : > { %2654 = vmatprep.subr.bf16.mxu0 %v5923_v63  ;;  %2885 = vmatpush1.bf16.msra.mxu1 %v5954_v16  ;;  %v2313_v63 = vrot.slane %v2296_v52, %v2312_v61 }
 0x60b   : > { %2886 = vmatprep.subr.bf16.mxu1 %v5960_v18  ;;  %2916 = vmatprep.mubr.bf16.mxu1 %v7030_v33  ;;  %v7971_v18 = vsub.s32 0, %v7942_v49 }
 0x60d   : > { %2655 = vmatpush1.bf16.msra.mxu0 %v5921_v2 }
 0x60e   : > { %2656 = vmatprep.subr.bf16.mxu0 %v5929_v5  ;;  %2887 = vmatpush1.bf16.msra.mxu1 %v5958_v20  ;;  %v2301_v20 = vrot.slane %v2296_v52, %v7971_v18 }
 0x60f   : > { %2888 = vmatprep.subr.bf16.mxu1 %v5964_v21 }
 0x611   : > { %2657 = vmatpush1.bf16.msra.mxu0 %v5927_v8 }
 0x612   : > { %2658 = vmatprep.subr.bf16.mxu0 %v5935_v10  ;;  %2889 = vmatpush1.bf16.msra.mxu1 %v5962_v23 }
 0x613   : > { %2890 = vmatprep.subr.bf16.mxu1 %v5968_v34 }
 0x615   : > { %2659 = vmatpush1.bf16.msra.mxu0 %v5933_v12 }
 0x616   : > { %2660 = vmatprep.subr.bf16.mxu0 %v5941_v9  ;;  %2891 = vmatpush1.bf16.msra.mxu1 %v5966_v35  ;;  %v2965_v35 = vld [vmem:[%s8396_s9] sm:$0xff] }
 0x617   : > { %2892 = vmatprep.subr.bf16.mxu1 %v5972_v37 }
 0x619   : > { %2661 = vmatpush1.bf16.msra.mxu0 %v5939_v15  ;;  %v7967_v15 = vsub.s32 1, %v7942_v49 }
 0x61a   : > { %2662 = vmatprep.subr.bf16.mxu0 %v5947_v17 }
 0x61b   : > { %v2305_v17 = vrot.slane %v2296_v52, %v7967_v15  ;;  %v2969_v52 = vld [vmem:[%s8396_s9 + $0x20] sm:$0xff] }
 0x61d   : > { %2663 = vmatpush1.bf16.msra.mxu0 %v5945_v19 }
 0x61e   : > { %2664 = vmatprep.subr.bf16.mxu0 %v5953_v3 }
 0x621   : > { %2665 = vmatpush1.bf16.msra.mxu0 %v5951_v22 }
 0x622   : > { %5337 = vmatprep.subr.bf16.mxu0 %v7031_v25 }
 0x624   : > { %2683 = vmatmul.mubr.bf16.vlgmr.msra.gmra.mrb[4].mxu0 %v7874_v57 }
 0x625   : > { %5338 = vmatpush3.bf16.msra.mxu0 %v5957_v24  ;;  %5353 = vmatprep.mubr.msk.bf16.mxu0 %vm7032_vm7, %v7031_v25 }
 0x626   : > { %5339 = vmatprep.subr.bf16.mxu0 %v7031_v25 }
 0x629   : > { %5340 = vmatpush3.bf16.msra.mxu0 %v5961_v26 }
 0x62a   : > { %5341 = vmatprep.subr.bf16.mxu0 %v7031_v25 }
 0x62d   : > { %5342 = vmatpush3.bf16.msra.mxu0 %v5965_v32 }
 0x62e   : > { %5343 = vmatprep.subr.bf16.mxu0 %v7031_v25 }
 0x631   : > { %5344 = vmatpush3.bf16.msra.mxu0 %v5969_v36  ;;  %v2966_v36 = vld [vmem:[%s8396_s9 + $0x8] sm:$0xff] }
 0x632   : > { %5345 = vmatprep.subr.bf16.mxu0 %v7031_v25 }
 0x635   : > { %5346 = vmatpush3.bf16.msra.mxu0 %v5973_v38 }
 0x636   : > { %5347 = vmatprep.subr.bf16.mxu0 %v7031_v25 }
 0x639   : > { %5348 = vmatpush3.bf16.msra.mxu0 %v5977_v41 }
 0x63a   : > { %5349 = vmatprep.subr.bf16.mxu0 %v7031_v25 }
 0x63d   : > { %5350 = vmatpush3.bf16.msra.mxu0 %v5981_v44 }
 0x63e   : > { %5351 = vmatprep.subr.bf16.mxu0 %v7031_v25 }
 0x641   : > { %5352 = vmatpush3.bf16.msra.mxu0 %v5985_v48 }
 0x642   : > { %5405 = vmatprep.subr.bf16.mxu0 %v7031_v25 }
 0x670   : > { %v2692_v27 = vpop.xlane.xlu0 %2691 }
 0x671   : > { %v2694_v28 = vmul.f32 0.0078125, %v2692_v27 }
 0x673   : > { %v7917_v29 = vsub.f32 %v7845_v30, %v2694_v28  ;;  %v5970_v30 = vld [vmem:[%s7766_s10 + $0x60] ss:$12 sps:$4 sm:$0xff]   ;;  %s8397_s10 = sld [smem:[#allocation67_spill]] }
 0x674   : > { %2893 = vmatpush1.bf16.msra.mxu1 %v5970_v30  ;;  %v2739_v28 = vld [vmem:[%s7768_s20] sm:$0x7]  ;;  %v2967_v30 = vld [vmem:[%s8396_s9 + $0x10] sm:$0xff]  ;;  %s8398_s20 = sld [smem:[#allocation68_spill]] }
 0x675   : > { %v2696_v31 = vmul.f32 %v7917_v29, %v7917_v29  ;;  %2894 = vmatprep.subr.bf16.mxu1 %v5976_v39  ;;  %v2748_v32 = vrot.slane %v2739_v28, %v7967_v15 }
 0x677   : > { %2697 = vadd.xlane.f32.xlu0 %v2696_v31  ;;  %v2752_v31 = vrot.slane %v2739_v28, %v7952_v60 }
 0x678   : > { %2895 = vmatpush1.bf16.msra.mxu1 %v5974_v40 }
 0x679   : > { %2896 = vmatprep.subr.bf16.mxu1 %v5980_v42 }
 0x67c   : > { %2897 = vmatpush1.bf16.msra.mxu1 %v5978_v43 }
 0x67d   : > { %2898 = vmatprep.subr.bf16.mxu1 %v5984_v46 }
 0x680   : > { %2899 = vmatpush1.bf16.msra.mxu1 %v5982_v47 }
 0x681   : > { %5357 = vmatprep.subr.bf16.mxu1 %v7031_v25 }
 0x6d7   : > { %v2602_v55 = vpop.f32.mrb[0].mxu0 }
 0x6d8   : > { %v2604_v56 = vpop.f32.mrb[1].mxu0  ;;  %v2603_v23 = vadd.f32 %v2602_v55, %v2301_v20  ;;  %v2972_v55 = vld [vmem:[%s8396_s9 + $0x38] sm:$0xff]  ;;  %v2744_v20 = vrot.slane %v2739_v28, %v7971_v18 }
 0x6d9   : > { %v2606_v58 = vpop.f32.mrb[2].mxu0  ;;  %v2605_v19 = vadd.f32 %v2604_v56, %v2305_v17 }
 0x6da   : > { %v2607_v59 = vpop.f32.mrb[3].mxu0 }
 0x6db   : > { %v2703_v3 = vadd.f32 1.0, %v2605_v19 }
 0x6dc   : > { %v2643_v0 = vpop.f32.mrb[0].mxu1 }
 0x6dd   : > { %v7958_v1 = vadd.f32 %v2643_v0, %v2309_v62  ;;  %v2645_v2 = vpop.f32.mrb[1].mxu1 }
 0x6de   : > { %v7960_v4 = vadd.f32 %v2645_v2, %v2313_v63  ;;  %v2647_v5 = vpop.f32.mrb[2].mxu1 }
 0x6df   : > { %v2648_v7 = vpop.f32.mrb[3].mxu1 }
 0x6f7   : > { %v2684_v8 = vpop.f32.mrb[4].mxu0 }
 0x6f8   : > { %v7962_v6 = vadd.f32 %v2684_v8, %v2317_v53  ;;  %v2686_v10 = vpop.f32.mrb[5].mxu0  ;;  %v2970_v53 = vld [vmem:[%s8396_s9 + $0x28] sm:$0xff] }
 0x6f9   : > { %v7964_v11 = vadd.f32 %v2686_v10, %v2321_v54  ;;  %v2688_v12 = vpop.f32.mrb[6].mxu0  ;;  %v2971_v54 = vld [vmem:[%s8396_s9 + $0x30] sm:$0xff] }
 0x6fa   : > { %v2689_v13 = vpop.f32.mrb[7].mxu0 }
 0x704   : > { %v2698_v9 = vpop.xlane.xlu0 %2697 }
 0x705   : > { %v2699_v14 = vmul.f32 0.0078125, %v2698_v9 }
 0x707   : > { %v2700_v16 = vadd.f32 0.0001, %v2699_v14 }
 0x709   : > { %6074 = vrsqrt.f32 %v2700_v16 }
 0x713   : > { %v6075_v21 = vpop.eup %6074 }
 0x714   : > { %v2702_v22 = vmul.f32 %v6075_v21, %v7917_v29 }
 0x716   : > { %v2704_v24 = vmul.f32 %v2703_v3, %v2702_v22 }
 0x718   : > { %v2705_v26 = vadd.f32 %v2704_v24, %v2603_v23  ;;  %v7033_v23 = vmov 0.0|0.0  }
 0x71a   : > { %v2706_v27 = vpack.c.bf16 %v2705_v26, %v2705_v26 }
 0x71c   : > { %2917 = vmatmul.mubr.bf16.vlgmr.msra.gmra.mrb[4].mxu1 %v2706_v27  ;;  %5354 = vmatmul.mubr.bf16.vlgmr.msra.gmra.mrb[8].mxu0 %v2706_v27 }
 0x71d   : > { %5365 = vmatprep.mubr.msk.bf16.mxu1 %vm7032_vm7, %v7031_v25  ;;  %5421 = vmatprep.mubr.msk.bf16.mxu0 %vm7032_vm7, %v7031_v25 }
 0x7ef   : > { %v2918_v29 = vpop.f32.mrb[4].mxu1  ;;  %v2959_v34 = vpop.f32.mrb[8].mxu0 }
 0x7f0   : > { %v2960_v37 = vadd.f32 %v2959_v34, %v2752_v31  ;;  %v2920_v38 = vpop.f32.mrb[5].mxu1  ;;  %v5355_v39 = vpop.f32.mrb[9].mxu0  ;;  %v2919_v21 = vadd.f32 %v2918_v29, %v2744_v20  ;;  %v3046_v29 = vld [vmem:[%s8397_s10] sm:$0xff]  ;;  %v3047_v34 = vld [vmem:[%s8397_s10 + $0x8] sm:$0xff] }
 0x7f1   : > { %v2921_v40 = vadd.f32 %v2920_v38, %v2748_v32  ;;  %v2922_v41 = vpop.f32.mrb[6].mxu1  ;;  %v2962_v42 = vpop.f32.mrb[10].mxu0  ;;  %v3050_v38 = vld [vmem:[%s8397_s10 + $0x20] sm:$0xff]  ;;  %v3051_v39 = vld [vmem:[%s8397_s10 + $0x28] sm:$0xff] }
 0x7f2   : > { %v2923_v43 = vpop.f32.mrb[7].mxu1  ;;  %v5356_v44 = vpop.f32.mrb[11].mxu0  ;;  %v7986_v46 = vmul.f32 %v2965_v35, %v2960_v37  ;;  %v7988_v47 = vmul.f32 %v2966_v36, %v2960_v37  ;;  %v7990_v48 = vmul.f32 %v2967_v30, %v2960_v37  ;;  %v7998_v59 = vmul.f32 %v2968_v45, %v2960_v37  ;;  %v3052_v41 = vld [vmem:[%s8397_s10 + $0x30] sm:$0xff]  ;;  %v3053_v42 = vld [vmem:[%s8397_s10 + $0x38] sm:$0xff] }
 0x7f3   : > { %v2973_v50 = vmul.f32 %v2965_v35, %v2921_v40  ;;  %v2974_v51 = vmul.f32 %v2966_v36, %v2921_v40  ;;  %v8000_v62 = vmul.f32 %v2969_v52, %v2960_v37  ;;  %v8002_v63 = vmul.f32 %v2970_v53, %v2960_v37  ;;  %v3048_v36 = vld [vmem:[%s8397_s10 + $0x10] sm:$0xff] }
 0x7f4   : > { %v2993_v58 = vpack.c.bf16 %v7988_v47, %v7986_v46  ;;  %v2994_v0 = vpack.c.bf16 %v7998_v59, %v7990_v48  ;;  %v8006_v2 = vmul.f32 %v2971_v54, %v2960_v37  ;;  %v8008_v5 = vmul.f32 %v2972_v55, %v2960_v37  ;;  %v5986_v46 = vld [vmem:[%s7770_s11] sm:$0xff]   ;;  %v5987_v47 = vld [vmem:[%s7770_s11 + $0x8] sm:$0xff]   ;;  %v5988_v48 = vld [vmem:[%s7770_s11 + $0x10] sm:$0xff]  }
 0x7f5   : > { %v2981_v56 = vpack.c.bf16 %v2974_v51, %v2973_v50  ;;  %v2995_v7 = vpack.c.bf16 %v8002_v63, %v8000_v62  ;;  %v2975_v8 = vmul.f32 %v2967_v30, %v2921_v40  ;;  %v2976_v10 = vmul.f32 %v2968_v45, %v2921_v40  ;;  %v3049_v30 = vld [vmem:[%s8397_s10 + $0x18] sm:$0xff]  ;;  %5406 = vmatpush3.bf16.msra.mxu0 %v5986_v46  ;;  %v5991_v59 = vld [vmem:[%s7770_s11 + $0x28] sm:$0xff]  }
 0x7f6   : > { %v2996_v12 = vpack.c.bf16 %v8008_v5, %v8006_v2  ;;  %v2977_v9 = vmul.f32 %v2969_v52, %v2921_v40  ;;  %v2978_v14 = vmul.f32 %v2970_v53, %v2921_v40  ;;  %v2979_v17 = vmul.f32 %v2971_v54, %v2921_v40  ;;  %v3128_v52 = vld [vmem:[%s8398_s20] sm:$0xff]  ;;  %5407 = vmatprep.subr.bf16.mxu0 %v7031_v25  ;;  %v5992_v62 = vld [vmem:[%s7770_s11 + $0x30] sm:$0xff]   ;;  %v6035_v46 = vld [vmem:[%s7787_s19 + $0xcc] ss:$16 sps:$4 sm:$0xff]  }
 0x7f7   : > { %5358 = vmatpush3.bf16.xpose.msra.mxu1 %v2981_v56  ;;  %v2982_v13 = vpack.c.bf16 %v2976_v10, %v2975_v8  ;;  %v2980_v19 = vmul.f32 %v2972_v55, %v2921_v40  ;;  %v2997_v22 = vpack.c.bf16 %v2919_v21, %v2919_v21  ;;  %v5537_v35 = vpack.c.bf16 %v3047_v34, %v3046_v29  ;;  %v5989_v56 = vld [vmem:[%s7770_s11 + $0x18] sm:$0xff]  }
 0x7f8   : > { %5359 = vmatprep.subr.bf16.mxu1 %v7031_v25  ;;  %v2983_v16 = vpack.c.bf16 %v2978_v14, %v2977_v9  ;;  %v5540_v37 = vpack.c.bf16 %v3049_v30, %v3048_v36  ;;  %v5543_v40 = vpack.c.bf16 %v3051_v39, %v3050_v38  ;;  %v5546_v43 = vpack.c.bf16 %v3053_v42, %v3052_v41  ;;  %v6098_v21 = vld [vmem:[#allocation2] sm:$0xff]  ;;  %v6011_v29 = vld [vmem:[%s7787_s19 + $0x4c] ss:$16 sps:$4 sm:$0xff]   ;;  %v6015_v42 = vld [vmem:[%s7787_s19 + $0x68] ss:$16 sps:$4 sm:$0xff]  }
 0x7f9   : > { %v2984_v3 = vpack.c.bf16 %v2980_v19, %v2979_v17  ;;  %5408 = vmatpush3.bf16.msra.mxu0 %v5987_v47  ;;  %v6006_v34 = vld [vmem:[%s7787_s19 + $0x40] ss:$16 sps:$4 sm:$0xff]   ;;  %v6014_v39 = vld [vmem:[%s7787_s19 + $0x64] ss:$16 sps:$4 sm:$0xff]  }
 0x7fa   : > { %5409 = vmatprep.subr.bf16.mxu0 %v7031_v25  ;;  %v6012_v41 = vld [vmem:[%s7787_s19 + $0x60] ss:$16 sps:$4 sm:$0xff]  }
 0x7fb   : > { %v6030_v47 = vld [vmem:[%s7787_s19 + $0xc0] ss:$16 sps:$4 sm:$0xff]  }
 0x7fd   : > { %5410 = vmatpush3.bf16.msra.mxu0 %v5988_v48  ;;  %v6033_v48 = vld [vmem:[%s7787_s19 + $0xc8] ss:$16 sps:$4 sm:$0xff]  }
 0x7fe   : > { %5411 = vmatprep.subr.bf16.mxu0 %v7031_v25 }
 0x7ff   : > { %5360 = vmatpush3.bf16.xpose.msra.mxu1 %v2982_v13 }
 0x800   : > { %5361 = vmatprep.subr.bf16.mxu1 %v7031_v25 }
 0x801   : > { %5412 = vmatpush3.bf16.msra.mxu0 %v5989_v56  ;;  %v6038_v56 = vld [vmem:[%s7787_s19 + $0xe4] ss:$16 sps:$4 sm:$0xff]  }
 0x802   : > { %5413 = vmatprep.subr.bf16.mxu0 %v7031_v25 }
 0x807   : > { %5362 = vmatpush3.bf16.xpose.msra.mxu1 %v2983_v16 }
 0x808   : > { %5363 = vmatprep.subr.bf16.mxu1 %v7031_v25 }
 0x80f   : > { %5364 = vmatpush3.bf16.xpose.msra.mxu1 %v2984_v3 }
 0x810   : > { %5536 = vmatprep.subr.bf16.mxu1 %v7033_v23 }
 0x816   : > { %5366 = vmatmul.mubr.bf16.vlgmr.msra.gmra.mrb[8].mxu1 %v2997_v22 }
 0x817   : > { %5385 = vmatprep.mubr.msk.f32.mxu1 %vm7032_vm7, %v7031_v25  ;;  %5538 = vmatpush3.bf16.msra.mxu1 %v5537_v35  ;;  %v6009_v35 = vld [vmem:[%s7787_s19 + $0x48] ss:$16 sps:$4 sm:$0xff]  }
 0x818   : > { %5539 = vmatprep.subr.bf16.mxu1 %v7033_v23 }
 0x81b   : > { %5541 = vmatpush3.bf16.msra.mxu1 %v5540_v37 }
 0x81c   : > { %5542 = vmatprep.subr.bf16.mxu1 %v7033_v23 }
 0x81f   : > { %5544 = vmatpush3.bf16.msra.mxu1 %v5543_v40  ;;  %v6017_v40 = vld [vmem:[%s7787_s19 + $0x6c] ss:$16 sps:$4 sm:$0xff]  }
 0x820   : > { %5545 = vmatprep.subr.bf16.mxu1 %v7033_v23  ;;  %v5996_v23 = vld [vmem:[%s7787_s19 + $0x4] ss:$16 sps:$4 sm:$0xff]  }
 0x823   : > { %5547 = vmatpush3.bf16.msra.mxu1 %v5546_v43  ;;  %v6020_v43 = vld [vmem:[%s7787_s19 + $0x84] ss:$16 sps:$4 sm:$0xff]  }
 0x824   : > { %5388 = vmatprep.subr.mxu1 %v7031_v25 }
 0x8e9   : > { %v3032_v24 = vpop.f32.mrb[8].mxu1 }
 0x8ea   : > { %v3038_v26 = vmul.f32 0.25, %v3032_v24  ;;  %v5367_v27 = vpop.f32.mrb[9].mxu1  ;;  %v5997_v24 = vld [vmem:[%s7787_s19 + $0x8] ss:$16 sps:$4 sm:$0xff]  }
 0x8eb   : > { %v3035_v28 = vpop.f32.mrb[10].mxu1  ;;  %v6002_v27 = vld [vmem:[%s7787_s19 + $0x24] ss:$16 sps:$4 sm:$0xff]  }
 0x8ec   : > { %v5368_v31 = vpop.f32.mrb[11].mxu1  ;;  %v3040_v32 = vsel %vm3039_vm8, %v3038_v26, -inf  ;;  %v6005_v28 = vld [vmem:[%s7787_s19 + $0x2c] ss:$16 sps:$4 sm:$0xff]  }
 0x8ed   : > { %3041 = vmax.xlane.f32.xlu1 %v3040_v32  ;;  %v6003_v31 = vld [vmem:[%s7787_s19 + $0x28] ss:$16 sps:$4 sm:$0xff]   ;;  %v6008_v32 = vld [vmem:[%s7787_s19 + $0x44] ss:$16 sps:$4 sm:$0xff]  }
 0x97a   : > { %v3042_v44 = vpop.xlane.xlu1 %3041 }
 0x97b   : > { %v3043_v45 = vsub.f32 %v3038_v26, %v3042_v44  ;;  %v5999_v26 = vld [vmem:[%s7787_s19 + $0xc] ss:$16 sps:$4 sm:$0xff]  }
 0x97c   : > { %v6023_v44 = vld [vmem:[%s7787_s19 + $0x8c] ss:$16 sps:$4 sm:$0xff]  }
 0x97d   : > { %v3044_v50 = vmul.f32 1.442695, %v3043_v45  ;;  %v6018_v45 = vld [vmem:[%s7787_s19 + $0x80] ss:$16 sps:$4 sm:$0xff]  }
 0x97f   : > { %6076 = vpow2.f32 %v3044_v50  ;;  %v6021_v50 = vld [vmem:[%s7787_s19 + $0x88] ss:$16 sps:$4 sm:$0xff]  }
 0x989   : > { %v6077_v51 = vpop.eup %6076 }
 0x98a   : > { %5386 = vmatmul.mubr.msk.f32.vlgmr.msra.gmra.mrb[12].mxu1 %vm3039_vm8, %v6077_v51 }
 0x98b   : > { %5390 = vmatprep.mubr.msk.f32.mxu1 %vm7032_vm7, %v7031_v25  ;;  %5389 = vmatpush3.msra.mxu1 %v3128_v52  ;;  %v6029_v52 = vld [vmem:[%s7787_s19 + $0xac] ss:$16 sps:$4 sm:$0xff]  }
 0x98c   : > { %5393 = vmatprep.subr.bf16.mxu1 %v7031_v25 }
 0xa5d   : > { %v3123_v53 = vpop.f32.mrb[12].mxu1 }
 0xa5e   : > { %6078 = vrcp.f32 %v3123_v53  ;;  %v5387_v54 = vpop.f32.mrb[13].mxu1  ;;  %v6024_v53 = vld [vmem:[%s7787_s19 + $0xa0] ss:$16 sps:$4 sm:$0xff]  }
 0xa5f   : > { %v6027_v54 = vld [vmem:[%s7787_s19 + $0xa8] ss:$16 sps:$4 sm:$0xff]  }
 0xa68   : > { %v6079_v55 = vpop.eup %6078 }
 0xa69   : > { %5391 = vmatmul.mubr.msk.f32.vlgmr.msra.gmra.mrb[14].mxu1 %vm3129_vm9, %v6079_v55  ;;  %v6032_v55 = vld [vmem:[%s7787_s19 + $0xc4] ss:$16 sps:$4 sm:$0xff]  }
 0xa6a   : > { %5394 = vmatpush3.bf16.msra.mxu1 %v2993_v58  ;;  %5401 = vmatprep.mubr.msk.bf16.mxu1 %vm7032_vm7, %v7031_v25  ;;  %v5990_v58 = vld [vmem:[%s7770_s11 + $0x20] sm:$0xff]  }
 0xa6b   : > { %5395 = vmatprep.subr.bf16.mxu1 %v7031_v25  ;;  %5414 = vmatpush3.bf16.msra.mxu0 %v5990_v58  ;;  %v6041_v58 = vld [vmem:[%s7787_s19 + $0xec] ss:$16 sps:$4 sm:$0xff]  }
 0xa6c   : > { %5415 = vmatprep.subr.bf16.mxu0 %v7031_v25 }
 0xa6e   : > { %5396 = vmatpush3.bf16.msra.mxu1 %v2994_v0 }
 0xa6f   : > { %5397 = vmatprep.subr.bf16.mxu1 %v7031_v25  ;;  %5416 = vmatpush3.bf16.msra.mxu0 %v5991_v59  ;;  %v6036_v59 = vld [vmem:[%s7787_s19 + $0xe0] ss:$16 sps:$4 sm:$0xff]  }
 0xa70   : > { %5417 = vmatprep.subr.bf16.mxu0 %v7031_v25 }
 0xa72   : > { %5398 = vmatpush3.bf16.msra.mxu1 %v2995_v7  ;;  %v5993_v7 = vld [vmem:[%s7770_s11 + $0x38] sm:$0xff]   ;;  %s8400_s11 = scalar_lea.vmem [#allocation36], %s7753_s22 }
 0xa73   : > { %5399 = vmatprep.subr.bf16.mxu1 %v7031_v25  ;;  %5418 = vmatpush3.bf16.msra.mxu0 %v5992_v62  ;;  %v6039_v62 = vld [vmem:[%s7787_s19 + $0xe8] ss:$16 sps:$4 sm:$0xff]  }
 0xa74   : > { %5419 = vmatprep.subr.bf16.mxu0 %v7031_v25  ;;  %v4965_v25 = vld [vmem:[%s8399_s26] ss:$0 sm:$0xff] }
 0xa76   : > { %5400 = vmatpush3.bf16.msra.mxu1 %v2996_v12 }
 0xa77   : > { %5420 = vmatpush3.bf16.msra.mxu0 %v5993_v7  ;;  %3591 = vmatprep.subr.bf16.mxu1 %v5996_v23  ;;  %v3373_v7 = vadd.f32 1.0, %v7962_v6  ;;  %v6046_v6 = vld [vmem:[%s7773_s7 + $0x48] sm:$0xff]   ;;  %v6054_v23 = vld [vmem:[%s7773_s7 + $0x58] sm:$0xff]  }
 0xa78   : > { %3632 = vmatprep.subr.bf16.mxu0 %v5999_v26  ;;  %v6056_v26 = vld [vmem:[%s7773_s7 + $0x18] sm:$0xff]  }
 0xb3c   : > { %v3199_v63 = vpop.f32.mrb[14].mxu1 }
 0xb3d   : > { %v3203_v0 = vmul.f32 %v6077_v51, %v3199_v63  ;;  %v5392_v2 = vpop.f32.mrb[15].mxu1  ;;  %v6026_v51 = vld [vmem:[%s7787_s19 + $0xa4] ss:$16 sps:$4 sm:$0xff]  }
 0xb3f   : > { %v3204_v5 = vpack.c.bf16 %v3203_v0, %v3203_v0 }
 0xb41   : > { %5402 = vmatmul.mubr.msk.bf16.vlgmr.msra.gmra.mrb[16].mxu1 %vm3039_vm8, %v3204_v5 }
 0xb42   : > { %3623 = vmatprep.mubr.bf16.mxu1 %v7030_v33 }
 0xc14   : > { %v3242_v8 = vpop.f32.mrb[16].mxu1 }
 0xc15   : > { %v3248_v10 = vpack.c.bf16 %v3242_v8, %v3242_v8  ;;  %v5403_v12 = vpop.f32.mrb[17].mxu1 }
 0xc16   : > { %v3245_v13 = vpop.f32.mrb[18].mxu1 }
 0xc17   : > { %v5404_v9 = vpop.f32.mrb[19].mxu1  ;;  %5422 = vmatmul.mubr.bf16.vlgmr.msra.gmra.mrb[12].mxu0 %v3248_v10 }
 0xc18   : > { %3664 = vmatprep.mubr.bf16.mxu0 %v7030_v33  ;;  %v5994_v33 = vld [vmem:[%s7787_s19] ss:$16 sps:$4 sm:$0xff]   ;;  %3633 = vmatpush1.bf16.msra.mxu0 %v5997_v24  ;;  %v6042_v9 = vld [vmem:[%s7773_s7 + $0x40] sm:$0xff]  }
 0xc19   : > { %3592 = vmatpush1.bf16.msra.mxu1 %v5994_v33  ;;  %3634 = vmatprep.subr.bf16.mxu0 %v6005_v28  ;;  %v6053_v33 = vld [vmem:[%s7773_s7 + $0x90] sm:$0xff]   ;;  %v6055_v24 = vld [vmem:[%s7773_s7 + $0xd8] sm:$0xff]   ;;  %v6058_v28 = vld [vmem:[%s7773_s7 + $0x60] sm:$0xff]  }
 0xc1a   : > { %3593 = vmatprep.subr.bf16.mxu1 %v6002_v27  ;;  %v6057_v27 = vld [vmem:[%s7773_s7 + $0x98] sm:$0xff]  }
 0xc1c   : > { %3635 = vmatpush1.bf16.msra.mxu0 %v6003_v31  ;;  %v6060_v31 = vld [vmem:[%s7773_s7 + $0x20] sm:$0xff]  }
 0xc1d   : > { %3636 = vmatprep.subr.bf16.mxu0 %v6011_v29  ;;  %v6062_v29 = vld [vmem:[%s7773_s7 + $0x68] sm:$0xff]  }
 0xc20   : > { %3637 = vmatpush1.bf16.msra.mxu0 %v6009_v35  ;;  %v6064_v35 = vld [vmem:[%s7773_s7 + $0x28] sm:$0xff]  }
 0xc21   : > { %3638 = vmatprep.subr.bf16.mxu0 %v6017_v40  ;;  %v6070_v40 = vld [vmem:[%s7773_s7 + $0x78] sm:$0xff]  }
 0xc24   : > { %3639 = vmatpush1.bf16.msra.mxu0 %v6015_v42  ;;  %v6072_v42 = vld [vmem:[%s7773_s7 + $0x38] sm:$0xff]  }
 0xc25   : > { %3640 = vmatprep.subr.bf16.mxu0 %v6023_v44  ;;  %v3409_v44 = vld [vmem:[%s7793_s8] sm:$0xf]  ;;  %s8401_s8 = sld [smem:[#allocation82_spill]] }
 0xc28   : > { %3641 = vmatpush1.bf16.msra.mxu0 %v6021_v50  ;;  %v3422_v50 = vrot.slane %v3409_v44, %v7952_v60 }
 0xc29   : > { %3642 = vmatprep.subr.bf16.mxu0 %v6029_v52  ;;  %v3426_v52 = vrot.slane %v3409_v44, %v2312_v61 }
 0xc2b   : > { %p5039_p1 = scmp.ne.s32.totalorder %s8401_s8, 1 }
 0xc2c   : > { %3643 = vmatpush1.bf16.msra.mxu0 %v6027_v54  ;;  %s8402_s22 = sld [smem:[#allocation77_spill]] (!%p5039_p1)  ;;  %vm7036_vm14 = vmmov (!%p5039_p1), 0   ;;  %s8404_s4 = sld [smem:[#allocation78_spill]] (!%p5039_p1) }
 0xc2d   : > { %3644 = vmatprep.subr.bf16.mxu0 %v6035_v46 }
 0xc30   : > { %3645 = vmatpush1.bf16.msra.mxu0 %v6033_v48 }
 0xc31   : > { %3646 = vmatprep.subr.bf16.mxu0 %v6041_v58 }
 0xc34   : > { %3647 = vmatpush1.bf16.msra.mxu0 %v6039_v62 }
 0xcea   : > { %v3354_v14 = vpop.f32.mrb[12].mxu0 }
 0xceb   : > { %v3355_v16 = vadd.f32 %v4965_v25, %v3354_v14  ;;  %v5423_v17 = vpop.f32.mrb[13].mxu0  ;;  %v6043_v25 = vld [vmem:[%s7773_s7 + $0xc0] sm:$0xff]  }
 0xcec   : > { %v3357_v19 = vpop.f32.mrb[14].mxu0  ;;  %v6044_v14 = vld [vmem:[%s7773_s7] sm:$0xff]   ;;  %5212 = vmatprep.subr.bf16.mxu0 %v6043_v25  ;;  %v6047_v17 = vld [vmem:[%s7773_s7 + $0xc8] sm:$0xff]  }
 0xced   : > { %v3360_v20 = vmul.f32 %v3355_v16, %v7958_v1  ;;  %v5424_v3 = vpop.f32.mrb[15].mxu0  ;;  %v6000_v1 = vld [vmem:[%s7787_s19 + $0x20] ss:$16 sps:$4 sm:$0xff]   ;;  %v6045_v16 = vld [vmem:[%s7773_s7 + $0x80] sm:$0xff]  }
 0xcee   : > { %3594 = vmatpush1.bf16.msra.mxu1 %v6000_v1  ;;  %v6049_v19 = vld [vmem:[%s7773_s7 + $0x88] sm:$0xff]   ;;  %v6051_v3 = vld [vmem:[%s7773_s7 + $0xd0] sm:$0xff]   ;;  %v6059_v1 = vld [vmem:[%s7773_s7 + $0xe0] sm:$0xff]  }
 0xcef   : > { %v8073_v22 = vadd.f32 %v6098_v21, %v3360_v20  ;;  %3595 = vmatprep.subr.bf16.mxu1 %v6008_v32  ;;  %v6050_v20 = vld [vmem:[%s7773_s7 + $0x50] sm:$0xff]   ;;  %v6061_v32 = vld [vmem:[%s7773_s7 + $0xa0] sm:$0xff]  }
 0xcf0   : > { %v6052_v21 = vld [vmem:[%s7773_s7 + $0x10] sm:$0xff]  }
 0xcf1   : > { %3362 = vadd.xlane.f32.xlu1 %v8073_v22 }
 0xcf2   : > { %3596 = vmatpush1.bf16.msra.mxu1 %v6006_v34  ;;  %v6063_v34 = vld [vmem:[%s7773_s7 + $0xe8] sm:$0xff]  }
 0xcf3   : > { %3597 = vmatprep.subr.bf16.mxu1 %v6014_v39  ;;  %v6069_v39 = vld [vmem:[%s7773_s7 + $0xb0] sm:$0xff]  }
 0xcf6   : > { %3598 = vmatpush1.bf16.msra.mxu1 %v6012_v41  ;;  %v6071_v41 = vld [vmem:[%s7773_s7 + $0xf8] sm:$0xff]  }
 0xcf7   : > { %3599 = vmatprep.subr.bf16.mxu1 %v6020_v43  ;;  %v6073_v43 = vld [vmem:[%s7773_s7 + $0xb8] sm:$0xff]  }
 0xcfa   : > { %3600 = vmatpush1.bf16.msra.mxu1 %v6018_v45  ;;  %v3414_v45 = vrot.slane %v3409_v44, %v7971_v18 }
 0xcfb   : > { %3601 = vmatprep.subr.bf16.mxu1 %v6026_v51  ;;  %v3418_v51 = vrot.slane %v3409_v44, %v7967_v15 }
 0xcfe   : > { %3602 = vmatpush1.bf16.msra.mxu1 %v6024_v53 }
 0xcff   : > { %3603 = vmatprep.subr.bf16.mxu1 %v6032_v55 }
 0xd02   : > { %3604 = vmatpush1.bf16.msra.mxu1 %v6030_v47 }
 0xd03   : > { %3605 = vmatprep.subr.bf16.mxu1 %v6038_v56 }
 0xd06   : > { %3606 = vmatpush1.bf16.msra.mxu1 %v6036_v59 }
 0xd07   : > { %5190 = vmatprep.subr.bf16.mxu1 %v6042_v9 }
 0xd7e   : > { %v3363_v36 = vpop.xlane.xlu1 %3362 }
 0xd7f   : > { %v3364_v30 = vmul.f32 0.0078125, %v3363_v36  ;;  %v6065_v36 = vld [vmem:[%s7773_s7 + $0xa8] sm:$0xff]  }
 0xd81   : > { %v3365_v37 = vsub.f32 %v8073_v22, %v3364_v30  ;;  %v6066_v30 = vld [vmem:[%s7773_s7 + $0x70] sm:$0xff]  }
 0xd83   : > { %v3366_v38 = vmul.f32 %v3365_v37, %v3365_v37 }
 0xd85   : > { %3367 = vadd.xlane.f32.xlu0 %v3366_v38  ;;  %v6068_v38 = vld [vmem:[%s7773_s7 + $0x30] sm:$0xff]  }
 0xe12   : > { %v3368_v63 = vpop.xlane.xlu0 %3367 }
 0xe13   : > { %v3369_v0 = vmul.f32 0.0078125, %v3368_v63 }
 0xe15   : > { %v3370_v2 = vadd.f32 0.0001, %v3369_v0 }
 0xe17   : > { %6080 = vrsqrt.f32 %v3370_v2 }
 0xe21   : > { %v6081_v5 = vpop.eup %6080 }
 0xe22   : > { %v3372_v8 = vmul.f32 %v6081_v5, %v3365_v37  ;;  %v6067_v37 = vld [vmem:[%s7773_s7 + $0xf0] sm:$0xff]  }
 0xe24   : > { %v3374_v10 = vmul.f32 %v3373_v7, %v3372_v8 }
 0xe26   : > { %v3375_v12 = vadd.f32 %v3374_v10, %v7960_v4  ;;  %v6048_v4 = vld [vmem:[%s7773_s7 + $0x8] sm:$0xff]   ;;  %s8403_s7 = smov (!%p5039_p1), %s8402_s22 }
 0xe28   : > { %v3376_v13 = vpack.c.bf16 %v3375_v12, %v3375_v12 }
 0xe2a   : > { %3624 = vmatmul.mubr.bf16.vlgmr.msra.gmra.mrb[20].mxu1 %v3376_v13  ;;  %3665 = vmatmul.mubr.bf16.vlgmr.msra.gmra.mrb[16].mxu0 %v3376_v13 }
 0xe2b   : > { %5191 = vmatpush3.bf16.msra.mxu1 %v6044_v14  ;;  %5213 = vmatpush3.bf16.msra.mxu0 %v6045_v16 }
 0xe2c   : > { %5192 = vmatprep.subr.bf16.mxu1 %v6046_v6  ;;  %5214 = vmatprep.subr.bf16.mxu0 %v6047_v17 }
 0xe2f   : > { %5193 = vmatpush3.bf16.msra.mxu1 %v6048_v4  ;;  %5215 = vmatpush3.bf16.msra.mxu0 %v6049_v19 }
 0xe30   : > { %5194 = vmatprep.subr.bf16.mxu1 %v6050_v20  ;;  %5216 = vmatprep.subr.bf16.mxu0 %v6051_v3 }
 0xe33   : > { %5195 = vmatpush3.bf16.msra.mxu1 %v6052_v21  ;;  %5217 = vmatpush3.bf16.msra.mxu0 %v6053_v33 }
 0xe34   : > { %5196 = vmatprep.subr.bf16.mxu1 %v6054_v23  ;;  %5218 = vmatprep.subr.bf16.mxu0 %v6055_v24 }
 0xe37   : > { %5197 = vmatpush3.bf16.msra.mxu1 %v6056_v26  ;;  %5219 = vmatpush3.bf16.msra.mxu0 %v6057_v27 }
 0xe38   : > { %5198 = vmatprep.subr.bf16.mxu1 %v6058_v28  ;;  %5220 = vmatprep.subr.bf16.mxu0 %v6059_v1 }
 0xe3b   : > { %5199 = vmatpush3.bf16.msra.mxu1 %v6060_v31  ;;  %5221 = vmatpush3.bf16.msra.mxu0 %v6061_v32 }
 0xe3c   : > { %5200 = vmatprep.subr.bf16.mxu1 %v6062_v29  ;;  %5222 = vmatprep.subr.bf16.mxu0 %v6063_v34 }
 0xe3f   : > { %5201 = vmatpush3.bf16.msra.mxu1 %v6064_v35  ;;  %5223 = vmatpush3.bf16.msra.mxu0 %v6065_v36 }
 0xe40   : > { %5202 = vmatprep.subr.bf16.mxu1 %v6066_v30  ;;  %5224 = vmatprep.subr.bf16.mxu0 %v6067_v37 }
 0xe43   : > { %5203 = vmatpush3.bf16.msra.mxu1 %v6068_v38  ;;  %5225 = vmatpush3.bf16.msra.mxu0 %v6069_v39 }
 0xe44   : > { %5204 = vmatprep.subr.bf16.mxu1 %v6070_v40  ;;  %5226 = vmatprep.subr.bf16.mxu0 %v6071_v41 }
 0xe47   : > { %5205 = vmatpush3.bf16.msra.mxu1 %v6072_v42  ;;  %5227 = vmatpush3.bf16.msra.mxu0 %v6073_v43 }
 0xefd   : > { %v3625_v53 = vpop.f32.mrb[20].mxu1  ;;  %v3666_v54 = vpop.f32.mrb[16].mxu0 }
 0xefe   : > { %v8149_v55 = vadd.f32 %v3625_v53, %v3414_v45  ;;  %v8151_v46 = vadd.f32 %v3666_v54, %v3422_v50  ;;  %v3627_v47 = vpop.f32.mrb[21].mxu1  ;;  %v3668_v48 = vpop.f32.mrb[17].mxu0 }
 0xeff   : > { %v8153_v56 = vadd.f32 %v3627_v47, %v3418_v51  ;;  %v8155_v58 = vadd.f32 %v3668_v48, %v3426_v52  ;;  %v3629_v59 = vpop.f32.mrb[22].mxu1  ;;  %v3670_v62 = vpop.f32.mrb[18].mxu0 }
 0xf00   : > { %v8158_v60 = vmul.f32 0.70710677, %v8149_v55  ;;  %v8161_v49 = vmul.f32 0.70710677, %v8151_v46  ;;  %v3630_v14 = vpop.f32.mrb[23].mxu1  ;;  %v3671_v16 = vpop.f32.mrb[19].mxu0 }
 0xf01   : > { %v8164_v61 = vmul.f32 0.70710677, %v8153_v56  ;;  %v8167_v63 = vmul.f32 0.70710677, %v8155_v58 }
 0xf02   : > { %v3681_v0 = vand.u32 2147483647, %v8158_v60  ;;  %v3683_v2 = vand.u32 2147483647, %v8161_v49  ;;  %vm3757_vm10 = vcmp.ge.f32.partialorder %v8158_v60, 0.0  ;;  %vm3759_vm11 = vcmp.ge.f32.partialorder %v8161_v49, 0.0 }
 0xf03   : > { %v3682_v5 = vand.u32 2147483647, %v8164_v61  ;;  %v3684_v7 = vand.u32 2147483647, %v8167_v63  ;;  %vm3758_vm12 = vcmp.ge.f32.partialorder %v8164_v61, 0.0  ;;  %vm3760_vm13 = vcmp.ge.f32.partialorder %v8167_v63, 0.0 }
 0xf04   : > { %v3685_v8 = vmul.f32 0.3275911, %v3681_v0  ;;  %v3687_v10 = vmul.f32 0.3275911, %v3683_v2  ;;  %v3733_v4 = vsub.f32 0.0, %v3681_v0  ;;  %v3735_v19 = vsub.f32 0.0, %v3683_v2 }
 0xf05   : > { %v3686_v12 = vmul.f32 0.3275911, %v3682_v5  ;;  %v3688_v25 = vmul.f32 0.3275911, %v3684_v7  ;;  %v3734_v21 = vsub.f32 0.0, %v3682_v5  ;;  %v3736_v27 = vsub.f32 0.0, %v3684_v7 }
 0xf06   : > { %v3689_v13 = vadd.f32 1.0, %v3685_v8  ;;  %v3691_v9 = vadd.f32 1.0, %v3687_v10  ;;  %v3737_v3 = vmul.f32 %v3733_v4, %v3681_v0  ;;  %v3739_v24 = vmul.f32 %v3735_v19, %v3683_v2  ;;  %v5006_v63 = vld [vmem:[%s8400_s11] ss:$0 sm:$0xff] }
 0xf07   : > { %v3690_v6 = vadd.f32 1.0, %v3686_v12  ;;  %v3692_v17 = vadd.f32 1.0, %v3688_v25  ;;  %v3738_v29 = vmul.f32 %v3734_v21, %v3682_v5  ;;  %v3740_v38 = vmul.f32 %v3736_v27, %v3684_v7 }
 0xf08   : > { %6082 = vrcp.f32 %v3689_v13  ;;  %v3741_v31 = vmul.f32 1.442695, %v3737_v3  ;;  %v3745_v35 = vmul.f32 1.442695, %v3739_v24  ;;  %v3675_v49 = vmul.f32 0.5, %v8151_v46 }
 0xf09   : > { %6084 = vrcp.f32 %v3691_v9  ;;  %v3743_v43 = vmul.f32 1.442695, %v3738_v29  ;;  %v3747_v52 = vmul.f32 1.442695, %v3740_v38 }
 0xf0a   : > { %6086 = vrcp.f32 %v3690_v6 }
 0xf0b   : > { %6088 = vrcp.f32 %v3692_v17 }
 0xf0c   : > { %6090 = vpow2.f32 %v3741_v31 }
 0xf0d   : > { %6092 = vpow2.f32 %v3745_v35 }
 0xf0e   : > { %6094 = vpow2.f32 %v3743_v43 }
 0xf0f   : > { %6096 = vpow2.f32 %v3747_v52 }
 0xf12   : > { %v6083_v20 = vpop.eup %6082 }
 0xf13   : > { %v6085_v33 = vpop.eup %6084  ;;  %v3697_v23 = vmul.f32 1.0614054, %v6083_v20 }
 0xf14   : > { %v3699_v26 = vmul.f32 1.0614054, %v6085_v33  ;;  %v6087_v1 = vpop.eup %6086 }
 0xf15   : > { %v3701_v28 = vadd.f32 -1.4531521, %v3697_v23  ;;  %v3698_v36 = vmul.f32 1.0614054, %v6087_v1  ;;  %v6089_v30 = vpop.eup %6088 }
 0xf16   : > { %v3703_v32 = vadd.f32 -1.4531521, %v3699_v26  ;;  %v3700_v41 = vmul.f32 1.0614054, %v6089_v30  ;;  %v6091_v25 = vpop.eup %6090 }
 0xf17   : > { %v3705_v34 = vmul.f32 %v6083_v20, %v3701_v28  ;;  %v3702_v40 = vadd.f32 -1.4531521, %v3698_v36  ;;  %v6093_v16 = vpop.eup %6092 }
 0xf18   : > { %v3707_v37 = vmul.f32 %v6085_v33, %v3703_v32  ;;  %v3704_v50 = vadd.f32 -1.4531521, %v3700_v41  ;;  %v6095_v24 = vpop.eup %6094  ;;  %v3674_v41 = vmul.f32 0.5, %v8153_v56 }
 0xf19   : > { %v3709_v39 = vadd.f32 1.4214138, %v3705_v34  ;;  %v3706_v45 = vmul.f32 %v6087_v1, %v3702_v40  ;;  %v6097_v32 = vpop.eup %6096 }
 0xf1a   : > { %v3711_v42 = vadd.f32 1.4214138, %v3707_v37  ;;  %v3708_v47 = vmul.f32 %v6089_v30, %v3704_v50 }
 0xf1b   : > { %v3713_v44 = vmul.f32 %v6083_v20, %v3709_v39  ;;  %v3710_v54 = vadd.f32 1.4214138, %v3706_v45 }
 0xf1c   : > { %v3715_v51 = vmul.f32 %v6085_v33, %v3711_v42  ;;  %v3712_v0 = vadd.f32 1.4214138, %v3708_v47 }
 0xf1d   : > { %v3717_v53 = vadd.f32 -0.28449672, %v3713_v44  ;;  %v3714_v62 = vmul.f32 %v6087_v1, %v3710_v54  ;;  %v3676_v44 = vmul.f32 0.5, %v8155_v58 }
 0xf1e   : > { %v3719_v48 = vadd.f32 -0.28449672, %v3715_v51  ;;  %v3716_v8 = vmul.f32 %v6089_v30, %v3712_v0 }
 0xf1f   : > { %v3721_v59 = vmul.f32 %v6083_v20, %v3717_v53  ;;  %v3718_v7 = vadd.f32 -0.28449672, %v3714_v62 }
 0xf20   : > { %v3723_v2 = vmul.f32 %v6085_v33, %v3719_v48  ;;  %v3720_v9 = vadd.f32 -0.28449672, %v3716_v8 }
 0xf21   : > { %v3725_v5 = vadd.f32 0.2548296, %v3721_v59  ;;  %v3722_v13 = vmul.f32 %v6087_v1, %v3718_v7 }
 0xf22   : > { %v3727_v10 = vadd.f32 0.2548296, %v3723_v2  ;;  %v3724_v4 = vmul.f32 %v6089_v30, %v3720_v9  ;;  %v6101_v9 = vld [vmem:[#allocation37] ss:$8 sps:$4 sm:$0xff] (!%p5039_p1)  }
 0xf23   : > { %v3729_v12 = vmul.f32 %v6083_v20, %v3725_v5  ;;  %v3726_v17 = vadd.f32 0.2548296, %v3722_v13  ;;  %v6099_v13 = vld [vmem:[#allocation37 + $0x4] ss:$8 sps:$4 sm:$0xff] (!%p5039_p1)  }
 0xf24   : > { %v3731_v14 = vmul.f32 %v6085_v33, %v3727_v10  ;;  %v3728_v23 = vadd.f32 0.2548296, %v3724_v4  ;;  %4239 = vmatprep.subr.bf16.mxu0 (!%p5039_p1), %v6099_v13  ;;  %v6111_v4 = vld [vmem:[#allocation37 + $0x44] ss:$8 sps:$4 sm:$0xff] (!%p5039_p1)  }
 0xf25   : > { %v3749_v6 = vmul.f32 %v6091_v25, %v3729_v12  ;;  %v3730_v21 = vmul.f32 %v6087_v1, %v3726_v17  ;;  %v3673_v1 = vmul.f32 0.5, %v8149_v55  ;;  %v7034_v25 = vmov (!%p5039_p1), 0   ;;  %v6110_v17 = vld [vmem:[#allocation37 + $0x30] ss:$8 sps:$4 sm:$0xff] (!%p5039_p1)  }
 0xf26   : > { %v3751_v19 = vmul.f32 %v6093_v16, %v3731_v14  ;;  %v3732_v31 = vmul.f32 %v6089_v30, %v3728_v23  ;;  %v6102_v14 = vld [vmem:[#allocation37 + $0x14] ss:$8 sps:$4 sm:$0xff] (!%p5039_p1)   ;;  %v6104_v16 = vld [vmem:[#allocation37 + $0x10] ss:$8 sps:$4 sm:$0xff] (!%p5039_p1)   ;;  %v6117_v23 = vld [vmem:[#allocation37 + $0x64] ss:$8 sps:$4 sm:$0xff] (!%p5039_p1)  }
 0xf27   : > { %v3753_v3 = vsub.f32 1.0, %v3749_v6  ;;  %v3750_v28 = vmul.f32 %v6095_v24, %v3730_v21  ;;  %v6105_v6 = vld [vmem:[#allocation37 + $0x24] ss:$8 sps:$4 sm:$0xff] (!%p5039_p1)   ;;  %v6116_v21 = vld [vmem:[#allocation37 + $0x50] ss:$8 sps:$4 sm:$0xff] (!%p5039_p1)  }
 0xf28   : > { %v3755_v26 = vsub.f32 1.0, %v3751_v19  ;;  %v3752_v34 = vmul.f32 %v6097_v32, %v3732_v31  ;;  %v6113_v19 = vld [vmem:[#allocation37 + $0x40] ss:$8 sps:$4 sm:$0xff] (!%p5039_p1)   ;;  %v6123_v24 = vld [vmem:[%s8402_s22] sm:$0xff] (!%p5039_p1)  }
 0xf29   : > { %v3761_v27 = vsub.f32 0.0, %v3753_v3  ;;  %v3754_v33 = vsub.f32 1.0, %v3750_v28  ;;  %v6119_v28 = vld [vmem:[#allocation37 + $0x60] ss:$8 sps:$4 sm:$0xff] (!%p5039_p1)   ;;  %v6120_v31 = vld [vmem:[#allocation37 + $0x74] ss:$8 sps:$4 sm:$0xff] (!%p5039_p1)  }
 0xf2a   : > { %v3763_v20 = vsub.f32 0.0, %v3755_v26  ;;  %v3756_v38 = vsub.f32 1.0, %v3752_v34  ;;  %v6122_v32 = vld [vmem:[#allocation37 + $0x70] ss:$8 sps:$4 sm:$0xff] (!%p5039_p1)  }
 0xf2b   : > { %v3765_v29 = vsel %vm3757_vm10, %v3753_v3, %v3761_v27  ;;  %v3762_v37 = vsub.f32 0.0, %v3754_v33  ;;  %v6114_v3 = vld [vmem:[#allocation37 + $0x54] ss:$8 sps:$4 sm:$0xff] (!%p5039_p1)   ;;  %v6124_v27 = vld [vmem:[%s8403_s7 + $0x8] sm:$0xff] (!%p5039_p1)  }
 0xf2c   : > { %v3767_v35 = vsel %vm3759_vm11, %v3755_v26, %v3763_v20  ;;  %v3769_v36 = vadd.f32 1.0, %v3765_v29  ;;  %v3764_v30 = vsub.f32 0.0, %v3756_v38  ;;  %v7035_v26 = vmov (!%p5039_p1), 0.0  }
 0xf2d   : > { %v3771_v39 = vadd.f32 1.0, %v3767_v35  ;;  %v3766_v40 = vsel %vm3758_vm12, %v3754_v33, %v3762_v37  ;;  %5425 = vmatprep.subr.bf16.mxu1 (!%p5039_p1), %v7035_v26  ;;  %v6125_v35 = vld [vmem:[%s8403_s7 + $0x10] sm:$0xff] (!%p5039_p1)   ;;  %v6127_v37 = vld [vmem:[%s8403_s7 + $0x20] sm:$0xff] (!%p5039_p1)  }
 0xf2e   : > { %v3770_v60 = vadd.f32 1.0, %v3766_v40  ;;  %v3773_v42 = vmul.f32 %v3769_v36, %v3673_v1  ;;  %v3768_v43 = vsel %vm3760_vm13, %v3756_v38, %v3764_v30  ;;  %v6126_v36 = vld [vmem:[%s8403_s7 + $0x18] sm:$0xff] (!%p5039_p1)   ;;  %v6128_v38 = vld [vmem:[%s8403_s7 + $0x28] sm:$0xff] (!%p5039_p1)  }
 0xf2f   : > { %v3772_v50 = vadd.f32 1.0, %v3768_v43  ;;  %v3775_v61 = vmul.f32 %v3771_v39, %v3675_v49  ;;  %v6130_v1 = vld [vmem:[%s8403_s7 + $0x38] sm:$0xff] (!%p5039_p1)   ;;  %v4147_v43 = vld [vmem:[#allocation38] sm:$0x3] (!%p5039_p1) }
 0xf30   : > { %v3774_v45 = vmul.f32 %v3770_v60, %v3674_v41  ;;  %v3777_v52 = vpack.c.bf16 %v3773_v42, %v3773_v42 }
 0xf31   : > { %v3776_v55 = vmul.f32 %v3772_v50, %v3676_v44  ;;  %v3779_v54 = vpack.c.bf16 %v3775_v61, %v3775_v61  ;;  %v4156_v44 = vrot.slane (!%p5039_p1), %v4147_v43, %v7967_v15  ;;  %v4152_v50 = vrot.slane (!%p5039_p1), %v4147_v43, %v7971_v18 }
 0xf32   : > { %v3778_v51 = vpack.c.bf16 %v3774_v45, %v3774_v45 }
 0xf33   : > { %v3780_v53 = vpack.c.bf16 %v3776_v55, %v3776_v55 }
 0xf34   : > { %4076 = vmatprep.mubr.bf16.mxu1 %v3778_v51 }
 0xf35   : > { %4077 = vmatmul.mubr.bf16.vlgmr.msra.gmra.mrb[24].mxu1 %v3777_v52  ;;  %4116 = vmatprep.mubr.bf16.mxu0 %v3780_v53 }
 0xf36   : > { %4117 = vmatmul.mubr.bf16.vlgmr.msra.gmra.mrb[20].mxu0 %v3779_v54  ;;  %5426 = vmatpush3.bf16.msra.mxu1 (!%p5039_p1), %v6123_v24 }
 0xf37   : > { %4271 = vmatprep.mubr.bf16.mxu0 (!%p5039_p1), %v7034_v25  ;;  %4240 = vmatpush1.bf16.msra.mxu0 (!%p5039_p1), %v6101_v9 }
 0xf38   : > { %4241 = vmatprep.subr.bf16.mxu0 (!%p5039_p1), %v6102_v14  ;;  %5427 = vmatprep.subr.bf16.mxu1 (!%p5039_p1), %v7035_v26 }
 0xf39   : > { %5441 = vmatprep.mubr.msk.bf16.mxu1 (!%p5039_p1), %vm7036_vm14, %v7035_v26 }
 0xf3a   : > { %5428 = vmatpush3.bf16.msra.mxu1 (!%p5039_p1), %v6124_v27 }
 0xf3b   : > { %4242 = vmatpush1.bf16.msra.mxu0 (!%p5039_p1), %v6104_v16  ;;  %5429 = vmatprep.subr.bf16.mxu1 (!%p5039_p1), %v7035_v26 }
 0xf3c   : > { %4243 = vmatprep.subr.bf16.mxu0 (!%p5039_p1), %v6105_v6 }
 0xf3e   : > { %5430 = vmatpush3.bf16.msra.mxu1 (!%p5039_p1), %v6125_v35 }
 0xf3f   : > { %5431 = vmatprep.subr.bf16.mxu1 (!%p5039_p1), %v7035_v26 }
 0xf42   : > { %5432 = vmatpush3.bf16.msra.mxu1 (!%p5039_p1), %v6126_v36 }
 0xf43   : > { %5433 = vmatprep.subr.bf16.mxu1 (!%p5039_p1), %v7035_v26 }
 0xf46   : > { %5434 = vmatpush3.bf16.msra.mxu1 (!%p5039_p1), %v6127_v37 }
 0xf47   : > { %5435 = vmatprep.subr.bf16.mxu1 (!%p5039_p1), %v7035_v26 }
 0xf4a   : > { %5436 = vmatpush3.bf16.msra.mxu1 (!%p5039_p1), %v6128_v38 }
 0xf4b   : > { %5437 = vmatprep.subr.bf16.mxu1 (!%p5039_p1), %v7035_v26 }
0x1008   : > { %v5206_v56 = vpop.f32.mrb[24].mxu1 }
0x1009   : > { %v5207_v46 = vpop.f32.mrb[25].mxu1  ;;  %v5228_v47 = vpop.f32.mrb[20].mxu0 }
0x100a   : > { %v5208_v48 = vadd.f32 %v5207_v46, %v5206_v56  ;;  %v5209_v59 = vpop.f32.mrb[26].mxu1  ;;  %v5229_v58 = vpop.f32.mrb[21].mxu0 }
0x100b   : > { %v5210_v62 = vpop.f32.mrb[27].mxu1  ;;  %v5230_v2 = vadd.f32 %v5229_v58, %v5228_v47  ;;  %v5231_v5 = vpop.f32.mrb[22].mxu0 }
0x100c   : > { %v4079_v0 = vadd.f32 %v5208_v48, %v5006_v63  ;;  %v5232_v7 = vpop.f32.mrb[23].mxu0  ;;  %v5056_v63 = vld [vmem:[%s8404_s4] ss:$0 sm:$0xff] (!%p5039_p1) }
0x100e   : > { %v4119_v8 = vadd.f32 %v5230_v2, %v4079_v0  ;;  %4130 = sbr.rel (%p5039_p1) target bundleno = 4644 (0x1224), region = 268 }
0x1010   : > { %v4124_v10 = vmul.f32 %v4119_v8, %v7964_v11  ;;  %v6107_v11 = vld [vmem:[#allocation37 + $0x20] ss:$8 sps:$4 sm:$0xff] (!%p5039_p1)  }
0x1011   : > { %4244 = vmatpush1.bf16.msra.mxu0 (!%p5039_p1), %v6107_v11 }
0x1012   : > { %v4125_v12 = vadd.f32 %v4124_v10, %v8073_v22  ;;  %v6108_v22 = vld [vmem:[#allocation37 + $0x34] ss:$8 sps:$4 sm:$0xff] (!%p5039_p1)  }
0x1013   : > { %4245 = vmatprep.subr.bf16.mxu0 (!%p5039_p1), %v6108_v22 }
0x1014   : > { %4126 = vst [vmem:[#allocation2] sm:$0xff] %v4125_v12  ;;  %4280 = vadd.xlane.f32.xlu0 (!%p5039_p1), %v4125_v12 }
0x1015   : > { %4246 = vmatpush1.bf16.msra.mxu0 %v6110_v17 }
0x1016   : > { %4247 = vmatprep.subr.bf16.mxu0 %v6111_v4 }
0x1019   : > { %4248 = vmatpush1.bf16.msra.mxu0 %v6113_v19 }
0x101a   : > { %4249 = vmatprep.subr.bf16.mxu0 %v6114_v3 }
0x101d   : > { %4250 = vmatpush1.bf16.msra.mxu0 %v6116_v21 }
0x101e   : > { %4251 = vmatprep.subr.bf16.mxu0 %v6117_v23 }
0x1021   : > { %4252 = vmatpush1.bf16.msra.mxu0 %v6119_v28 }
0x1022   : > { %4253 = vmatprep.subr.bf16.mxu0 %v6120_v31 }
0x1025   : > { %4254 = vmatpush1.bf16.msra.mxu0 %v6122_v32 }
0x1028   : > { %4272 = vmatmul.mubr.bf16.vlgmr.msra.gmra.mrb[0].mxu0 %v7874_v57  ;;  %v6129_v57 = vld [vmem:[%s8403_s7 + $0x30] sm:$0xff]  }
0x1029   : > { %5438 = vmatpush3.bf16.msra.mxu1 %v6129_v57 }
0x102a   : > { %5439 = vmatprep.subr.bf16.mxu1 %v7035_v26 }
0x102d   : > { %5440 = vmatpush3.bf16.msra.mxu1 %v6130_v1 }
0x10a1   : > { %v4281_v20 = vpop.xlane.xlu0 %4280 }
0x10a2   : > { %v4282_v29 = vmul.f32 0.0078125, %v4281_v20 }
0x10a4   : > { %v4283_v33 = vsub.f32 %v4125_v12, %v4282_v29 }
0x10a6   : > { %v4284_v34 = vmul.f32 %v4283_v33, %v4283_v33 }
0x10a8   : > { %4285 = vadd.xlane.f32.xlu0 %v4284_v34 }
0x10fb   : > { %v4273_v39 = vpop.f32.mrb[0].mxu0 }
0x10fc   : > { %v4275_v40 = vpop.f32.mrb[1].mxu0  ;;  %v4274_v52 = vadd.f32 %v4273_v39, %v4152_v50 }
0x10fd   : > { %v4277_v30 = vpop.f32.mrb[2].mxu0  ;;  %v4276_v45 = vadd.f32 %v4275_v40, %v4156_v44 }
0x10fe   : > { %v4278_v41 = vpop.f32.mrb[3].mxu0 }
0x10ff   : > { %v4291_v61 = vadd.f32 1.0, %v4276_v45 }
0x1135   : > { %v4286_v60 = vpop.xlane.xlu0 %4285 }
0x1136   : > { %v4287_v42 = vmul.f32 0.0078125, %v4286_v60 }
0x1138   : > { %v4288_v49 = vadd.f32 0.0001, %v4287_v42 }
0x113a   : > { %6131 = vrsqrt.f32 %v4288_v49 }
0x1144   : > { %v6132_v51 = vpop.eup %6131 }
0x1145   : > { %v4290_v55 = vmul.f32 %v6132_v51, %v4283_v33 }
0x1147   : > { %v4292_v53 = vmul.f32 %v4291_v61, %v4290_v55 }
0x1149   : > { %v4293_v54 = vadd.f32 %v4292_v53, %v4274_v52 }
0x114b   : > { %v4294_v56 = vpack.c.bf16 %v4293_v54, %v4293_v54 }
0x114d   : > { %5442 = vmatmul.mubr.bf16.vlgmr.msra.gmra.mrb[0].mxu1 %v4294_v56 }
0x1220   : > { %v4400_v46 = vpop.f32.mrb[0].mxu1 }
0x1221   : > { %v4401_v47 = vadd.f32 %v5056_v63, %v4400_v46  ;;  %v5443_v48 = vpop.f32.mrb[1].mxu1 }
0x1222   : > { %v4403_v59 = vpop.f32.mrb[2].mxu1 }
0x1223   : > { %4406 = vst [vmem:[#allocation39] sm:$0xff] %v4401_v47  ;;  %v5444_v58 = vpop.f32.mrb[3].mxu1 }
0x1224 PF: > { %s8405_s23 = sld [smem:[#allocation82_spill]]  ;;  %s7037_s28 = smov [#allocation39]  }
0x1225   : > { %s4414_s0 = sshll.u32 %s7037_s28, 4  ;;  %s4415_s0 = int_to_ptr.vmem [resolvable:$true] %s4414_s0 }
0x1226   : > { %s6847_s19 = scalar_lea.vmem %s4415_s0, 128  ;;  %p6854_p4 = scmp.lt.s32.totalorder %s4415_s0, %s4415_s0 }
0x1227   : > { %p6848_p11 = scmp.ne.s32.totalorder %s4415_s0, %s6847_s19  ;;  %p6855_p9 = scmp.lt.s32.totalorder %s6847_s19, %s6847_s19 }
0x1229   : > { %p6856_p13 = por %p6855_p9, %p6854_p4 }
0x122a   : > { %p5766_p6 = scmp.eq.s32.totalorder %s8405_s23, 1 }
0x122c   : > { %p6849_p8 = pnand %p6848_p11, %p5766_p6 }
0x122e   : > { %p6850_p3 = pneg %p6849_p8 }
0x1230   : > { %p6857_p10 = pnand %p6856_p13, %p6850_p3 }
0x1232   : > { %6860 = shalt.err (!%p6857_p10)
}
0x1233   : > { %s8406_s5 = sld [smem:[#allocation79_spill]] }
0x1239   : > { %s6861_s16 = scalar_lea.hbm %s8406_s5, 128 }
0x123a   : > { %p6862_p5 = scmp.ne.s32.totalorder %s8406_s5, %s6861_s16  ;;  %p6867_p12 = scmp.lt.u32.totalorder %s6861_s16, %s8406_s5 }
0x123c   : > { %p6863_p2 = pnand %p6862_p5, %p5766_p6 }
0x123e   : > { %p6864_p7 = pneg %p6863_p2 }
0x1240   : > { %p6869_p0 = pnand %p6867_p12, %p6864_p7 }
0x1242   : > { %6872 = shalt.err (!%p6869_p0)
}
0x1243   : > { %5649 = dma.vmem_to_hbm [thread:$0]  (%p5766_p6), %s4415_s0, 128, %s8406_s5, [#allocation6]  }
0x1244   : > { %6938 = dma.done.wait (%p5766_p6), [#allocation6], 128  }
0x1245   : > { %6940 = vsyncadd (%p5766_p6), [#allocation6], 4294967168 }
0x1246 PF: > { %s8407_s28 = sld [smem:[#allocation84_spill]]  ;;  %s8408_s22 = sld [smem:[#allocation80_spill]] }
0x1247   : > { %s8409_s23 = sld [smem:[#allocation81_spill]]  ;;  %s8410_s26 = sld [smem:[#allocation85_spill]] }
0x124c   : > { %p88_p1 = scmp.ge.s32.totalorder %s8407_s28, 4  }
0x124e   :  { %90 = sbr.rel (!%p88_p1) target bundleno = 84 (0x54), region = 386 }
0x1255   :  { %4427 = vsyncpa [#allocation5], 1 }
0x1256   :  { %4429 = vsyncpa [#allocation5 + $0x1], 1 }
0x1257   :  { %4430 = vsyncpa [#allocation8], 1 }
0x1258   :  { %4431 = vsyncpa [#allocation11], 1 }
0x1259   :  { %4432 = vsyncpa [#allocation14], 1 }
0x125a   :  { %4433 = vsyncpa [#allocation17], 1 }
0x125b   :  { %4434 = vsyncpa [#allocation20], 1 }
0x125c   :  { %4435 = vsyncpa [#allocation23], 1 }
0x125d   :  { %4436 = vsyncpa [#allocation26], 1 }
0x125e   :  { %4437 = vsyncpa [#allocation29], 1 }
0x125f   :  { %4438 = vsyncpa [#allocation6], 1 }
0x1260   :  { %4440 = vsyncpa [#allocation6 + $0x1], 1 }

</bundles_post_ra>
